<compile_context>
chip_gen: v5e
topology: v5e:2x2
jax: 0.10.0
libtpu: 0.0.40
codegen_flags: <defaults>
</compile_context>

<pallas_src>
import functools

import jax
import jax.numpy as jnp
from jax.experimental import pallas as pl
from jax.experimental.pallas import tpu as pltpu


# ----------------------------------------------------------------------------
# Fused kernel factory
# ----------------------------------------------------------------------------
def _make_fused_kernel(T: int, B: int, H: int, L: int):
    """One kernel: L bidirectional LSTM layers + final bias-free Linear."""

    def lstm_cell(gx, h, c, whh):
        # gx already contains x_t @ W_ih^T + (b_ih + b_hh)   -- hoisted.
        gates = gx + jnp.dot(h, whh, preferred_element_type=jnp.float32)  # (B, 4H)
        sig = jax.nn.sigmoid(gates)          # full 4H-lane EUP op
        th = jnp.tanh(gates)                 # full 4H-lane EUP op
        i = sig[:, 0 * H:1 * H]
        f = sig[:, 1 * H:2 * H]
        g = th[:, 2 * H:3 * H]
        o = sig[:, 3 * H:4 * H]
        c_new = f * c + i * g
        h_new = o * jnp.tanh(c_new)
        return h_new, c_new

    def kernel(*refs):
        # refs = (x, [wih_f, whh_f, b_f, wih_b, whh_b, b_b] * L, w_end, out[, seq_scratch])
        x_ref = refs[0]
        wend_ref = refs[1 + 6 * L]
        out_ref = refs[2 + 6 * L]
        seq_ref = refs[3 + 6 * L] if L > 1 else None

        finals = []
        x_cur = x_ref[...]                      # (T*B, F) time-major, layer-0 input

        for l in range(L):
            base = 1 + 6 * l
            wih_f = refs[base + 0][...]         # (Fin, 4H)
            whh_f = refs[base + 1][...]         # (H, 4H)
            b_f = refs[base + 2][...]           # (1, 4H)
            wih_b = refs[base + 3][...]
            whh_b = refs[base + 4][...]
            b_b = refs[base + 5][...]

            # Hoisted input projection: one batched matmul per direction.
            gx_f = jnp.dot(x_cur, wih_f, preferred_element_type=jnp.float32) + b_f
            gx_b = jnp.dot(x_cur, wih_b, preferred_element_type=jnp.float32) + b_b

            z = jnp.zeros((B, H), jnp.float32)
            h_f, c_f, h_b, c_b = z, z, z, z
            write_seq = (l + 1 < L)

            for t in range(T):                  # fully unrolled (T static, small)
                tb = T - 1 - t
                h_f, c_f = lstm_cell(gx_f[t * B:(t + 1) * B, :], h_f, c_f, whh_f)
                h_b, c_b = lstm_cell(gx_b[tb * B:(tb + 1) * B, :], h_b, c_b, whh_b)
                if write_seq:
                    # Inter-layer hidden sequence stays in VMEM scratch.
                    seq_ref[t * B:(t + 1) * B, 0:H] = h_f
                    seq_ref[tb * B:(tb + 1) * B, H:2 * H] = h_b

            finals += [h_f, h_b]                # PyTorch order: layer-major, then dir
            if write_seq:
                # TODO(synk): inter-layer dropout (p=0.6, training mode) omitted;
                # eval-mode semantics implemented.
                x_cur = seq_ref[...]            # (T*B, 2H) next-layer input

        # Final hidden states -> (B, 2*L*H), then the bias-free end Linear.
        h_all = jnp.concatenate(finals, axis=-1)
        out_ref[...] = jnp.dot(h_all, wend_ref[...],
                               preferred_element_type=jnp.float32)

    return kernel


# ----------------------------------------------------------------------------
# Wrapper
# ----------------------------------------------------------------------------
def my_lstm_forward(x, layer_weights, w_end_t, hidden_size, no_layers):
    """x: (B, T, F) batch-first (PyTorch convention).

    layer_weights: tuple over layers of
        (wih_fwd_T, whh_fwd_T, b_fwd, wih_bwd_T, whh_bwd_T, b_bwd)
      with wih_T: (Fin, 4H), whh_T: (H, 4H), b = (b_ih + b_hh): (1, 4H).
    w_end_t: (2*L*H, 1).
    """
    B, T, F = x.shape
    H, L = hidden_size, no_layers

    # time-major, flattened to (T*B, F) so the input projection is one matmul
    x_flat = jnp.transpose(x, (1, 0, 2)).reshape(T * B, F).astype(jnp.float32)
    flat_w = [w for lw in layer_weights for w in lw]

    vmem = pl.BlockSpec(memory_space=pltpu.MemorySpace.VMEM)
    scratch = [pltpu.VMEM((T * B, 2 * H), jnp.float32)] if L > 1 else []

    out = pl.pallas_call(
        _make_fused_kernel(T, B, H, L),
        out_shape=jax.ShapeDtypeStruct((B, 1), jnp.float32),
        in_specs=[vmem] * (2 + 6 * L),
        out_specs=vmem,
        scratch_shapes=scratch,
    )(x_flat, *flat_w, w_end_t)

    return jnp.squeeze(out)     # matches torch.squeeze(out) in the reference module


# ----------------------------------------------------------------------------
# Pure-JAX reference (for an in-script sanity check)
# ----------------------------------------------------------------------------
def _ref_forward(x, layer_weights, w_end_t, hidden_size, no_layers):
    B, T, _ = x.shape
    H = hidden_size
    inp = jnp.transpose(x, (1, 0, 2)).astype(jnp.float32)   # (T, B, F)
    finals = []

    def run_dir(seq_in, wih, whh, b, reverse):
        h = jnp.zeros((B, H), jnp.float32)
        c = jnp.zeros((B, H), jnp.float32)
        out = [None] * T
        order = range(T - 1, -1, -1) if reverse else range(T)
        for t in order:
            g = seq_in[t] @ wih + h @ whh + b
            i = jax.nn.sigmoid(g[:, :H])
            f = jax.nn.sigmoid(g[:, H:2 * H])
            gg = jnp.tanh(g[:, 2 * H:3 * H])
            o = jax.nn.sigmoid(g[:, 3 * H:])
            c = f * c + i * gg
            h = o * jnp.tanh(c)
            out[t] = h
        return jnp.stack(out, 0), h

    for l in range(no_layers):
        wih_f, whh_f, b_f, wih_b, whh_b, b_b = layer_weights[l]
        sf, hf = run_dir(inp, wih_f, whh_f, b_f, False)
        sb, hb = run_dir(inp, wih_b, whh_b, b_b, True)
        finals += [hf, hb]
        inp = jnp.concatenate([sf, sb], axis=-1)
    h_all = jnp.concatenate(finals, axis=-1)
    return jnp.squeeze(h_all @ w_end_t)


# ----------------------------------------------------------------------------
# Parameter init (mirrors the PyTorch module __init__) + one-time packing
# ----------------------------------------------------------------------------
def init_params(key, input_size, hidden_size, no_layers):
    H = hidden_size
    bound = 1.0 / (H ** 0.5)
    params = {}
    for layer in range(no_layers):
        in_f = input_size if layer == 0 else 2 * H
        for d in range(2):
            key, k0, k1, k2, k3, k4, k5 = jax.random.split(key, 7)
            w_ih = jax.random.uniform(k0, (4 * H, in_f), jnp.float32,
                                      minval=-bound, maxval=bound)
            w_hh = jax.random.uniform(k1, (4 * H, H), jnp.float32,
                                      minval=-bound, maxval=bound)
            b_ih = jax.random.uniform(k2, (4 * H,), jnp.float32,
                                      minval=-bound, maxval=bound)
            b_hh = jax.random.uniform(k3, (4 * H,), jnp.float32,
                                      minval=-bound, maxval=bound)
            if layer == 0 and d == 0:
                # xavier_normal_(gain=5) on weight_ih_l0 / weight_hh_l0 only
                std_ih = 5.0 * (2.0 / (in_f + 4 * H)) ** 0.5
                std_hh = 5.0 * (2.0 / (H + 4 * H)) ** 0.5
                w_ih = std_ih * jax.random.normal(k4, (4 * H, in_f), jnp.float32)
                w_hh = std_hh * jax.random.normal(k5, (4 * H, H), jnp.float32)
            params[(layer, d)] = (w_ih, w_hh, b_ih, b_hh)

    key, k_end = jax.random.split(key)
    fan_in = 2 * no_layers * H
    end_bound = 1.0 / (fan_in ** 0.5)
    params["end"] = jax.random.uniform(k_end, (1, fan_in), jnp.float32,
                                       minval=-end_bound, maxval=end_bound)
    return params


def pack_params(params, no_layers):
    """Pre-transpose weights and pre-sum biases once (kept out of the fwd path)."""
    layers = []
    for layer in range(no_layers):
        per_dir = []
        for d in range(2):
            w_ih, w_hh, b_ih, b_hh = params[(layer, d)]
            per_dir += [jnp.transpose(w_ih),                  # (Fin, 4H)
                        jnp.transpose(w_hh),                  # (H, 4H)
                        (b_ih + b_hh).reshape(1, -1)]         # (1, 4H)
        layers.append(tuple(per_dir))
    w_end_t = jnp.transpose(params["end"])                    # (2*L*H, 1)
    return tuple(layers), w_end_t


# ----------------------------------------------------------------------------
if __name__ == "__main__":
    INPUT_SIZE = 16
    HIDDEN_SIZE = 32
    NO_LAYERS = 2
    BATCH = 2
    SEQ = 8

    key = jax.random.PRNGKey(0)
    key, kx, kp = jax.random.split(key, 3)
    x = jax.random.normal(kx, (BATCH, SEQ, INPUT_SIZE), jnp.float32)
    params = init_params(kp, INPUT_SIZE, HIDDEN_SIZE, NO_LAYERS)
    layer_weights, w_end_t = pack_params(params, NO_LAYERS)

    fwd = jax.jit(functools.partial(my_lstm_forward,
                                    hidden_size=HIDDEN_SIZE,
                                    no_layers=NO_LAYERS))
    out = fwd(x, layer_weights, w_end_t)
    out = jax.block_until_ready(out)
    assert out.shape == (BATCH,), out.shape

    # sanity check against a pure-JAX reference
    ref = jax.block_until_ready(
        _ref_forward(x, layer_weights, w_end_t, HIDDEN_SIZE, NO_LAYERS))
    assert jnp.allclose(out, ref, atol=1e-3, rtol=1e-3), (out, ref)

    print("KERNEL_OK")
</pallas_src>

<mosaic_0001>
module attributes {stable_mosaic.version = 11 : i64} {
  func.func @kernel(%arg0: memref<16x16xf32, #tpu.memory_space<vmem>>, %arg1: memref<16x128xf32, #tpu.memory_space<vmem>>, %arg2: memref<32x128xf32, #tpu.memory_space<vmem>>, %arg3: memref<1x128xf32, #tpu.memory_space<vmem>>, %arg4: memref<16x128xf32, #tpu.memory_space<vmem>>, %arg5: memref<32x128xf32, #tpu.memory_space<vmem>>, %arg6: memref<1x128xf32, #tpu.memory_space<vmem>>, %arg7: memref<64x128xf32, #tpu.memory_space<vmem>>, %arg8: memref<32x128xf32, #tpu.memory_space<vmem>>, %arg9: memref<1x128xf32, #tpu.memory_space<vmem>>, %arg10: memref<64x128xf32, #tpu.memory_space<vmem>>, %arg11: memref<32x128xf32, #tpu.memory_space<vmem>>, %arg12: memref<1x128xf32, #tpu.memory_space<vmem>>, %arg13: memref<128x1xf32, #tpu.memory_space<vmem>>, %arg14: memref<2x1xf32, #tpu.memory_space<vmem>>, %arg15: memref<16x64xf32, #tpu.memory_space<vmem>>) attributes {dimension_semantics = [], scalar_prefetch = 0 : i64, scratch_operands = 1 : i64, tpu.core_type = #tpu.core_type<tc>} {
    %c0 = arith.constant 0 : index
    %c0_0 = arith.constant 0 : index
    %0 = vector.load %arg0[%c0, %c0_0] : memref<16x16xf32, #tpu.memory_space<vmem>>, vector<16x16xf32>
    %c0_1 = arith.constant 0 : index
    %c0_2 = arith.constant 0 : index
    %1 = vector.load %arg1[%c0_1, %c0_2] : memref<16x128xf32, #tpu.memory_space<vmem>>, vector<16x128xf32>
    %c0_3 = arith.constant 0 : index
    %c0_4 = arith.constant 0 : index
    %2 = vector.load %arg2[%c0_3, %c0_4] : memref<32x128xf32, #tpu.memory_space<vmem>>, vector<32x128xf32>
    %c0_5 = arith.constant 0 : index
    %c0_6 = arith.constant 0 : index
    %3 = vector.load %arg3[%c0_5, %c0_6] : memref<1x128xf32, #tpu.memory_space<vmem>>, vector<1x128xf32>
    %c0_7 = arith.constant 0 : index
    %c0_8 = arith.constant 0 : index
    %4 = vector.load %arg4[%c0_7, %c0_8] : memref<16x128xf32, #tpu.memory_space<vmem>>, vector<16x128xf32>
    %c0_9 = arith.constant 0 : index
    %c0_10 = arith.constant 0 : index
    %5 = vector.load %arg5[%c0_9, %c0_10] : memref<32x128xf32, #tpu.memory_space<vmem>>, vector<32x128xf32>
    %c0_11 = arith.constant 0 : index
    %c0_12 = arith.constant 0 : index
    %6 = vector.load %arg6[%c0_11, %c0_12] : memref<1x128xf32, #tpu.memory_space<vmem>>, vector<1x128xf32>
    %cst = arith.constant dense<0.000000e+00> : vector<16x128xf32>
    %7 = tpu.matmul %0, %1, %cst {dimension_numbers = #tpu.dot_dimension_numbers<[1], [0], [0], [1], [0, 0, 1, 1], [], []>} : vector<16x16xf32>, vector<16x128xf32>, vector<16x128xf32> -> vector<16x128xf32>
    %8 = vector.broadcast %3 : vector<1x128xf32> to vector<16x128xf32>
    %9 = arith.addf %7, %8 : vector<16x128xf32>
    %cst_13 = arith.constant dense<0.000000e+00> : vector<16x128xf32>
    %10 = tpu.matmul %0, %4, %cst_13 {dimension_numbers = #tpu.dot_dimension_numbers<[1], [0], [0], [1], [0, 0, 1, 1], [], []>} : vector<16x16xf32>, vector<16x128xf32>, vector<16x128xf32> -> vector<16x128xf32>
    %11 = vector.broadcast %6 : vector<1x128xf32> to vector<16x128xf32>
    %12 = arith.addf %10, %11 : vector<16x128xf32>
    %cst_14 = arith.constant 0.000000e+00 : f32
    %13 = vector.broadcast %cst_14 : f32 to vector<2x32xf32>
    %14 = vector.extract_strided_slice %9 {offsets = [0, 0], sizes = [2, 128], strides = [1, 1]} : vector<16x128xf32> to vector<2x128xf32>
    %cst_15 = arith.constant dense<0.000000e+00> : vector<2x128xf32>
    %15 = tpu.matmul %13, %2, %cst_15 {dimension_numbers = #tpu.dot_dimension_numbers<[1], [0], [0], [1], [0, 0, 1, 1], [], []>} : vector<2x32xf32>, vector<32x128xf32>, vector<2x128xf32> -> vector<2x128xf32>
    %16 = arith.addf %14, %15 : vector<2x128xf32>
    %17 = arith.negf %16 : vector<2x128xf32>
    %18 = math.exp %17 : vector<2x128xf32>
    %cst_16 = arith.constant 1.000000e+00 : f32
    %19 = vector.broadcast %cst_16 : f32 to vector<2x128xf32>
    %20 = arith.addf %19, %18 : vector<2x128xf32>
    %21 = arith.divf %19, %20 : vector<2x128xf32>
    %22 = math.tanh %16 : vector<2x128xf32>
    %23 = vector.extract_strided_slice %21 {offsets = [0, 0], sizes = [2, 32], strides = [1, 1]} : vector<2x128xf32> to vector<2x32xf32>
    %24 = vector.extract_strided_slice %21 {offsets = [0, 32], sizes = [2, 32], strides = [1, 1]} : vector<2x128xf32> to vector<2x32xf32>
    %25 = vector.extract_strided_slice %22 {offsets = [0, 64], sizes = [2, 32], strides = [1, 1]} : vector<2x128xf32> to vector<2x32xf32>
    %26 = vector.extract_strided_slice %21 {offsets = [0, 96], sizes = [2, 32], strides = [1, 1]} : vector<2x128xf32> to vector<2x32xf32>
    %27 = arith.mulf %24, %13 : vector<2x32xf32>
    %28 = arith.mulf %23, %25 : vector<2x32xf32>
    %29 = arith.addf %27, %28 : vector<2x32xf32>
    %30 = math.tanh %29 : vector<2x32xf32>
    %31 = arith.mulf %26, %30 : vector<2x32xf32>
    %32 = vector.extract_strided_slice %12 {offsets = [14, 0], sizes = [2, 128], strides = [1, 1]} : vector<16x128xf32> to vector<2x128xf32>
    %cst_17 = arith.constant dense<0.000000e+00> : vector<2x128xf32>
    %33 = tpu.matmul %13, %5, %cst_17 {dimension_numbers = #tpu.dot_dimension_numbers<[1], [0], [0], [1], [0, 0, 1, 1], [], []>} : vector<2x32xf32>, vector<32x128xf32>, vector<2x128xf32> -> vector<2x128xf32>
    %34 = arith.addf %32, %33 : vector<2x128xf32>
    %35 = arith.negf %34 : vector<2x128xf32>
    %36 = math.exp %35 : vector<2x128xf32>
    %cst_18 = arith.constant 1.000000e+00 : f32
    %37 = vector.broadcast %cst_18 : f32 to vector<2x128xf32>
    %38 = arith.addf %37, %36 : vector<2x128xf32>
    %39 = arith.divf %37, %38 : vector<2x128xf32>
    %40 = math.tanh %34 : vector<2x128xf32>
    %41 = vector.extract_strided_slice %39 {offsets = [0, 0], sizes = [2, 32], strides = [1, 1]} : vector<2x128xf32> to vector<2x32xf32>
    %42 = vector.extract_strided_slice %39 {offsets = [0, 32], sizes = [2, 32], strides = [1, 1]} : vector<2x128xf32> to vector<2x32xf32>
    %43 = vector.extract_strided_slice %40 {offsets = [0, 64], sizes = [2, 32], strides = [1, 1]} : vector<2x128xf32> to vector<2x32xf32>
    %44 = vector.extract_strided_slice %39 {offsets = [0, 96], sizes = [2, 32], strides = [1, 1]} : vector<2x128xf32> to vector<2x32xf32>
    %45 = arith.mulf %42, %13 : vector<2x32xf32>
    %46 = arith.mulf %41, %43 : vector<2x32xf32>
    %47 = arith.addf %45, %46 : vector<2x32xf32>
    %48 = math.tanh %47 : vector<2x32xf32>
    %49 = arith.mulf %44, %48 : vector<2x32xf32>
    %c0_19 = arith.constant 0 : index
    %c0_20 = arith.constant 0 : index
    %50 = vector.load %arg15[%c0_19, %c0_20] : memref<16x64xf32, #tpu.memory_space<vmem>>, vector<2x32xf32>
    tpu.vector_store %arg15[%c0_19, %c0_20], %31 {strides = array<i32>} : memref<16x64xf32, #tpu.memory_space<vmem>>, vector<2x32xf32>,
    %c14 = arith.constant 14 : index
    %c32 = arith.constant 32 : index
    %51 = vector.load %arg15[%c14, %c32] : memref<16x64xf32, #tpu.memory_space<vmem>>, vector<2x32xf32>
    tpu.vector_store %arg15[%c14, %c32], %49 {strides = array<i32>} : memref<16x64xf32, #tpu.memory_space<vmem>>, vector<2x32xf32>,
    %52 = vector.extract_strided_slice %9 {offsets = [2, 0], sizes = [2, 128], strides = [1, 1]} : vector<16x128xf32> to vector<2x128xf32>
    %cst_21 = arith.constant dense<0.000000e+00> : vector<2x128xf32>
    %53 = tpu.matmul %31, %2, %cst_21 {dimension_numbers = #tpu.dot_dimension_numbers<[1], [0], [0], [1], [0, 0, 1, 1], [], []>} : vector<2x32xf32>, vector<32x128xf32>, vector<2x128xf32> -> vector<2x128xf32>
    %54 = arith.addf %52, %53 : vector<2x128xf32>
    %55 = arith.negf %54 : vector<2x128xf32>
    %56 = math.exp %55 : vector<2x128xf32>
    %cst_22 = arith.constant 1.000000e+00 : f32
    %57 = vector.broadcast %cst_22 : f32 to vector<2x128xf32>
    %58 = arith.addf %57, %56 : vector<2x128xf32>
    %59 = arith.divf %57, %58 : vector<2x128xf32>
    %60 = math.tanh %54 : vector<2x128xf32>
    %61 = vector.extract_strided_slice %59 {offsets = [0, 0], sizes = [2, 32], strides = [1, 1]} : vector<2x128xf32> to vector<2x32xf32>
    %62 = vector.extract_strided_slice %59 {offsets = [0, 32], sizes = [2, 32], strides = [1, 1]} : vector<2x128xf32> to vector<2x32xf32>
    %63 = vector.extract_strided_slice %60 {offsets = [0, 64], sizes = [2, 32], strides = [1, 1]} : vector<2x128xf32> to vector<2x32xf32>
    %64 = vector.extract_strided_slice %59 {offsets = [0, 96], sizes = [2, 32], strides = [1, 1]} : vector<2x128xf32> to vector<2x32xf32>
    %65 = arith.mulf %62, %29 : vector<2x32xf32>
    %66 = arith.mulf %61, %63 : vector<2x32xf32>
    %67 = arith.addf %65, %66 : vector<2x32xf32>
    %68 = math.tanh %67 : vector<2x32xf32>
    %69 = arith.mulf %64, %68 : vector<2x32xf32>
    %70 = vector.extract_strided_slice %12 {offsets = [12, 0], sizes = [2, 128], strides = [1, 1]} : vector<16x128xf32> to vector<2x128xf32>
    %cst_23 = arith.constant dense<0.000000e+00> : vector<2x128xf32>
    %71 = tpu.matmul %49, %5, %cst_23 {dimension_numbers = #tpu.dot_dimension_numbers<[1], [0], [0], [1], [0, 0, 1, 1], [], []>} : vector<2x32xf32>, vector<32x128xf32>, vector<2x128xf32> -> vector<2x128xf32>
    %72 = arith.addf %70, %71 : vector<2x128xf32>
    %73 = arith.negf %72 : vector<2x128xf32>
    %74 = math.exp %73 : vector<2x128xf32>
    %cst_24 = arith.constant 1.000000e+00 : f32
    %75 = vector.broadcast %cst_24 : f32 to vector<2x128xf32>
    %76 = arith.addf %75, %74 : vector<2x128xf32>
    %77 = arith.divf %75, %76 : vector<2x128xf32>
    %78 = math.tanh %72 : vector<2x128xf32>
    %79 = vector.extract_strided_slice %77 {offsets = [0, 0], sizes = [2, 32], strides = [1, 1]} : vector<2x128xf32> to vector<2x32xf32>
    %80 = vector.extract_strided_slice %77 {offsets = [0, 32], sizes = [2, 32], strides = [1, 1]} : vector<2x128xf32> to vector<2x32xf32>
    %81 = vector.extract_strided_slice %78 {offsets = [0, 64], sizes = [2, 32], strides = [1, 1]} : vector<2x128xf32> to vector<2x32xf32>
    %82 = vector.extract_strided_slice %77 {offsets = [0, 96], sizes = [2, 32], strides = [1, 1]} : vector<2x128xf32> to vector<2x32xf32>
    %83 = arith.mulf %80, %47 : vector<2x32xf32>
    %84 = arith.mulf %79, %81 : vector<2x32xf32>
    %85 = arith.addf %83, %84 : vector<2x32xf32>
    %86 = math.tanh %85 : vector<2x32xf32>
    %87 = arith.mulf %82, %86 : vector<2x32xf32>
    %c2 = arith.constant 2 : index
    %c0_25 = arith.constant 0 : index
    %88 = vector.load %arg15[%c2, %c0_25] : memref<16x64xf32, #tpu.memory_space<vmem>>, vector<2x32xf32>
    tpu.vector_store %arg15[%c2, %c0_25], %69 {strides = array<i32>} : memref<16x64xf32, #tpu.memory_space<vmem>>, vector<2x32xf32>,
    %c12 = arith.constant 12 : index
    %c32_26 = arith.constant 32 : index
    %89 = vector.load %arg15[%c12, %c32_26] : memref<16x64xf32, #tpu.memory_space<vmem>>, vector<2x32xf32>
    tpu.vector_store %arg15[%c12, %c32_26], %87 {strides = array<i32>} : memref<16x64xf32, #tpu.memory_space<vmem>>, vector<2x32xf32>,
    %90 = vector.extract_strided_slice %9 {offsets = [4, 0], sizes = [2, 128], strides = [1, 1]} : vector<16x128xf32> to vector<2x128xf32>
    %cst_27 = arith.constant dense<0.000000e+00> : vector<2x128xf32>
    %91 = tpu.matmul %69, %2, %cst_27 {dimension_numbers = #tpu.dot_dimension_numbers<[1], [0], [0], [1], [0, 0, 1, 1], [], []>} : vector<2x32xf32>, vector<32x128xf32>, vector<2x128xf32> -> vector<2x128xf32>
    %92 = arith.addf %90, %91 : vector<2x128xf32>
    %93 = arith.negf %92 : vector<2x128xf32>
    %94 = math.exp %93 : vector<2x128xf32>
    %cst_28 = arith.constant 1.000000e+00 : f32
    %95 = vector.broadcast %cst_28 : f32 to vector<2x128xf32>
    %96 = arith.addf %95, %94 : vector<2x128xf32>
    %97 = arith.divf %95, %96 : vector<2x128xf32>
    %98 = math.tanh %92 : vector<2x128xf32>
    %99 = vector.extract_strided_slice %97 {offsets = [0, 0], sizes = [2, 32], strides = [1, 1]} : vector<2x128xf32> to vector<2x32xf32>
    %100 = vector.extract_strided_slice %97 {offsets = [0, 32], sizes = [2, 32], strides = [1, 1]} : vector<2x128xf32> to vector<2x32xf32>
    %101 = vector.extract_strided_slice %98 {offsets = [0, 64], sizes = [2, 32], strides = [1, 1]} : vector<2x128xf32> to vector<2x32xf32>
    %102 = vector.extract_strided_slice %97 {offsets = [0, 96], sizes = [2, 32], strides = [1, 1]} : vector<2x128xf32> to vector<2x32xf32>
    %103 = arith.mulf %100, %67 : vector<2x32xf32>
    %104 = arith.mulf %99, %101 : vector<2x32xf32>
    %105 = arith.addf %103, %104 : vector<2x32xf32>
    %106 = math.tanh %105 : vector<2x32xf32>
    %107 = arith.mulf %102, %106 : vector<2x32xf32>
    %108 = vector.extract_strided_slice %12 {offsets = [10, 0], sizes = [2, 128], strides = [1, 1]} : vector<16x128xf32> to vector<2x128xf32>
    %cst_29 = arith.constant dense<0.000000e+00> : vector<2x128xf32>
    %109 = tpu.matmul %87, %5, %cst_29 {dimension_numbers = #tpu.dot_dimension_numbers<[1], [0], [0], [1], [0, 0, 1, 1], [], []>} : vector<2x32xf32>, vector<32x128xf32>, vector<2x128xf32> -> vector<2x128xf32>
    %110 = arith.addf %108, %109 : vector<2x128xf32>
    %111 = arith.negf %110 : vector<2x128xf32>
    %112 = math.exp %111 : vector<2x128xf32>
    %cst_30 = arith.constant 1.000000e+00 : f32
    %113 = vector.broadcast %cst_30 : f32 to vector<2x128xf32>
    %114 = arith.addf %113, %112 : vector<2x128xf32>
    %115 = arith.divf %113, %114 : vector<2x128xf32>
    %116 = math.tanh %110 : vector<2x128xf32>
    %117 = vector.extract_strided_slice %115 {offsets = [0, 0], sizes = [2, 32], strides = [1, 1]} : vector<2x128xf32> to vector<2x32xf32>
    %118 = vector.extract_strided_slice %115 {offsets = [0, 32], sizes = [2, 32], strides = [1, 1]} : vector<2x128xf32> to vector<2x32xf32>
    %119 = vector.extract_strided_slice %116 {offsets = [0, 64], sizes = [2, 32], strides = [1, 1]} : vector<2x128xf32> to vector<2x32xf32>
    %120 = vector.extract_strided_slice %115 {offsets = [0, 96], sizes = [2, 32], strides = [1, 1]} : vector<2x128xf32> to vector<2x32xf32>
    %121 = arith.mulf %118, %85 : vector<2x32xf32>
    %122 = arith.mulf %117, %119 : vector<2x32xf32>
    %123 = arith.addf %121, %122 : vector<2x32xf32>
    %124 = math.tanh %123 : vector<2x32xf32>
    %125 = arith.mulf %120, %124 : vector<2x32xf32>
    %c4 = arith.constant 4 : index
    %c0_31 = arith.constant 0 : index
    %126 = vector.load %arg15[%c4, %c0_31] : memref<16x64xf32, #tpu.memory_space<vmem>>, vector<2x32xf32>
    tpu.vector_store %arg15[%c4, %c0_31], %107 {strides = array<i32>} : memref<16x64xf32, #tpu.memory_space<vmem>>, vector<2x32xf32>,
    %c10 = arith.constant 10 : index
    %c32_32 = arith.constant 32 : index
    %127 = vector.load %arg15[%c10, %c32_32] : memref<16x64xf32, #tpu.memory_space<vmem>>, vector<2x32xf32>
    tpu.vector_store %arg15[%c10, %c32_32], %125 {strides = array<i32>} : memref<16x64xf32, #tpu.memory_space<vmem>>, vector<2x32xf32>,
    %128 = vector.extract_strided_slice %9 {offsets = [6, 0], sizes = [2, 128], strides = [1, 1]} : vector<16x128xf32> to vector<2x128xf32>
    %cst_33 = arith.constant dense<0.000000e+00> : vector<2x128xf32>
    %129 = tpu.matmul %107, %2, %cst_33 {dimension_numbers = #tpu.dot_dimension_numbers<[1], [0], [0], [1], [0, 0, 1, 1], [], []>} : vector<2x32xf32>, vector<32x128xf32>, vector<2x128xf32> -> vector<2x128xf32>
    %130 = arith.addf %128, %129 : vector<2x128xf32>
    %131 = arith.negf %130 : vector<2x128xf32>
    %132 = math.exp %131 : vector<2x128xf32>
    %cst_34 = arith.constant 1.000000e+00 : f32
    %133 = vector.broadcast %cst_34 : f32 to vector<2x128xf32>
    %134 = arith.addf %133, %132 : vector<2x128xf32>
    %135 = arith.divf %133, %134 : vector<2x128xf32>
    %136 = math.tanh %130 : vector<2x128xf32>
    %137 = vector.extract_strided_slice %135 {offsets = [0, 0], sizes = [2, 32], strides = [1, 1]} : vector<2x128xf32> to vector<2x32xf32>
    %138 = vector.extract_strided_slice %135 {offsets = [0, 32], sizes = [2, 32], strides = [1, 1]} : vector<2x128xf32> to vector<2x32xf32>
    %139 = vector.extract_strided_slice %136 {offsets = [0, 64], sizes = [2, 32], strides = [1, 1]} : vector<2x128xf32> to vector<2x32xf32>
    %140 = vector.extract_strided_slice %135 {offsets = [0, 96], sizes = [2, 32], strides = [1, 1]} : vector<2x128xf32> to vector<2x32xf32>
    %141 = arith.mulf %138, %105 : vector<2x32xf32>
    %142 = arith.mulf %137, %139 : vector<2x32xf32>
    %143 = arith.addf %141, %142 : vector<2x32xf32>
    %144 = math.tanh %143 : vector<2x32xf32>
    %145 = arith.mulf %140, %144 : vector<2x32xf32>
    %146 = vector.extract_strided_slice %12 {offsets = [8, 0], sizes = [2, 128], strides = [1, 1]} : vector<16x128xf32> to vector<2x128xf32>
    %cst_35 = arith.constant dense<0.000000e+00> : vector<2x128xf32>
    %147 = tpu.matmul %125, %5, %cst_35 {dimension_numbers = #tpu.dot_dimension_numbers<[1], [0], [0], [1], [0, 0, 1, 1], [], []>} : vector<2x32xf32>, vector<32x128xf32>, vector<2x128xf32> -> vector<2x128xf32>
    %148 = arith.addf %146, %147 : vector<2x128xf32>
    %149 = arith.negf %148 : vector<2x128xf32>
    %150 = math.exp %149 : vector<2x128xf32>
    %cst_36 = arith.constant 1.000000e+00 : f32
    %151 = vector.broadcast %cst_36 : f32 to vector<2x128xf32>
    %152 = arith.addf %151, %150 : vector<2x128xf32>
    %153 = arith.divf %151, %152 : vector<2x128xf32>
    %154 = math.tanh %148 : vector<2x128xf32>
    %155 = vector.extract_strided_slice %153 {offsets = [0, 0], sizes = [2, 32], strides = [1, 1]} : vector<2x128xf32> to vector<2x32xf32>
    %156 = vector.extract_strided_slice %153 {offsets = [0, 32], sizes = [2, 32], strides = [1, 1]} : vector<2x128xf32> to vector<2x32xf32>
    %157 = vector.extract_strided_slice %154 {offsets = [0, 64], sizes = [2, 32], strides = [1, 1]} : vector<2x128xf32> to vector<2x32xf32>
    %158 = vector.extract_strided_slice %153 {offsets = [0, 96], sizes = [2, 32], strides = [1, 1]} : vector<2x128xf32> to vector<2x32xf32>
    %159 = arith.mulf %156, %123 : vector<2x32xf32>
    %160 = arith.mulf %155, %157 : vector<2x32xf32>
    %161 = arith.addf %159, %160 : vector<2x32xf32>
    %162 = math.tanh %161 : vector<2x32xf32>
    %163 = arith.mulf %158, %162 : vector<2x32xf32>
    %c6 = arith.constant 6 : index
    %c0_37 = arith.constant 0 : index
    %164 = vector.load %arg15[%c6, %c0_37] : memref<16x64xf32, #tpu.memory_space<vmem>>, vector<2x32xf32>
    tpu.vector_store %arg15[%c6, %c0_37], %145 {strides = array<i32>} : memref<16x64xf32, #tpu.memory_space<vmem>>, vector<2x32xf32>,
    %c8 = arith.constant 8 : index
    %c32_38 = arith.constant 32 : index
    %165 = vector.load %arg15[%c8, %c32_38] : memref<16x64xf32, #tpu.memory_space<vmem>>, vector<2x32xf32>
    tpu.vector_store %arg15[%c8, %c32_38], %163 {strides = array<i32>} : memref<16x64xf32, #tpu.memory_space<vmem>>, vector<2x32xf32>,
    %166 = vector.extract_strided_slice %9 {offsets = [8, 0], sizes = [2, 128], strides = [1, 1]} : vector<16x128xf32> to vector<2x128xf32>
    %cst_39 = arith.constant dense<0.000000e+00> : vector<2x128xf32>
    %167 = tpu.matmul %145, %2, %cst_39 {dimension_numbers = #tpu.dot_dimension_numbers<[1], [0], [0], [1], [0, 0, 1, 1], [], []>} : vector<2x32xf32>, vector<32x128xf32>, vector<2x128xf32> -> vector<2x128xf32>
    %168 = arith.addf %166, %167 : vector<2x128xf32>
    %169 = arith.negf %168 : vector<2x128xf32>
    %170 = math.exp %169 : vector<2x128xf32>
    %cst_40 = arith.constant 1.000000e+00 : f32
    %171 = vector.broadcast %cst_40 : f32 to vector<2x128xf32>
    %172 = arith.addf %171, %170 : vector<2x128xf32>
    %173 = arith.divf %171, %172 : vector<2x128xf32>
    %174 = math.tanh %168 : vector<2x128xf32>
    %175 = vector.extract_strided_slice %173 {offsets = [0, 0], sizes = [2, 32], strides = [1, 1]} : vector<2x128xf32> to vector<2x32xf32>
    %176 = vector.extract_strided_slice %173 {offsets = [0, 32], sizes = [2, 32], strides = [1, 1]} : vector<2x128xf32> to vector<2x32xf32>
    %177 = vector.extract_strided_slice %174 {offsets = [0, 64], sizes = [2, 32], strides = [1, 1]} : vector<2x128xf32> to vector<2x32xf32>
    %178 = vector.extract_strided_slice %173 {offsets = [0, 96], sizes = [2, 32], strides = [1, 1]} : vector<2x128xf32> to vector<2x32xf32>
    %179 = arith.mulf %176, %143 : vector<2x32xf32>
    %180 = arith.mulf %175, %177 : vector<2x32xf32>
    %181 = arith.addf %179, %180 : vector<2x32xf32>
    %182 = math.tanh %181 : vector<2x32xf32>
    %183 = arith.mulf %178, %182 : vector<2x32xf32>
    %184 = vector.extract_strided_slice %12 {offsets = [6, 0], sizes = [2, 128], strides = [1, 1]} : vector<16x128xf32> to vector<2x128xf32>
    %cst_41 = arith.constant dense<0.000000e+00> : vector<2x128xf32>
    %185 = tpu.matmul %163, %5, %cst_41 {dimension_numbers = #tpu.dot_dimension_numbers<[1], [0], [0], [1], [0, 0, 1, 1], [], []>} : vector<2x32xf32>, vector<32x128xf32>, vector<2x128xf32> -> vector<2x128xf32>
    %186 = arith.addf %184, %185 : vector<2x128xf32>
    %187 = arith.negf %186 : vector<2x128xf32>
    %188 = math.exp %187 : vector<2x128xf32>
    %cst_42 = arith.constant 1.000000e+00 : f32
    %189 = vector.broadcast %cst_42 : f32 to vector<2x128xf32>
    %190 = arith.addf %189, %188 : vector<2x128xf32>
    %191 = arith.divf %189, %190 : vector<2x128xf32>
    %192 = math.tanh %186 : vector<2x128xf32>
    %193 = vector.extract_strided_slice %191 {offsets = [0, 0], sizes = [2, 32], strides = [1, 1]} : vector<2x128xf32> to vector<2x32xf32>
    %194 = vector.extract_strided_slice %191 {offsets = [0, 32], sizes = [2, 32], strides = [1, 1]} : vector<2x128xf32> to vector<2x32xf32>
    %195 = vector.extract_strided_slice %192 {offsets = [0, 64], sizes = [2, 32], strides = [1, 1]} : vector<2x128xf32> to vector<2x32xf32>
    %196 = vector.extract_strided_slice %191 {offsets = [0, 96], sizes = [2, 32], strides = [1, 1]} : vector<2x128xf32> to vector<2x32xf32>
    %197 = arith.mulf %194, %161 : vector<2x32xf32>
    %198 = arith.mulf %193, %195 : vector<2x32xf32>
    %199 = arith.addf %197, %198 : vector<2x32xf32>
    %200 = math.tanh %199 : vector<2x32xf32>
    %201 = arith.mulf %196, %200 : vector<2x32xf32>
    %c8_43 = arith.constant 8 : index
    %c0_44 = arith.constant 0 : index
    %202 = vector.load %arg15[%c8_43, %c0_44] : memref<16x64xf32, #tpu.memory_space<vmem>>, vector<2x32xf32>
    tpu.vector_store %arg15[%c8_43, %c0_44], %183 {strides = array<i32>} : memref<16x64xf32, #tpu.memory_space<vmem>>, vector<2x32xf32>,
    %c6_45 = arith.constant 6 : index
    %c32_46 = arith.constant 32 : index
    %203 = vector.load %arg15[%c6_45, %c32_46] : memref<16x64xf32, #tpu.memory_space<vmem>>, vector<2x32xf32>
    tpu.vector_store %arg15[%c6_45, %c32_46], %201 {strides = array<i32>} : memref<16x64xf32, #tpu.memory_space<vmem>>, vector<2x32xf32>,
    %204 = vector.extract_strided_slice %9 {offsets = [10, 0], sizes = [2, 128], strides = [1, 1]} : vector<16x128xf32> to vector<2x128xf32>
    %cst_47 = arith.constant dense<0.000000e+00> : vector<2x128xf32>
    %205 = tpu.matmul %183, %2, %cst_47 {dimension_numbers = #tpu.dot_dimension_numbers<[1], [0], [0], [1], [0, 0, 1, 1], [], []>} : vector<2x32xf32>, vector<32x128xf32>, vector<2x128xf32> -> vector<2x128xf32>
    %206 = arith.addf %204, %205 : vector<2x128xf32>
    %207 = arith.negf %206 : vector<2x128xf32>
    %208 = math.exp %207 : vector<2x128xf32>
    %cst_48 = arith.constant 1.000000e+00 : f32
    %209 = vector.broadcast %cst_48 : f32 to vector<2x128xf32>
    %210 = arith.addf %209, %208 : vector<2x128xf32>
    %211 = arith.divf %209, %210 : vector<2x128xf32>
    %212 = math.tanh %206 : vector<2x128xf32>
    %213 = vector.extract_strided_slice %211 {offsets = [0, 0], sizes = [2, 32], strides = [1, 1]} : vector<2x128xf32> to vector<2x32xf32>
    %214 = vector.extract_strided_slice %211 {offsets = [0, 32], sizes = [2, 32], strides = [1, 1]} : vector<2x128xf32> to vector<2x32xf32>
    %215 = vector.extract_strided_slice %212 {offsets = [0, 64], sizes = [2, 32], strides = [1, 1]} : vector<2x128xf32> to vector<2x32xf32>
    %216 = vector.extract_strided_slice %211 {offsets = [0, 96], sizes = [2, 32], strides = [1, 1]} : vector<2x128xf32> to vector<2x32xf32>
    %217 = arith.mulf %214, %181 : vector<2x32xf32>
    %218 = arith.mulf %213, %215 : vector<2x32xf32>
    %219 = arith.addf %217, %218 : vector<2x32xf32>
    %220 = math.tanh %219 : vector<2x32xf32>
    %221 = arith.mulf %216, %220 : vector<2x32xf32>
    %222 = vector.extract_strided_slice %12 {offsets = [4, 0], sizes = [2, 128], strides = [1, 1]} : vector<16x128xf32> to vector<2x128xf32>
    %cst_49 = arith.constant dense<0.000000e+00> : vector<2x128xf32>
    %223 = tpu.matmul %201, %5, %cst_49 {dimension_numbers = #tpu.dot_dimension_numbers<[1], [0], [0], [1], [0, 0, 1, 1], [], []>} : vector<2x32xf32>, vector<32x128xf32>, vector<2x128xf32> -> vector<2x128xf32>
    %224 = arith.addf %222, %223 : vector<2x128xf32>
    %225 = arith.negf %224 : vector<2x128xf32>
    %226 = math.exp %225 : vector<2x128xf32>
    %cst_50 = arith.constant 1.000000e+00 : f32
    %227 = vector.broadcast %cst_50 : f32 to vector<2x128xf32>
    %228 = arith.addf %227, %226 : vector<2x128xf32>
    %229 = arith.divf %227, %228 : vector<2x128xf32>
    %230 = math.tanh %224 : vector<2x128xf32>
    %231 = vector.extract_strided_slice %229 {offsets = [0, 0], sizes = [2, 32], strides = [1, 1]} : vector<2x128xf32> to vector<2x32xf32>
    %232 = vector.extract_strided_slice %229 {offsets = [0, 32], sizes = [2, 32], strides = [1, 1]} : vector<2x128xf32> to vector<2x32xf32>
    %233 = vector.extract_strided_slice %230 {offsets = [0, 64], sizes = [2, 32], strides = [1, 1]} : vector<2x128xf32> to vector<2x32xf32>
    %234 = vector.extract_strided_slice %229 {offsets = [0, 96], sizes = [2, 32], strides = [1, 1]} : vector<2x128xf32> to vector<2x32xf32>
    %235 = arith.mulf %232, %199 : vector<2x32xf32>
    %236 = arith.mulf %231, %233 : vector<2x32xf32>
    %237 = arith.addf %235, %236 : vector<2x32xf32>
    %238 = math.tanh %237 : vector<2x32xf32>
    %239 = arith.mulf %234, %238 : vector<2x32xf32>
    %c10_51 = arith.constant 10 : index
    %c0_52 = arith.constant 0 : index
    %240 = vector.load %arg15[%c10_51, %c0_52] : memref<16x64xf32, #tpu.memory_space<vmem>>, vector<2x32xf32>
    tpu.vector_store %arg15[%c10_51, %c0_52], %221 {strides = array<i32>} : memref<16x64xf32, #tpu.memory_space<vmem>>, vector<2x32xf32>,
    %c4_53 = arith.constant 4 : index
    %c32_54 = arith.constant 32 : index
    %241 = vector.load %arg15[%c4_53, %c32_54] : memref<16x64xf32, #tpu.memory_space<vmem>>, vector<2x32xf32>
    tpu.vector_store %arg15[%c4_53, %c32_54], %239 {strides = array<i32>} : memref<16x64xf32, #tpu.memory_space<vmem>>, vector<2x32xf32>,
    %242 = vector.extract_strided_slice %9 {offsets = [12, 0], sizes = [2, 128], strides = [1, 1]} : vector<16x128xf32> to vector<2x128xf32>
    %cst_55 = arith.constant dense<0.000000e+00> : vector<2x128xf32>
    %243 = tpu.matmul %221, %2, %cst_55 {dimension_numbers = #tpu.dot_dimension_numbers<[1], [0], [0], [1], [0, 0, 1, 1], [], []>} : vector<2x32xf32>, vector<32x128xf32>, vector<2x128xf32> -> vector<2x128xf32>
    %244 = arith.addf %242, %243 : vector<2x128xf32>
    %245 = arith.negf %244 : vector<2x128xf32>
    %246 = math.exp %245 : vector<2x128xf32>
    %cst_56 = arith.constant 1.000000e+00 : f32
    %247 = vector.broadcast %cst_56 : f32 to vector<2x128xf32>
    %248 = arith.addf %247, %246 : vector<2x128xf32>
    %249 = arith.divf %247, %248 : vector<2x128xf32>
    %250 = math.tanh %244 : vector<2x128xf32>
    %251 = vector.extract_strided_slice %249 {offsets = [0, 0], sizes = [2, 32], strides = [1, 1]} : vector<2x128xf32> to vector<2x32xf32>
    %252 = vector.extract_strided_slice %249 {offsets = [0, 32], sizes = [2, 32], strides = [1, 1]} : vector<2x128xf32> to vector<2x32xf32>
    %253 = vector.extract_strided_slice %250 {offsets = [0, 64], sizes = [2, 32], strides = [1, 1]} : vector<2x128xf32> to vector<2x32xf32>
    %254 = vector.extract_strided_slice %249 {offsets = [0, 96], sizes = [2, 32], strides = [1, 1]} : vector<2x128xf32> to vector<2x32xf32>
    %255 = arith.mulf %252, %219 : vector<2x32xf32>
    %256 = arith.mulf %251, %253 : vector<2x32xf32>
    %257 = arith.addf %255, %256 : vector<2x32xf32>
    %258 = math.tanh %257 : vector<2x32xf32>
    %259 = arith.mulf %254, %258 : vector<2x32xf32>
    %260 = vector.extract_strided_slice %12 {offsets = [2, 0], sizes = [2, 128], strides = [1, 1]} : vector<16x128xf32> to vector<2x128xf32>
    %cst_57 = arith.constant dense<0.000000e+00> : vector<2x128xf32>
    %261 = tpu.matmul %239, %5, %cst_57 {dimension_numbers = #tpu.dot_dimension_numbers<[1], [0], [0], [1], [0, 0, 1, 1], [], []>} : vector<2x32xf32>, vector<32x128xf32>, vector<2x128xf32> -> vector<2x128xf32>
    %262 = arith.addf %260, %261 : vector<2x128xf32>
    %263 = arith.negf %262 : vector<2x128xf32>
    %264 = math.exp %263 : vector<2x128xf32>
    %cst_58 = arith.constant 1.000000e+00 : f32
    %265 = vector.broadcast %cst_58 : f32 to vector<2x128xf32>
    %266 = arith.addf %265, %264 : vector<2x128xf32>
    %267 = arith.divf %265, %266 : vector<2x128xf32>
    %268 = math.tanh %262 : vector<2x128xf32>
    %269 = vector.extract_strided_slice %267 {offsets = [0, 0], sizes = [2, 32], strides = [1, 1]} : vector<2x128xf32> to vector<2x32xf32>
    %270 = vector.extract_strided_slice %267 {offsets = [0, 32], sizes = [2, 32], strides = [1, 1]} : vector<2x128xf32> to vector<2x32xf32>
    %271 = vector.extract_strided_slice %268 {offsets = [0, 64], sizes = [2, 32], strides = [1, 1]} : vector<2x128xf32> to vector<2x32xf32>
    %272 = vector.extract_strided_slice %267 {offsets = [0, 96], sizes = [2, 32], strides = [1, 1]} : vector<2x128xf32> to vector<2x32xf32>
    %273 = arith.mulf %270, %237 : vector<2x32xf32>
    %274 = arith.mulf %269, %271 : vector<2x32xf32>
    %275 = arith.addf %273, %274 : vector<2x32xf32>
    %276 = math.tanh %275 : vector<2x32xf32>
    %277 = arith.mulf %272, %276 : vector<2x32xf32>
    %c12_59 = arith.constant 12 : index
    %c0_60 = arith.constant 0 : index
    %278 = vector.load %arg15[%c12_59, %c0_60] : memref<16x64xf32, #tpu.memory_space<vmem>>, vector<2x32xf32>
    tpu.vector_store %arg15[%c12_59, %c0_60], %259 {strides = array<i32>} : memref<16x64xf32, #tpu.memory_space<vmem>>, vector<2x32xf32>,
    %c2_61 = arith.constant 2 : index
    %c32_62 = arith.constant 32 : index
    %279 = vector.load %arg15[%c2_61, %c32_62] : memref<16x64xf32, #tpu.memory_space<vmem>>, vector<2x32xf32>
    tpu.vector_store %arg15[%c2_61, %c32_62], %277 {strides = array<i32>} : memref<16x64xf32, #tpu.memory_space<vmem>>, vector<2x32xf32>,
    %280 = vector.extract_strided_slice %9 {offsets = [14, 0], sizes = [2, 128], strides = [1, 1]} : vector<16x128xf32> to vector<2x128xf32>
    %cst_63 = arith.constant dense<0.000000e+00> : vector<2x128xf32>
    %281 = tpu.matmul %259, %2, %cst_63 {dimension_numbers = #tpu.dot_dimension_numbers<[1], [0], [0], [1], [0, 0, 1, 1], [], []>} : vector<2x32xf32>, vector<32x128xf32>, vector<2x128xf32> -> vector<2x128xf32>
    %282 = arith.addf %280, %281 : vector<2x128xf32>
    %283 = arith.negf %282 : vector<2x128xf32>
    %284 = math.exp %283 : vector<2x128xf32>
    %cst_64 = arith.constant 1.000000e+00 : f32
    %285 = vector.broadcast %cst_64 : f32 to vector<2x128xf32>
    %286 = arith.addf %285, %284 : vector<2x128xf32>
    %287 = arith.divf %285, %286 : vector<2x128xf32>
    %288 = math.tanh %282 : vector<2x128xf32>
    %289 = vector.extract_strided_slice %287 {offsets = [0, 0], sizes = [2, 32], strides = [1, 1]} : vector<2x128xf32> to vector<2x32xf32>
    %290 = vector.extract_strided_slice %287 {offsets = [0, 32], sizes = [2, 32], strides = [1, 1]} : vector<2x128xf32> to vector<2x32xf32>
    %291 = vector.extract_strided_slice %288 {offsets = [0, 64], sizes = [2, 32], strides = [1, 1]} : vector<2x128xf32> to vector<2x32xf32>
    %292 = vector.extract_strided_slice %287 {offsets = [0, 96], sizes = [2, 32], strides = [1, 1]} : vector<2x128xf32> to vector<2x32xf32>
    %293 = arith.mulf %290, %257 : vector<2x32xf32>
    %294 = arith.mulf %289, %291 : vector<2x32xf32>
    %295 = arith.addf %293, %294 : vector<2x32xf32>
    %296 = math.tanh %295 : vector<2x32xf32>
    %297 = arith.mulf %292, %296 : vector<2x32xf32>
    %298 = vector.extract_strided_slice %12 {offsets = [0, 0], sizes = [2, 128], strides = [1, 1]} : vector<16x128xf32> to vector<2x128xf32>
    %cst_65 = arith.constant dense<0.000000e+00> : vector<2x128xf32>
    %299 = tpu.matmul %277, %5, %cst_65 {dimension_numbers = #tpu.dot_dimension_numbers<[1], [0], [0], [1], [0, 0, 1, 1], [], []>} : vector<2x32xf32>, vector<32x128xf32>, vector<2x128xf32> -> vector<2x128xf32>
    %300 = arith.addf %298, %299 : vector<2x128xf32>
    %301 = arith.negf %300 : vector<2x128xf32>
    %302 = math.exp %301 : vector<2x128xf32>
    %cst_66 = arith.constant 1.000000e+00 : f32
    %303 = vector.broadcast %cst_66 : f32 to vector<2x128xf32>
    %304 = arith.addf %303, %302 : vector<2x128xf32>
    %305 = arith.divf %303, %304 : vector<2x128xf32>
    %306 = math.tanh %300 : vector<2x128xf32>
    %307 = vector.extract_strided_slice %305 {offsets = [0, 0], sizes = [2, 32], strides = [1, 1]} : vector<2x128xf32> to vector<2x32xf32>
    %308 = vector.extract_strided_slice %305 {offsets = [0, 32], sizes = [2, 32], strides = [1, 1]} : vector<2x128xf32> to vector<2x32xf32>
    %309 = vector.extract_strided_slice %306 {offsets = [0, 64], sizes = [2, 32], strides = [1, 1]} : vector<2x128xf32> to vector<2x32xf32>
    %310 = vector.extract_strided_slice %305 {offsets = [0, 96], sizes = [2, 32], strides = [1, 1]} : vector<2x128xf32> to vector<2x32xf32>
    %311 = arith.mulf %308, %275 : vector<2x32xf32>
    %312 = arith.mulf %307, %309 : vector<2x32xf32>
    %313 = arith.addf %311, %312 : vector<2x32xf32>
    %314 = math.tanh %313 : vector<2x32xf32>
    %315 = arith.mulf %310, %314 : vector<2x32xf32>
    %c14_67 = arith.constant 14 : index
    %c0_68 = arith.constant 0 : index
    %316 = vector.load %arg15[%c14_67, %c0_68] : memref<16x64xf32, #tpu.memory_space<vmem>>, vector<2x32xf32>
    tpu.vector_store %arg15[%c14_67, %c0_68], %297 {strides = array<i32>} : memref<16x64xf32, #tpu.memory_space<vmem>>, vector<2x32xf32>,
    %c0_69 = arith.constant 0 : index
    %c32_70 = arith.constant 32 : index
    %317 = vector.load %arg15[%c0_69, %c32_70] : memref<16x64xf32, #tpu.memory_space<vmem>>, vector<2x32xf32>
    tpu.vector_store %arg15[%c0_69, %c32_70], %315 {strides = array<i32>} : memref<16x64xf32, #tpu.memory_space<vmem>>, vector<2x32xf32>,
    %c0_71 = arith.constant 0 : index
    %c0_72 = arith.constant 0 : index
    %318 = vector.load %arg15[%c0_71, %c0_72] : memref<16x64xf32, #tpu.memory_space<vmem>>, vector<16x64xf32>
    %c0_73 = arith.constant 0 : index
    %c0_74 = arith.constant 0 : index
    %319 = vector.load %arg7[%c0_73, %c0_74] : memref<64x128xf32, #tpu.memory_space<vmem>>, vector<64x128xf32>
    %c0_75 = arith.constant 0 : index
    %c0_76 = arith.constant 0 : index
    %320 = vector.load %arg8[%c0_75, %c0_76] : memref<32x128xf32, #tpu.memory_space<vmem>>, vector<32x128xf32>
    %c0_77 = arith.constant 0 : index
    %c0_78 = arith.constant 0 : index
    %321 = vector.load %arg9[%c0_77, %c0_78] : memref<1x128xf32, #tpu.memory_space<vmem>>, vector<1x128xf32>
    %c0_79 = arith.constant 0 : index
    %c0_80 = arith.constant 0 : index
    %322 = vector.load %arg10[%c0_79, %c0_80] : memref<64x128xf32, #tpu.memory_space<vmem>>, vector<64x128xf32>
    %c0_81 = arith.constant 0 : index
    %c0_82 = arith.constant 0 : index
    %323 = vector.load %arg11[%c0_81, %c0_82] : memref<32x128xf32, #tpu.memory_space<vmem>>, vector<32x128xf32>
    %c0_83 = arith.constant 0 : index
    %c0_84 = arith.constant 0 : index
    %324 = vector.load %arg12[%c0_83, %c0_84] : memref<1x128xf32, #tpu.memory_space<vmem>>, vector<1x128xf32>
    %cst_85 = arith.constant dense<0.000000e+00> : vector<16x128xf32>
    %325 = tpu.matmul %318, %319, %cst_85 {dimension_numbers = #tpu.dot_dimension_numbers<[1], [0], [0], [1], [0, 0, 1, 1], [], []>} : vector<16x64xf32>, vector<64x128xf32>, vector<16x128xf32> -> vector<16x128xf32>
    %326 = vector.broadcast %321 : vector<1x128xf32> to vector<16x128xf32>
    %327 = arith.addf %325, %326 : vector<16x128xf32>
    %cst_86 = arith.constant dense<0.000000e+00> : vector<16x128xf32>
    %328 = tpu.matmul %318, %322, %cst_86 {dimension_numbers = #tpu.dot_dimension_numbers<[1], [0], [0], [1], [0, 0, 1, 1], [], []>} : vector<16x64xf32>, vector<64x128xf32>, vector<16x128xf32> -> vector<16x128xf32>
    %329 = vector.broadcast %324 : vector<1x128xf32> to vector<16x128xf32>
    %330 = arith.addf %328, %329 : vector<16x128xf32>
    %cst_87 = arith.constant 0.000000e+00 : f32
    %331 = vector.broadcast %cst_87 : f32 to vector<2x32xf32>
    %332 = vector.extract_strided_slice %327 {offsets = [0, 0], sizes = [2, 128], strides = [1, 1]} : vector<16x128xf32> to vector<2x128xf32>
    %cst_88 = arith.constant dense<0.000000e+00> : vector<2x128xf32>
    %333 = tpu.matmul %331, %320, %cst_88 {dimension_numbers = #tpu.dot_dimension_numbers<[1], [0], [0], [1], [0, 0, 1, 1], [], []>} : vector<2x32xf32>, vector<32x128xf32>, vector<2x128xf32> -> vector<2x128xf32>
    %334 = arith.addf %332, %333 : vector<2x128xf32>
    %335 = arith.negf %334 : vector<2x128xf32>
    %336 = math.exp %335 : vector<2x128xf32>
    %cst_89 = arith.constant 1.000000e+00 : f32
    %337 = vector.broadcast %cst_89 : f32 to vector<2x128xf32>
    %338 = arith.addf %337, %336 : vector<2x128xf32>
    %339 = arith.divf %337, %338 : vector<2x128xf32>
    %340 = math.tanh %334 : vector<2x128xf32>
    %341 = vector.extract_strided_slice %339 {offsets = [0, 0], sizes = [2, 32], strides = [1, 1]} : vector<2x128xf32> to vector<2x32xf32>
    %342 = vector.extract_strided_slice %339 {offsets = [0, 32], sizes = [2, 32], strides = [1, 1]} : vector<2x128xf32> to vector<2x32xf32>
    %343 = vector.extract_strided_slice %340 {offsets = [0, 64], sizes = [2, 32], strides = [1, 1]} : vector<2x128xf32> to vector<2x32xf32>
    %344 = vector.extract_strided_slice %339 {offsets = [0, 96], sizes = [2, 32], strides = [1, 1]} : vector<2x128xf32> to vector<2x32xf32>
    %345 = arith.mulf %342, %331 : vector<2x32xf32>
    %346 = arith.mulf %341, %343 : vector<2x32xf32>
    %347 = arith.addf %345, %346 : vector<2x32xf32>
    %348 = math.tanh %347 : vector<2x32xf32>
    %349 = arith.mulf %344, %348 : vector<2x32xf32>
    %350 = vector.extract_strided_slice %330 {offsets = [14, 0], sizes = [2, 128], strides = [1, 1]} : vector<16x128xf32> to vector<2x128xf32>
    %cst_90 = arith.constant dense<0.000000e+00> : vector<2x128xf32>
    %351 = tpu.matmul %331, %323, %cst_90 {dimension_numbers = #tpu.dot_dimension_numbers<[1], [0], [0], [1], [0, 0, 1, 1], [], []>} : vector<2x32xf32>, vector<32x128xf32>, vector<2x128xf32> -> vector<2x128xf32>
    %352 = arith.addf %350, %351 : vector<2x128xf32>
    %353 = arith.negf %352 : vector<2x128xf32>
    %354 = math.exp %353 : vector<2x128xf32>
    %cst_91 = arith.constant 1.000000e+00 : f32
    %355 = vector.broadcast %cst_91 : f32 to vector<2x128xf32>
    %356 = arith.addf %355, %354 : vector<2x128xf32>
    %357 = arith.divf %355, %356 : vector<2x128xf32>
    %358 = math.tanh %352 : vector<2x128xf32>
    %359 = vector.extract_strided_slice %357 {offsets = [0, 0], sizes = [2, 32], strides = [1, 1]} : vector<2x128xf32> to vector<2x32xf32>
    %360 = vector.extract_strided_slice %357 {offsets = [0, 32], sizes = [2, 32], strides = [1, 1]} : vector<2x128xf32> to vector<2x32xf32>
    %361 = vector.extract_strided_slice %358 {offsets = [0, 64], sizes = [2, 32], strides = [1, 1]} : vector<2x128xf32> to vector<2x32xf32>
    %362 = vector.extract_strided_slice %357 {offsets = [0, 96], sizes = [2, 32], strides = [1, 1]} : vector<2x128xf32> to vector<2x32xf32>
    %363 = arith.mulf %360, %331 : vector<2x32xf32>
    %364 = arith.mulf %359, %361 : vector<2x32xf32>
    %365 = arith.addf %363, %364 : vector<2x32xf32>
    %366 = math.tanh %365 : vector<2x32xf32>
    %367 = arith.mulf %362, %366 : vector<2x32xf32>
    %368 = vector.extract_strided_slice %327 {offsets = [2, 0], sizes = [2, 128], strides = [1, 1]} : vector<16x128xf32> to vector<2x128xf32>
    %cst_92 = arith.constant dense<0.000000e+00> : vector<2x128xf32>
    %369 = tpu.matmul %349, %320, %cst_92 {dimension_numbers = #tpu.dot_dimension_numbers<[1], [0], [0], [1], [0, 0, 1, 1], [], []>} : vector<2x32xf32>, vector<32x128xf32>, vector<2x128xf32> -> vector<2x128xf32>
    %370 = arith.addf %368, %369 : vector<2x128xf32>
    %371 = arith.negf %370 : vector<2x128xf32>
    %372 = math.exp %371 : vector<2x128xf32>
    %cst_93 = arith.constant 1.000000e+00 : f32
    %373 = vector.broadcast %cst_93 : f32 to vector<2x128xf32>
    %374 = arith.addf %373, %372 : vector<2x128xf32>
    %375 = arith.divf %373, %374 : vector<2x128xf32>
    %376 = math.tanh %370 : vector<2x128xf32>
    %377 = vector.extract_strided_slice %375 {offsets = [0, 0], sizes = [2, 32], strides = [1, 1]} : vector<2x128xf32> to vector<2x32xf32>
    %378 = vector.extract_strided_slice %375 {offsets = [0, 32], sizes = [2, 32], strides = [1, 1]} : vector<2x128xf32> to vector<2x32xf32>
    %379 = vector.extract_strided_slice %376 {offsets = [0, 64], sizes = [2, 32], strides = [1, 1]} : vector<2x128xf32> to vector<2x32xf32>
    %380 = vector.extract_strided_slice %375 {offsets = [0, 96], sizes = [2, 32], strides = [1, 1]} : vector<2x128xf32> to vector<2x32xf32>
    %381 = arith.mulf %378, %347 : vector<2x32xf32>
    %382 = arith.mulf %377, %379 : vector<2x32xf32>
    %383 = arith.addf %381, %382 : vector<2x32xf32>
    %384 = math.tanh %383 : vector<2x32xf32>
    %385 = arith.mulf %380, %384 : vector<2x32xf32>
    %386 = vector.extract_strided_slice %330 {offsets = [12, 0], sizes = [2, 128], strides = [1, 1]} : vector<16x128xf32> to vector<2x128xf32>
    %cst_94 = arith.constant dense<0.000000e+00> : vector<2x128xf32>
    %387 = tpu.matmul %367, %323, %cst_94 {dimension_numbers = #tpu.dot_dimension_numbers<[1], [0], [0], [1], [0, 0, 1, 1], [], []>} : vector<2x32xf32>, vector<32x128xf32>, vector<2x128xf32> -> vector<2x128xf32>
    %388 = arith.addf %386, %387 : vector<2x128xf32>
    %389 = arith.negf %388 : vector<2x128xf32>
    %390 = math.exp %389 : vector<2x128xf32>
    %cst_95 = arith.constant 1.000000e+00 : f32
    %391 = vector.broadcast %cst_95 : f32 to vector<2x128xf32>
    %392 = arith.addf %391, %390 : vector<2x128xf32>
    %393 = arith.divf %391, %392 : vector<2x128xf32>
    %394 = math.tanh %388 : vector<2x128xf32>
    %395 = vector.extract_strided_slice %393 {offsets = [0, 0], sizes = [2, 32], strides = [1, 1]} : vector<2x128xf32> to vector<2x32xf32>
    %396 = vector.extract_strided_slice %393 {offsets = [0, 32], sizes = [2, 32], strides = [1, 1]} : vector<2x128xf32> to vector<2x32xf32>
    %397 = vector.extract_strided_slice %394 {offsets = [0, 64], sizes = [2, 32], strides = [1, 1]} : vector<2x128xf32> to vector<2x32xf32>
    %398 = vector.extract_strided_slice %393 {offsets = [0, 96], sizes = [2, 32], strides = [1, 1]} : vector<2x128xf32> to vector<2x32xf32>
    %399 = arith.mulf %396, %365 : vector<2x32xf32>
    %400 = arith.mulf %395, %397 : vector<2x32xf32>
    %401 = arith.addf %399, %400 : vector<2x32xf32>
    %402 = math.tanh %401 : vector<2x32xf32>
    %403 = arith.mulf %398, %402 : vector<2x32xf32>
    %404 = vector.extract_strided_slice %327 {offsets = [4, 0], sizes = [2, 128], strides = [1, 1]} : vector<16x128xf32> to vector<2x128xf32>
    %cst_96 = arith.constant dense<0.000000e+00> : vector<2x128xf32>
    %405 = tpu.matmul %385, %320, %cst_96 {dimension_numbers = #tpu.dot_dimension_numbers<[1], [0], [0], [1], [0, 0, 1, 1], [], []>} : vector<2x32xf32>, vector<32x128xf32>, vector<2x128xf32> -> vector<2x128xf32>
    %406 = arith.addf %404, %405 : vector<2x128xf32>
    %407 = arith.negf %406 : vector<2x128xf32>
    %408 = math.exp %407 : vector<2x128xf32>
    %cst_97 = arith.constant 1.000000e+00 : f32
    %409 = vector.broadcast %cst_97 : f32 to vector<2x128xf32>
    %410 = arith.addf %409, %408 : vector<2x128xf32>
    %411 = arith.divf %409, %410 : vector<2x128xf32>
    %412 = math.tanh %406 : vector<2x128xf32>
    %413 = vector.extract_strided_slice %411 {offsets = [0, 0], sizes = [2, 32], strides = [1, 1]} : vector<2x128xf32> to vector<2x32xf32>
    %414 = vector.extract_strided_slice %411 {offsets = [0, 32], sizes = [2, 32], strides = [1, 1]} : vector<2x128xf32> to vector<2x32xf32>
    %415 = vector.extract_strided_slice %412 {offsets = [0, 64], sizes = [2, 32], strides = [1, 1]} : vector<2x128xf32> to vector<2x32xf32>
    %416 = vector.extract_strided_slice %411 {offsets = [0, 96], sizes = [2, 32], strides = [1, 1]} : vector<2x128xf32> to vector<2x32xf32>
    %417 = arith.mulf %414, %383 : vector<2x32xf32>
    %418 = arith.mulf %413, %415 : vector<2x32xf32>
    %419 = arith.addf %417, %418 : vector<2x32xf32>
    %420 = math.tanh %419 : vector<2x32xf32>
    %421 = arith.mulf %416, %420 : vector<2x32xf32>
    %422 = vector.extract_strided_slice %330 {offsets = [10, 0], sizes = [2, 128], strides = [1, 1]} : vector<16x128xf32> to vector<2x128xf32>
    %cst_98 = arith.constant dense<0.000000e+00> : vector<2x128xf32>
    %423 = tpu.matmul %403, %323, %cst_98 {dimension_numbers = #tpu.dot_dimension_numbers<[1], [0], [0], [1], [0, 0, 1, 1], [], []>} : vector<2x32xf32>, vector<32x128xf32>, vector<2x128xf32> -> vector<2x128xf32>
    %424 = arith.addf %422, %423 : vector<2x128xf32>
    %425 = arith.negf %424 : vector<2x128xf32>
    %426 = math.exp %425 : vector<2x128xf32>
    %cst_99 = arith.constant 1.000000e+00 : f32
    %427 = vector.broadcast %cst_99 : f32 to vector<2x128xf32>
    %428 = arith.addf %427, %426 : vector<2x128xf32>
    %429 = arith.divf %427, %428 : vector<2x128xf32>
    %430 = math.tanh %424 : vector<2x128xf32>
    %431 = vector.extract_strided_slice %429 {offsets = [0, 0], sizes = [2, 32], strides = [1, 1]} : vector<2x128xf32> to vector<2x32xf32>
    %432 = vector.extract_strided_slice %429 {offsets = [0, 32], sizes = [2, 32], strides = [1, 1]} : vector<2x128xf32> to vector<2x32xf32>
    %433 = vector.extract_strided_slice %430 {offsets = [0, 64], sizes = [2, 32], strides = [1, 1]} : vector<2x128xf32> to vector<2x32xf32>
    %434 = vector.extract_strided_slice %429 {offsets = [0, 96], sizes = [2, 32], strides = [1, 1]} : vector<2x128xf32> to vector<2x32xf32>
    %435 = arith.mulf %432, %401 : vector<2x32xf32>
    %436 = arith.mulf %431, %433 : vector<2x32xf32>
    %437 = arith.addf %435, %436 : vector<2x32xf32>
    %438 = math.tanh %437 : vector<2x32xf32>
    %439 = arith.mulf %434, %438 : vector<2x32xf32>
    %440 = vector.extract_strided_slice %327 {offsets = [6, 0], sizes = [2, 128], strides = [1, 1]} : vector<16x128xf32> to vector<2x128xf32>
    %cst_100 = arith.constant dense<0.000000e+00> : vector<2x128xf32>
    %441 = tpu.matmul %421, %320, %cst_100 {dimension_numbers = #tpu.dot_dimension_numbers<[1], [0], [0], [1], [0, 0, 1, 1], [], []>} : vector<2x32xf32>, vector<32x128xf32>, vector<2x128xf32> -> vector<2x128xf32>
    %442 = arith.addf %440, %441 : vector<2x128xf32>
    %443 = arith.negf %442 : vector<2x128xf32>
    %444 = math.exp %443 : vector<2x128xf32>
    %cst_101 = arith.constant 1.000000e+00 : f32
    %445 = vector.broadcast %cst_101 : f32 to vector<2x128xf32>
    %446 = arith.addf %445, %444 : vector<2x128xf32>
    %447 = arith.divf %445, %446 : vector<2x128xf32>
    %448 = math.tanh %442 : vector<2x128xf32>
    %449 = vector.extract_strided_slice %447 {offsets = [0, 0], sizes = [2, 32], strides = [1, 1]} : vector<2x128xf32> to vector<2x32xf32>
    %450 = vector.extract_strided_slice %447 {offsets = [0, 32], sizes = [2, 32], strides = [1, 1]} : vector<2x128xf32> to vector<2x32xf32>
    %451 = vector.extract_strided_slice %448 {offsets = [0, 64], sizes = [2, 32], strides = [1, 1]} : vector<2x128xf32> to vector<2x32xf32>
    %452 = vector.extract_strided_slice %447 {offsets = [0, 96], sizes = [2, 32], strides = [1, 1]} : vector<2x128xf32> to vector<2x32xf32>
    %453 = arith.mulf %450, %419 : vector<2x32xf32>
    %454 = arith.mulf %449, %451 : vector<2x32xf32>
    %455 = arith.addf %453, %454 : vector<2x32xf32>
    %456 = math.tanh %455 : vector<2x32xf32>
    %457 = arith.mulf %452, %456 : vector<2x32xf32>
    %458 = vector.extract_strided_slice %330 {offsets = [8, 0], sizes = [2, 128], strides = [1, 1]} : vector<16x128xf32> to vector<2x128xf32>
    %cst_102 = arith.constant dense<0.000000e+00> : vector<2x128xf32>
    %459 = tpu.matmul %439, %323, %cst_102 {dimension_numbers = #tpu.dot_dimension_numbers<[1], [0], [0], [1], [0, 0, 1, 1], [], []>} : vector<2x32xf32>, vector<32x128xf32>, vector<2x128xf32> -> vector<2x128xf32>
    %460 = arith.addf %458, %459 : vector<2x128xf32>
    %461 = arith.negf %460 : vector<2x128xf32>
    %462 = math.exp %461 : vector<2x128xf32>
    %cst_103 = arith.constant 1.000000e+00 : f32
    %463 = vector.broadcast %cst_103 : f32 to vector<2x128xf32>
    %464 = arith.addf %463, %462 : vector<2x128xf32>
    %465 = arith.divf %463, %464 : vector<2x128xf32>
    %466 = math.tanh %460 : vector<2x128xf32>
    %467 = vector.extract_strided_slice %465 {offsets = [0, 0], sizes = [2, 32], strides = [1, 1]} : vector<2x128xf32> to vector<2x32xf32>
    %468 = vector.extract_strided_slice %465 {offsets = [0, 32], sizes = [2, 32], strides = [1, 1]} : vector<2x128xf32> to vector<2x32xf32>
    %469 = vector.extract_strided_slice %466 {offsets = [0, 64], sizes = [2, 32], strides = [1, 1]} : vector<2x128xf32> to vector<2x32xf32>
    %470 = vector.extract_strided_slice %465 {offsets = [0, 96], sizes = [2, 32], strides = [1, 1]} : vector<2x128xf32> to vector<2x32xf32>
    %471 = arith.mulf %468, %437 : vector<2x32xf32>
    %472 = arith.mulf %467, %469 : vector<2x32xf32>
    %473 = arith.addf %471, %472 : vector<2x32xf32>
    %474 = math.tanh %473 : vector<2x32xf32>
    %475 = arith.mulf %470, %474 : vector<2x32xf32>
    %476 = vector.extract_strided_slice %327 {offsets = [8, 0], sizes = [2, 128], strides = [1, 1]} : vector<16x128xf32> to vector<2x128xf32>
    %cst_104 = arith.constant dense<0.000000e+00> : vector<2x128xf32>
    %477 = tpu.matmul %457, %320, %cst_104 {dimension_numbers = #tpu.dot_dimension_numbers<[1], [0], [0], [1], [0, 0, 1, 1], [], []>} : vector<2x32xf32>, vector<32x128xf32>, vector<2x128xf32> -> vector<2x128xf32>
    %478 = arith.addf %476, %477 : vector<2x128xf32>
    %479 = arith.negf %478 : vector<2x128xf32>
    %480 = math.exp %479 : vector<2x128xf32>
    %cst_105 = arith.constant 1.000000e+00 : f32
    %481 = vector.broadcast %cst_105 : f32 to vector<2x128xf32>
    %482 = arith.addf %481, %480 : vector<2x128xf32>
    %483 = arith.divf %481, %482 : vector<2x128xf32>
    %484 = math.tanh %478 : vector<2x128xf32>
    %485 = vector.extract_strided_slice %483 {offsets = [0, 0], sizes = [2, 32], strides = [1, 1]} : vector<2x128xf32> to vector<2x32xf32>
    %486 = vector.extract_strided_slice %483 {offsets = [0, 32], sizes = [2, 32], strides = [1, 1]} : vector<2x128xf32> to vector<2x32xf32>
    %487 = vector.extract_strided_slice %484 {offsets = [0, 64], sizes = [2, 32], strides = [1, 1]} : vector<2x128xf32> to vector<2x32xf32>
    %488 = vector.extract_strided_slice %483 {offsets = [0, 96], sizes = [2, 32], strides = [1, 1]} : vector<2x128xf32> to vector<2x32xf32>
    %489 = arith.mulf %486, %455 : vector<2x32xf32>
    %490 = arith.mulf %485, %487 : vector<2x32xf32>
    %491 = arith.addf %489, %490 : vector<2x32xf32>
    %492 = math.tanh %491 : vector<2x32xf32>
    %493 = arith.mulf %488, %492 : vector<2x32xf32>
    %494 = vector.extract_strided_slice %330 {offsets = [6, 0], sizes = [2, 128], strides = [1, 1]} : vector<16x128xf32> to vector<2x128xf32>
    %cst_106 = arith.constant dense<0.000000e+00> : vector<2x128xf32>
    %495 = tpu.matmul %475, %323, %cst_106 {dimension_numbers = #tpu.dot_dimension_numbers<[1], [0], [0], [1], [0, 0, 1, 1], [], []>} : vector<2x32xf32>, vector<32x128xf32>, vector<2x128xf32> -> vector<2x128xf32>
    %496 = arith.addf %494, %495 : vector<2x128xf32>
    %497 = arith.negf %496 : vector<2x128xf32>
    %498 = math.exp %497 : vector<2x128xf32>
    %cst_107 = arith.constant 1.000000e+00 : f32
    %499 = vector.broadcast %cst_107 : f32 to vector<2x128xf32>
    %500 = arith.addf %499, %498 : vector<2x128xf32>
    %501 = arith.divf %499, %500 : vector<2x128xf32>
    %502 = math.tanh %496 : vector<2x128xf32>
    %503 = vector.extract_strided_slice %501 {offsets = [0, 0], sizes = [2, 32], strides = [1, 1]} : vector<2x128xf32> to vector<2x32xf32>
    %504 = vector.extract_strided_slice %501 {offsets = [0, 32], sizes = [2, 32], strides = [1, 1]} : vector<2x128xf32> to vector<2x32xf32>
    %505 = vector.extract_strided_slice %502 {offsets = [0, 64], sizes = [2, 32], strides = [1, 1]} : vector<2x128xf32> to vector<2x32xf32>
    %506 = vector.extract_strided_slice %501 {offsets = [0, 96], sizes = [2, 32], strides = [1, 1]} : vector<2x128xf32> to vector<2x32xf32>
    %507 = arith.mulf %504, %473 : vector<2x32xf32>
    %508 = arith.mulf %503, %505 : vector<2x32xf32>
    %509 = arith.addf %507, %508 : vector<2x32xf32>
    %510 = math.tanh %509 : vector<2x32xf32>
    %511 = arith.mulf %506, %510 : vector<2x32xf32>
    %512 = vector.extract_strided_slice %327 {offsets = [10, 0], sizes = [2, 128], strides = [1, 1]} : vector<16x128xf32> to vector<2x128xf32>
    %cst_108 = arith.constant dense<0.000000e+00> : vector<2x128xf32>
    %513 = tpu.matmul %493, %320, %cst_108 {dimension_numbers = #tpu.dot_dimension_numbers<[1], [0], [0], [1], [0, 0, 1, 1], [], []>} : vector<2x32xf32>, vector<32x128xf32>, vector<2x128xf32> -> vector<2x128xf32>
    %514 = arith.addf %512, %513 : vector<2x128xf32>
    %515 = arith.negf %514 : vector<2x128xf32>
    %516 = math.exp %515 : vector<2x128xf32>
    %cst_109 = arith.constant 1.000000e+00 : f32
    %517 = vector.broadcast %cst_109 : f32 to vector<2x128xf32>
    %518 = arith.addf %517, %516 : vector<2x128xf32>
    %519 = arith.divf %517, %518 : vector<2x128xf32>
    %520 = math.tanh %514 : vector<2x128xf32>
    %521 = vector.extract_strided_slice %519 {offsets = [0, 0], sizes = [2, 32], strides = [1, 1]} : vector<2x128xf32> to vector<2x32xf32>
    %522 = vector.extract_strided_slice %519 {offsets = [0, 32], sizes = [2, 32], strides = [1, 1]} : vector<2x128xf32> to vector<2x32xf32>
    %523 = vector.extract_strided_slice %520 {offsets = [0, 64], sizes = [2, 32], strides = [1, 1]} : vector<2x128xf32> to vector<2x32xf32>
    %524 = vector.extract_strided_slice %519 {offsets = [0, 96], sizes = [2, 32], strides = [1, 1]} : vector<2x128xf32> to vector<2x32xf32>
    %525 = arith.mulf %522, %491 : vector<2x32xf32>
    %526 = arith.mulf %521, %523 : vector<2x32xf32>
    %527 = arith.addf %525, %526 : vector<2x32xf32>
    %528 = math.tanh %527 : vector<2x32xf32>
    %529 = arith.mulf %524, %528 : vector<2x32xf32>
    %530 = vector.extract_strided_slice %330 {offsets = [4, 0], sizes = [2, 128], strides = [1, 1]} : vector<16x128xf32> to vector<2x128xf32>
    %cst_110 = arith.constant dense<0.000000e+00> : vector<2x128xf32>
    %531 = tpu.matmul %511, %323, %cst_110 {dimension_numbers = #tpu.dot_dimension_numbers<[1], [0], [0], [1], [0, 0, 1, 1], [], []>} : vector<2x32xf32>, vector<32x128xf32>, vector<2x128xf32> -> vector<2x128xf32>
    %532 = arith.addf %530, %531 : vector<2x128xf32>
    %533 = arith.negf %532 : vector<2x128xf32>
    %534 = math.exp %533 : vector<2x128xf32>
    %cst_111 = arith.constant 1.000000e+00 : f32
    %535 = vector.broadcast %cst_111 : f32 to vector<2x128xf32>
    %536 = arith.addf %535, %534 : vector<2x128xf32>
    %537 = arith.divf %535, %536 : vector<2x128xf32>
    %538 = math.tanh %532 : vector<2x128xf32>
    %539 = vector.extract_strided_slice %537 {offsets = [0, 0], sizes = [2, 32], strides = [1, 1]} : vector<2x128xf32> to vector<2x32xf32>
    %540 = vector.extract_strided_slice %537 {offsets = [0, 32], sizes = [2, 32], strides = [1, 1]} : vector<2x128xf32> to vector<2x32xf32>
    %541 = vector.extract_strided_slice %538 {offsets = [0, 64], sizes = [2, 32], strides = [1, 1]} : vector<2x128xf32> to vector<2x32xf32>
    %542 = vector.extract_strided_slice %537 {offsets = [0, 96], sizes = [2, 32], strides = [1, 1]} : vector<2x128xf32> to vector<2x32xf32>
    %543 = arith.mulf %540, %509 : vector<2x32xf32>
    %544 = arith.mulf %539, %541 : vector<2x32xf32>
    %545 = arith.addf %543, %544 : vector<2x32xf32>
    %546 = math.tanh %545 : vector<2x32xf32>
    %547 = arith.mulf %542, %546 : vector<2x32xf32>
    %548 = vector.extract_strided_slice %327 {offsets = [12, 0], sizes = [2, 128], strides = [1, 1]} : vector<16x128xf32> to vector<2x128xf32>
    %cst_112 = arith.constant dense<0.000000e+00> : vector<2x128xf32>
    %549 = tpu.matmul %529, %320, %cst_112 {dimension_numbers = #tpu.dot_dimension_numbers<[1], [0], [0], [1], [0, 0, 1, 1], [], []>} : vector<2x32xf32>, vector<32x128xf32>, vector<2x128xf32> -> vector<2x128xf32>
    %550 = arith.addf %548, %549 : vector<2x128xf32>
    %551 = arith.negf %550 : vector<2x128xf32>
    %552 = math.exp %551 : vector<2x128xf32>
    %cst_113 = arith.constant 1.000000e+00 : f32
    %553 = vector.broadcast %cst_113 : f32 to vector<2x128xf32>
    %554 = arith.addf %553, %552 : vector<2x128xf32>
    %555 = arith.divf %553, %554 : vector<2x128xf32>
    %556 = math.tanh %550 : vector<2x128xf32>
    %557 = vector.extract_strided_slice %555 {offsets = [0, 0], sizes = [2, 32], strides = [1, 1]} : vector<2x128xf32> to vector<2x32xf32>
    %558 = vector.extract_strided_slice %555 {offsets = [0, 32], sizes = [2, 32], strides = [1, 1]} : vector<2x128xf32> to vector<2x32xf32>
    %559 = vector.extract_strided_slice %556 {offsets = [0, 64], sizes = [2, 32], strides = [1, 1]} : vector<2x128xf32> to vector<2x32xf32>
    %560 = vector.extract_strided_slice %555 {offsets = [0, 96], sizes = [2, 32], strides = [1, 1]} : vector<2x128xf32> to vector<2x32xf32>
    %561 = arith.mulf %558, %527 : vector<2x32xf32>
    %562 = arith.mulf %557, %559 : vector<2x32xf32>
    %563 = arith.addf %561, %562 : vector<2x32xf32>
    %564 = math.tanh %563 : vector<2x32xf32>
    %565 = arith.mulf %560, %564 : vector<2x32xf32>
    %566 = vector.extract_strided_slice %330 {offsets = [2, 0], sizes = [2, 128], strides = [1, 1]} : vector<16x128xf32> to vector<2x128xf32>
    %cst_114 = arith.constant dense<0.000000e+00> : vector<2x128xf32>
    %567 = tpu.matmul %547, %323, %cst_114 {dimension_numbers = #tpu.dot_dimension_numbers<[1], [0], [0], [1], [0, 0, 1, 1], [], []>} : vector<2x32xf32>, vector<32x128xf32>, vector<2x128xf32> -> vector<2x128xf32>
    %568 = arith.addf %566, %567 : vector<2x128xf32>
    %569 = arith.negf %568 : vector<2x128xf32>
    %570 = math.exp %569 : vector<2x128xf32>
    %cst_115 = arith.constant 1.000000e+00 : f32
    %571 = vector.broadcast %cst_115 : f32 to vector<2x128xf32>
    %572 = arith.addf %571, %570 : vector<2x128xf32>
    %573 = arith.divf %571, %572 : vector<2x128xf32>
    %574 = math.tanh %568 : vector<2x128xf32>
    %575 = vector.extract_strided_slice %573 {offsets = [0, 0], sizes = [2, 32], strides = [1, 1]} : vector<2x128xf32> to vector<2x32xf32>
    %576 = vector.extract_strided_slice %573 {offsets = [0, 32], sizes = [2, 32], strides = [1, 1]} : vector<2x128xf32> to vector<2x32xf32>
    %577 = vector.extract_strided_slice %574 {offsets = [0, 64], sizes = [2, 32], strides = [1, 1]} : vector<2x128xf32> to vector<2x32xf32>
    %578 = vector.extract_strided_slice %573 {offsets = [0, 96], sizes = [2, 32], strides = [1, 1]} : vector<2x128xf32> to vector<2x32xf32>
    %579 = arith.mulf %576, %545 : vector<2x32xf32>
    %580 = arith.mulf %575, %577 : vector<2x32xf32>
    %581 = arith.addf %579, %580 : vector<2x32xf32>
    %582 = math.tanh %581 : vector<2x32xf32>
    %583 = arith.mulf %578, %582 : vector<2x32xf32>
    %584 = vector.extract_strided_slice %327 {offsets = [14, 0], sizes = [2, 128], strides = [1, 1]} : vector<16x128xf32> to vector<2x128xf32>
    %cst_116 = arith.constant dense<0.000000e+00> : vector<2x128xf32>
    %585 = tpu.matmul %565, %320, %cst_116 {dimension_numbers = #tpu.dot_dimension_numbers<[1], [0], [0], [1], [0, 0, 1, 1], [], []>} : vector<2x32xf32>, vector<32x128xf32>, vector<2x128xf32> -> vector<2x128xf32>
    %586 = arith.addf %584, %585 : vector<2x128xf32>
    %587 = arith.negf %586 : vector<2x128xf32>
    %588 = math.exp %587 : vector<2x128xf32>
    %cst_117 = arith.constant 1.000000e+00 : f32
    %589 = vector.broadcast %cst_117 : f32 to vector<2x128xf32>
    %590 = arith.addf %589, %588 : vector<2x128xf32>
    %591 = arith.divf %589, %590 : vector<2x128xf32>
    %592 = math.tanh %586 : vector<2x128xf32>
    %593 = vector.extract_strided_slice %591 {offsets = [0, 0], sizes = [2, 32], strides = [1, 1]} : vector<2x128xf32> to vector<2x32xf32>
    %594 = vector.extract_strided_slice %591 {offsets = [0, 32], sizes = [2, 32], strides = [1, 1]} : vector<2x128xf32> to vector<2x32xf32>
    %595 = vector.extract_strided_slice %592 {offsets = [0, 64], sizes = [2, 32], strides = [1, 1]} : vector<2x128xf32> to vector<2x32xf32>
    %596 = vector.extract_strided_slice %591 {offsets = [0, 96], sizes = [2, 32], strides = [1, 1]} : vector<2x128xf32> to vector<2x32xf32>
    %597 = arith.mulf %594, %563 : vector<2x32xf32>
    %598 = arith.mulf %593, %595 : vector<2x32xf32>
    %599 = arith.addf %597, %598 : vector<2x32xf32>
    %600 = math.tanh %599 : vector<2x32xf32>
    %601 = arith.mulf %596, %600 : vector<2x32xf32>
    %602 = vector.extract_strided_slice %330 {offsets = [0, 0], sizes = [2, 128], strides = [1, 1]} : vector<16x128xf32> to vector<2x128xf32>
    %cst_118 = arith.constant dense<0.000000e+00> : vector<2x128xf32>
    %603 = tpu.matmul %583, %323, %cst_118 {dimension_numbers = #tpu.dot_dimension_numbers<[1], [0], [0], [1], [0, 0, 1, 1], [], []>} : vector<2x32xf32>, vector<32x128xf32>, vector<2x128xf32> -> vector<2x128xf32>
    %604 = arith.addf %602, %603 : vector<2x128xf32>
    %605 = arith.negf %604 : vector<2x128xf32>
    %606 = math.exp %605 : vector<2x128xf32>
    %cst_119 = arith.constant 1.000000e+00 : f32
    %607 = vector.broadcast %cst_119 : f32 to vector<2x128xf32>
    %608 = arith.addf %607, %606 : vector<2x128xf32>
    %609 = arith.divf %607, %608 : vector<2x128xf32>
    %610 = math.tanh %604 : vector<2x128xf32>
    %611 = vector.extract_strided_slice %609 {offsets = [0, 0], sizes = [2, 32], strides = [1, 1]} : vector<2x128xf32> to vector<2x32xf32>
    %612 = vector.extract_strided_slice %609 {offsets = [0, 32], sizes = [2, 32], strides = [1, 1]} : vector<2x128xf32> to vector<2x32xf32>
    %613 = vector.extract_strided_slice %610 {offsets = [0, 64], sizes = [2, 32], strides = [1, 1]} : vector<2x128xf32> to vector<2x32xf32>
    %614 = vector.extract_strided_slice %609 {offsets = [0, 96], sizes = [2, 32], strides = [1, 1]} : vector<2x128xf32> to vector<2x32xf32>
    %615 = arith.mulf %612, %581 : vector<2x32xf32>
    %616 = arith.mulf %611, %613 : vector<2x32xf32>
    %617 = arith.addf %615, %616 : vector<2x32xf32>
    %618 = math.tanh %617 : vector<2x32xf32>
    %619 = arith.mulf %614, %618 : vector<2x32xf32>
    %620 = tpu.concatenate %297, %315, %601, %619 in 1 : vector<2x32xf32>, vector<2x32xf32>, vector<2x32xf32>, vector<2x32xf32> -> vector<2x128xf32>
    %c0_120 = arith.constant 0 : index
    %c0_121 = arith.constant 0 : index
    %621 = vector.load %arg13[%c0_120, %c0_121] : memref<128x1xf32, #tpu.memory_space<vmem>>, vector<128x1xf32>
    %cst_122 = arith.constant dense<0.000000e+00> : vector<2x1xf32>
    %622 = tpu.matmul %620, %621, %cst_122 {dimension_numbers = #tpu.dot_dimension_numbers<[1], [0], [0], [1], [0, 0, 1, 1], [], []>} : vector<2x128xf32>, vector<128x1xf32>, vector<2x1xf32> -> vector<2x1xf32>
    %c0_123 = arith.constant 0 : index
    %c0_124 = arith.constant 0 : index
    %623 = vector.load %arg14[%c0_123, %c0_124] : memref<2x1xf32, #tpu.memory_space<vmem>>, vector<2x1xf32>
    tpu.vector_store %arg14[%c0_123, %c0_124], %622 {strides = array<i32>} : memref<2x1xf32, #tpu.memory_space<vmem>>, vector<2x1xf32>,
    return
  }
}

</mosaic_0001>

<bundles_post_ra>
// kernel: my_lstm_forward.1
= control target key start
LH: loop header
LB: loop body
LE: loop exit
PB: predicated region body
PF: predicated region fallthrough
CT: control target
= control target key end

     0   :  { %19 = vsyncpa [#allocation4], 0  ;;  %s3884_s0 = inlined_call_operand.vmem [shape: f32[16,16], index: 0, kind: input, shape index: {}]   ;;  %s3885_s1 = inlined_call_operand.hbm [shape: f32[16,128], index: 1, kind: input, shape index: {}]   ;;  %s3886_s2 = inlined_call_operand.vmem [shape: f32[32,128], index: 2, kind: input, shape index: {}]   ;;  %s3887_s3 = inlined_call_operand.vmem [shape: f32[1,128], index: 3, kind: input, shape index: {}]   ;;  %s3888_s4 = inlined_call_operand.hbm [shape: f32[16,128], index: 4, kind: input, shape index: {}]   ;;  %s3889_s5 = inlined_call_operand.hbm [shape: f32[32,128], index: 5, kind: input, shape index: {}]   ;;  %s3890_s6 = inlined_call_operand.vmem [shape: f32[1,128], index: 6, kind: input, shape index: {}]   ;;  %s3891_s7 = inlined_call_operand.vmem [shape: f32[64,128], index: 7, kind: input, shape index: {}]   ;;  %s3892_s8 = inlined_call_operand.hbm [shape: f32[32,128], index: 8, kind: input, shape index: {}]   ;;  %s3893_s9 = inlined_call_operand.vmem [shape: f32[1,128], index: 9, kind: input, shape index: {}]   ;;  %s3894_s10 = inlined_call_operand.vmem [shape: f32[64,128], index: 10, kind: input, shape index: {}]   ;;  %s3895_s11 = inlined_call_operand.hbm [shape: f32[32,128], index: 11, kind: input, shape index: {}]   ;;  %s3896_s12 = inlined_call_operand.vmem [shape: f32[1,128], index: 12, kind: input, shape index: {}]   ;;  %s3897_s13 = inlined_call_operand.vmem [shape: f32[128,1], index: 13, kind: input, shape index: {}]   ;;  %s3898_s14 = inlined_call_operand.vmem [shape: f32[2,1], index: 14, kind: output, shape index: {}]  }
   0x1   :  { %20 = vsyncpa [#allocation6], 0 }
   0x2   :  { %21 = vsyncpa [#allocation9], 0  ;;  %s45_s15 = sshll.u32 %s3888_s4, 4  ;;  %s3063_s16 = smov [#allocation5]   ;;  %s46_s15 = int_to_ptr.hbm [resolvable:$true] %s45_s15 }
   0x3   :  { %s47_s17 = sshll.u32 %s3063_s16, 4  ;;  %s75_s20 = sshll.u32 %s3892_s8, 4  ;;  %s48_s17 = int_to_ptr.vmem [resolvable:$true] %s47_s17  ;;  %s76_s20 = int_to_ptr.hbm [resolvable:$true] %s75_s20 }
   0x4   :  { %s3064_s21 = smov 128   ;;  %s3065_s22 = smov 8  }
   0x5   :  { %53 = dma.hbm_to_vmem [thread:$0]  %s46_s15, 256, %s48_s17, [#allocation6], %s3064_s21, %s3064_s21, %s3065_s22  }
   0x6   :  { %s3066_s23 = smov [#allocation8]   ;;  %s28_s27 = sshll.u32 %s3885_s1, 4  ;;  %s29_s27 = int_to_ptr.hbm [resolvable:$true] %s28_s27 }
   0x7   :  { %s77_s24 = sshll.u32 %s3066_s23, 4  ;;  %s58_s29 = sshll.u32 %s3889_s5, 4  ;;  %s78_s24 = int_to_ptr.vmem [resolvable:$true] %s77_s24  ;;  %s59_s29 = int_to_ptr.hbm [resolvable:$true] %s58_s29 }
   0x8   :  { %83 = dma.hbm_to_vmem [thread:$0]  %s76_s20, 512, %s78_s24, [#allocation9], %s3064_s21, %s3064_s21, %s3065_s22  }
   0x9   :  { %s3067_s30 = smov [#allocation3]   ;;  %s3068_s8 = smov [#allocation7]  }
   0xa   :  { %s30_s16 = sshll.u32 %s3067_s30, 4  ;;  %s60_s15 = sshll.u32 %s3068_s8, 4  ;;  %s31_s16 = int_to_ptr.vmem [resolvable:$true] %s30_s16  ;;  %s61_s15 = int_to_ptr.vmem [resolvable:$true] %s60_s15 }
   0xb   :  { %36 = dma.hbm_to_vmem [thread:$0]  %s29_s27, 256, %s31_s16, [#allocation4], %s3064_s21, %s3064_s21, %s3065_s22  }
   0xc   :  { %s92_s19 = sshll.u32 %s3895_s11, 4  ;;  %s3069_s1 = smov [#allocation10]   ;;  %s93_s19 = int_to_ptr.hbm [resolvable:$true] %s92_s19 }
   0xd   :  { %66 = dma.hbm_to_vmem [thread:$0]  %s59_s29, 512, %s61_s15, [#allocation6], %s3064_s21, %s3064_s21, %s3065_s22  }
   0xe   :  { %s94_s20 = sshll.u32 %s3069_s1, 4  ;;  %s95_s20 = int_to_ptr.vmem [resolvable:$true] %s94_s20 }
   0xf   :  { %100 = dma.hbm_to_vmem [thread:$0]  %s93_s19, 512, %s95_s20, [#allocation9], %s3064_s21, %s3064_s21, %s3065_s22  }
  0x10   :  { %3057 = dma.done.wait [#allocation4], 256  }
  0x11   :  { %3058 = vsyncadd [#allocation4], 4294967040 }
  0x12   :  { %3059 = dma.done.wait [#allocation6], 768  }
  0x13   :  { %3060 = vsyncadd [#allocation6], 4294966528 }
  0x14   :  { %3061 = dma.done.wait [#allocation9], 1024  }
  0x15   :  { %3062 = vsyncadd [#allocation9], 4294966272  ;;  %v3167_v0 = vld [vmem:[%s3886_s2 + $0x18] sm:$0xff]  ;;  %v3172_v1 = vld [vmem:[%s3886_s2 + $0x10] sm:$0xff]  ;;  %vm144_vm0 = vcmask 130048   ;;  %v3070_v10 = vmov 0.0  }
  0x16   :  { %216 = vmatpush.msra.mxu3 %v3167_v0  ;;  %v128_v2 = vld [vmem:[#allocation3 + $0x8] sm:$0xff]  ;;  %937 = vmatpush.msra.mxu2 %v3167_v0  ;;  %v3179_v3 = vld [vmem:[%s3886_s2 + $0x8] sm:$0xff]  ;;  %v127_v4 = vld [vmem:[#allocation3] sm:$0xff]  ;;  %vm327_vm9 = vcmask 254976   ;;  %vm200_vm10 = vcmask 261120  }
  0x17   :  { %165 = vmatpush.msra.mxu0 %v128_v2  ;;  %v135_v5 = vld [vmem:[#allocation5 + $0x8] sm:$0xff]  ;;  %v125_v6 = vld [vmem:[%s3884_s0] sm:$0xff]  ;;  %v3204_v12 = vld [vmem:[#allocation7 + $0x8] sm:$0xff] }
  0x18   :  { %217 = vmatpush.msra.mxu3 %v3172_v1  ;;  %191 = vmatpush.msra.mxu1 %v135_v5  ;;  %v134_v7 = vld [vmem:[#allocation5] sm:$0xff]  ;;  %v3193_v9 = vld [vmem:[#allocation7 + $0x18] sm:$0xff]  ;;  %v3210_v13 = vld [vmem:[#allocation7] sm:$0xff] }
  0x19   :  { %v3188_v8 = vld [vmem:[%s3886_s2] sm:$0xff]  ;;  %166 = vmatpush.msra.mxu0 %v127_v4  ;;  %938 = vmatpush.msra.mxu2 %v3172_v1  ;;  %v126_v14 = vld [vmem:[%s3884_s0 + $0x8] sm:$0xff] }
  0x1a   :  { %218 = vmatpush.msra.mxu3 %v3179_v3  ;;  %2598 = vmatmul.msk.f32.vlgmr.msra.gmra.mxu0 %vm144_vm0, %v125_v6  ;;  %v3199_v11 = vld [vmem:[#allocation7 + $0x10] sm:$0xff] }
  0x1b   :  { %192 = vmatpush.msra.mxu1 %v134_v7  ;;  %349 = vmatpush.msrb.mxu0 %v3167_v0  ;;  %v2678_v15 = vld [vmem:[%s3890_s6] ss:$0 sm:$0xff]  ;;  %s3071_s6 = smov 64  }
  0x1c   :  { %219 = vmatpush.msra.mxu3 %v3188_v8  ;;  %2600 = vmatmul.msk.f32.vlgmr.msra.gmra.mxu1 %vm144_vm0, %v125_v6  ;;  %v3250_v16 = vld [vmem:[%s3887_s3] ss:$0 sm:$0xff]  ;;  %s3072_s3 = smov 32  }
  0x1d   :  { %220 = vmatmul.f32.vlgmr.msra.gmra.mxu3 %v3070_v10  ;;  %350 = vmatpush.msrb.mxu0 %v3172_v1 }
  0x1e   :  { %274 = vmatpush.msrb.mxu3 %v3193_v9  ;;  %568 = vmatpush.msrb.mxu1 %v3193_v9 }
  0x1f   :  { %351 = vmatpush.msrb.mxu0 %v3179_v3  ;;  %939 = vmatpush.msra.mxu2 %v3179_v3 }
  0x20   :  { %275 = vmatpush.msrb.mxu3 %v3199_v11  ;;  %569 = vmatpush.msrb.mxu1 %v3199_v11 }
  0x21   :  { %352 = vmatpush.msrb.mxu0 %v3188_v8  ;;  %940 = vmatpush.msra.mxu2 %v3188_v8 }
  0x22   :  { %276 = vmatpush.msrb.mxu3 %v3204_v12  ;;  %2599 = vmatmul.msk.f32.gmra.mxu0 %vm144_vm0, %v126_v14 }
  0x23   :  { %570 = vmatpush.msrb.mxu1 %v3204_v12  ;;  %499 = vmatpush.msra.mxu0 %v3167_v0 }
  0x24   :  { %277 = vmatpush.msrb.mxu3 %v3210_v13  ;;  %2601 = vmatmul.msk.f32.gmra.mxu1 %vm144_vm0, %v126_v14 }
  0x25   :  { %278 = vmatmul.f32.vlgmr.msrb.gmra.mxu3 %v3070_v10  ;;  %571 = vmatpush.msrb.mxu1 %v3210_v13 }
  0x26   :  { %418 = vmatpush.msra.mxu3 %v3193_v9  ;;  %500 = vmatpush.msra.mxu0 %v3172_v1 }
  0x27   :  { %649 = vmatpush.msra.mxu1 %v3167_v0  ;;  %1233 = vmatpush.msrb.mxu2 %v3167_v0 }
  0x28   :  { %419 = vmatpush.msra.mxu3 %v3199_v11  ;;  %501 = vmatpush.msra.mxu0 %v3179_v3 }
  0x29   :  { %650 = vmatpush.msra.mxu1 %v3172_v1  ;;  %1234 = vmatpush.msrb.mxu2 %v3172_v1 }
  0x2a   :  { %420 = vmatpush.msra.mxu3 %v3204_v12  ;;  %502 = vmatpush.msra.mxu0 %v3188_v8 }
  0x2b   :  { %651 = vmatpush.msra.mxu1 %v3179_v3  ;;  %1235 = vmatpush.msrb.mxu2 %v3179_v3 }
  0x2c   :  { %421 = vmatpush.msra.mxu3 %v3210_v13 }
  0x2d   :  { %652 = vmatpush.msra.mxu1 %v3188_v8  ;;  %1236 = vmatpush.msrb.mxu2 %v3188_v8 }
  0x2e   :  { %718 = vmatpush.msrb.mxu3 %v3193_v9 }
  0x30   :  { %719 = vmatpush.msrb.mxu3 %v3199_v11 }
  0x32   :  { %720 = vmatpush.msrb.mxu3 %v3204_v12 }
  0x34   :  { %721 = vmatpush.msrb.mxu3 %v3210_v13 }
  0x97   :  { %v168_v18 = vpop.f32.mrf.mxu0 }
  0x98   :  { %v3255_v20 = vadd.f32 %v3250_v16, %v168_v18 }
  0x99   :  { %v194_v17 = vpop.f32.mrf.mxu1 }
  0x9a   :  { %v3252_v19 = vadd.f32 %v2678_v15, %v194_v17 }
  0xa0   :  { %v221_v21 = vpop.f32.mrf.mxu3 }
  0xa1   :  { %v224_v22 = vadd.f32 %v221_v21, %v3255_v20  ;;  %v197_v23 = vpop.f32.mrf.mxu1 }
  0xa2   :  { %v3258_v24 = vadd.f32 %v2678_v15, %v197_v23  ;;  %v3289_v23 = vpop.f32.mrf.mxu0 }
  0xa3   :  { %2681 = vtanh.f32 %v224_v22  ;;  %v2602_v30 = vmul.f32 -1.442695, %v224_v22 }
  0xa8   :  { %v279_v25 = vpop.f32.mrf.mxu3 }
  0xa9   :  { %v2682_v26 = vpop.eup %2681  ;;  %v283_v27 = vrot.slane %v279_v25, 2 }
  0xaa   :  { %247 = vrot.lane.b32.xlu1 %v2682_v26, %s3071_s6 }
  0xab   :  { %v285_v28 = vadd.f32 %v283_v27, %v3258_v24 }
  0xad   :  { %2683 = vtanh.f32 %v285_v28  ;;  %v2603_v32 = vmul.f32 -1.442695, %v285_v28 }
  0xae   :  { %2685 = vpow2.f32 %v2602_v30 }
  0xaf   :  { %2687 = vpow2.f32 %v2603_v32 }
  0xb3   :  { %v2684_v29 = vpop.eup %2683 }
  0xb4   :  { %308 = vrot.lane.b32.xlu0 %v2684_v29, %s3071_s6  ;;  %v2686_v31 = vpop.eup %2685 }
  0xb5   :  { %v228_v33 = vadd.f32 1.0, %v2686_v31  ;;  %v2688_v34 = vpop.eup %2687 }
  0xb6   :  { %v289_v36 = vadd.f32 1.0, %v2688_v34 }
  0xb7   :  { %2689 = vrcp.f32 %v228_v33  ;;  %v240_v43 = vand.u32 2147483648, %v228_v33  ;;  %vm234_vm2 = vweird.f32 %v228_v33  ;;  %v238_v44 = vand.u32 2147483647, %v228_v33 }
  0xb8   :  { %2691 = vrcp.f32 %v289_v36  ;;  %v301_v53 = vand.u32 2147483648, %v289_v36  ;;  %vm295_vm6 = vweird.f32 %v289_v36  ;;  %v299_v54 = vand.u32 2147483647, %v289_v36 }
  0xb9   :  { %v241_v47 = vor.u32 1.1754944e-38, %v240_v43  ;;  %vm239_vm4 = vcmp.eq.f32.partialorder %v238_v44, 8.507059e+37 }
  0xba   :  { %v302_v56 = vor.u32 1.1754944e-38, %v301_v53  ;;  %vm300_vm8 = vcmp.eq.f32.partialorder %v299_v54, 8.507059e+37 }
  0xbd   :  { %v2690_v35 = vpop.eup %2689 }
  0xbe   :  { %v230_v37 = vmul.f32 %v2690_v35, %v228_v33  ;;  %v2692_v39 = vpop.eup %2691  ;;  %vm235_vm1 = vweird.f32 %v2690_v35 }
  0xbf   :  { %v291_v41 = vmul.f32 %v2692_v39, %v289_v36  ;;  %vm236_vm3 = vmor %vm234_vm2, %vm235_vm1  ;;  %vm296_vm5 = vweird.f32 %v2692_v39 }
  0xc0   :  { %v231_v38 = vsub.f32 1.0, %v230_v37  ;;  %vm297_vm7 = vmor %vm295_vm6, %vm296_vm5 }
  0xc1   :  { %v292_v45 = vsub.f32 1.0, %v291_v41 }
  0xc2   :  { %v232_v40 = vmul.f32 %v2690_v35, %v231_v38 }
  0xc3   :  { %v293_v48 = vmul.f32 %v2692_v39, %v292_v45 }
  0xc4   :  { %v233_v42 = vadd.f32 %v2690_v35, %v232_v40 }
  0xc5   :  { %v294_v52 = vadd.f32 %v2692_v39, %v293_v48 }
  0xc6   :  { %v237_v46 = vsel %vm236_vm3, %v2690_v35, %v233_v42 }
  0xc7   :  { %v242_v50 = vsel %vm239_vm4, %v241_v47, %v237_v46  ;;  %v298_v55 = vsel %vm297_vm7, %v2692_v39, %v294_v52 }
  0xc8   :  { %v303_v58 = vsel %vm300_vm8, %v302_v56, %v298_v55  ;;  %v245_v60 = vmul.f32 0.0, %v242_v50 }
  0xc9   :  { %v306_v2 = vmul.f32 0.0, %v303_v58 }
 0x11c   :  { %v248_v49 = vpop.permute.xlu1 %247 }
 0x11d   :  { %v250_v51 = vmul.f32 %v248_v49, %v242_v50 }
 0x11f   :  { %252 = vrot.lane.b32.xlu2 %v250_v51, %s3072_s3 }
 0x126   :  { %v309_v57 = vpop.permute.xlu0 %308 }
 0x127   :  { %v311_v59 = vmul.f32 %v309_v57, %v303_v58 }
 0x129   :  { %313 = vrot.lane.b32.xlu0 %v311_v59, %s3072_s3 }
 0x179   :  { %v253_v61 = vpop.permute.xlu2 %252 }
 0x17a   :  { %v3265_v62 = vadd.f32 %v253_v61, %v245_v60 }
 0x17c   :  { %2693 = vtanh.f32 %v3265_v62 }
 0x182   :  { %v2694_v63 = vpop.eup %2693 }
 0x183   :  { %258 = vrot.lane.b32.xlu0 %v2694_v63, %s3071_s6 }
 0x19b   :  { %v314_v4 = vpop.permute.xlu0 %313 }
 0x19c   :  { %v3269_v5 = vadd.f32 %v314_v4, %v306_v2  ;;  %v382_v2 = vrot.slane %v3265_v62, 6 }
 0x19e   :  { %2695 = vtanh.f32 %v3269_v5 }
 0x1a4   :  { %v2696_v6 = vpop.eup %2695 }
 0x1a5   :  { %319 = vrot.lane.b32.xlu1 %v2696_v6, %s3071_s6 }
 0x1f5   :  { %v259_v7 = vpop.permute.xlu0 %258 }
 0x1f6   :  { %v261_v14 = vmul.f32 %v259_v7, %v242_v50 }
 0x1f8   :  { %324 = vrot.lane.b32.xlu1 %v261_v14, %s3072_s3 }
 0x217   :  { %v320_v15 = vpop.permute.xlu1 %319 }
 0x218   :  { %v3274_v17 = vmul.f32 %v320_v15, %v303_v58  ;;  %v451_v15 = vrot.slane %v3269_v5, 2 }
 0x21a   :  { %v401_v18 = vrot.slane %v3274_v17, 6 }
 0x21c   :  { %402 = vrot.lane.b32.xlu2 %v401_v18, %s3072_s3 }
 0x26a   :  { %v325_v21 = vpop.permute.xlu1 %324 }
 0x26b   :  { %328 = vst.msk [vmem:[#allocation2] sm:$0x3] %vm327_vm9, %v325_v21  ;;  %2604 = vmatmul.msk.f32.vlgmr.msrb.gmra.mxu0 %vm200_vm10, %v325_v21 }
 0x26c   :  { %796 = vmatpush.msrb.mxu0 %v3167_v0 }
 0x26e   :  { %797 = vmatpush.msrb.mxu0 %v3172_v1 }
 0x270   :  { %798 = vmatpush.msrb.mxu0 %v3179_v3 }
 0x272   :  { %799 = vmatpush.msrb.mxu0 %v3188_v8 }
 0x276   :  { %v403_v22 = vpop.permute.xlu2 %402 }
 0x277   :  { %2606 = vmatmul.msk.f32.vlgmr.msra.gmra.mxu3 %vm200_vm10, %v403_v22 }
 0x278   :  { %1006 = vmatpush.msra.mxu3 %v3193_v9 }
 0x27a   :  { %1007 = vmatpush.msra.mxu3 %v3199_v11 }
 0x27c   :  { %1008 = vmatpush.msra.mxu3 %v3204_v12 }
 0x27e   :  { %1009 = vmatpush.msra.mxu3 %v3210_v13 }
 0x2e8   :  { %v354_v25 = vpop.f32.mrf.mxu0 }
 0x2e9   :  { %v358_v26 = vrot.slane %v354_v25, 6 }
 0x2eb   :  { %v360_v27 = vadd.f32 %v358_v26, %v3255_v20 }
 0x2ed   :  { %2697 = vtanh.f32 %v360_v27  ;;  %v2605_v34 = vmul.f32 -1.442695, %v360_v27 }
 0x2f3   :  { %v2698_v28 = vpop.eup %2697 }
 0x2f4   :  { %386 = vrot.lane.b32.xlu1 %v2698_v28, %s3071_s6 }
 0x2fa   :  { %v423_v29 = vpop.f32.mrf.mxu3 }
 0x2fb   :  { %v427_v30 = vrot.slane %v423_v29, 4 }
 0x2fd   :  { %v429_v31 = vadd.f32 %v427_v30, %v3258_v24 }
 0x2ff   :  { %2699 = vtanh.f32 %v429_v31  ;;  %v2607_v33 = vmul.f32 -1.442695, %v429_v31 }
 0x301   :  { %2701 = vpow2.f32 %v2607_v33 }
 0x302   :  { %2703 = vpow2.f32 %v2605_v34 }
 0x305   :  { %v2700_v32 = vpop.eup %2699 }
 0x306   :  { %455 = vrot.lane.b32.xlu2 %v2700_v32, %s3071_s6 }
 0x307   :  { %v2702_v35 = vpop.eup %2701 }
 0x308   :  { %v433_v36 = vadd.f32 1.0, %v2702_v35  ;;  %v2704_v37 = vpop.eup %2703 }
 0x309   :  { %v364_v38 = vadd.f32 1.0, %v2704_v37 }
 0x30a   :  { %2705 = vrcp.f32 %v433_v36  ;;  %v445_v47 = vand.u32 2147483648, %v433_v36  ;;  %vm439_vm12 = vweird.f32 %v433_v36  ;;  %v443_v48 = vand.u32 2147483647, %v433_v36 }
 0x30b   :  { %2707 = vrcp.f32 %v364_v38  ;;  %v376_v55 = vand.u32 2147483648, %v364_v38  ;;  %vm370_vm0 = vweird.f32 %v364_v38  ;;  %v374_v57 = vand.u32 2147483647, %v364_v38 }
 0x30c   :  { %v446_v51 = vor.u32 1.1754944e-38, %v445_v47  ;;  %vm444_vm14 = vcmp.eq.f32.partialorder %v443_v48, 8.507059e+37 }
 0x30d   :  { %v377_v59 = vor.u32 1.1754944e-38, %v376_v55  ;;  %vm375_vm2 = vcmp.eq.f32.partialorder %v374_v57, 8.507059e+37 }
 0x310   :  { %v2706_v39 = vpop.eup %2705 }
 0x311   :  { %v435_v40 = vmul.f32 %v2706_v39, %v433_v36  ;;  %v2708_v41 = vpop.eup %2707  ;;  %vm440_vm11 = vweird.f32 %v2706_v39 }
 0x312   :  { %v366_v43 = vmul.f32 %v2708_v41, %v364_v38  ;;  %vm441_vm13 = vmor %vm439_vm12, %vm440_vm11  ;;  %vm371_vm15 = vweird.f32 %v2708_v41 }
 0x313   :  { %v436_v42 = vsub.f32 1.0, %v435_v40  ;;  %vm372_vm1 = vmor %vm370_vm0, %vm371_vm15 }
 0x314   :  { %v367_v45 = vsub.f32 1.0, %v366_v43 }
 0x315   :  { %v437_v44 = vmul.f32 %v2706_v39, %v436_v42 }
 0x316   :  { %v368_v49 = vmul.f32 %v2708_v41, %v367_v45 }
 0x317   :  { %v438_v46 = vadd.f32 %v2706_v39, %v437_v44 }
 0x318   :  { %v369_v52 = vadd.f32 %v2708_v41, %v368_v49 }
 0x319   :  { %v442_v50 = vsel %vm441_vm13, %v2706_v39, %v438_v46 }
 0x31a   :  { %v447_v54 = vsel %vm444_vm14, %v446_v51, %v442_v50  ;;  %v373_v58 = vsel %vm372_vm1, %v2708_v41, %v369_v52 }
 0x31b   :  { %v378_v61 = vsel %vm375_vm2, %v377_v59, %v373_v58  ;;  %v453_v18 = vmul.f32 %v451_v15, %v447_v54 }
 0x31c   :  { %v384_v4 = vmul.f32 %v382_v2, %v378_v61 }
 0x360   :  { %v456_v53 = vpop.permute.xlu2 %455 }
 0x361   :  { %v458_v56 = vmul.f32 %v456_v53, %v447_v54 }
 0x363   :  { %460 = vrot.lane.b32.xlu0 %v458_v56, %s3072_s3 }
 0x366   :  { %v387_v60 = vpop.permute.xlu1 %386 }
 0x367   :  { %v389_v63 = vmul.f32 %v387_v60, %v378_v61 }
 0x369   :  { %391 = vrot.lane.b32.xlu2 %v389_v63, %s3072_s3 }
 0x3c3   :  { %v392_v6 = vpop.permute.xlu2 %391 }
 0x3c4   :  { %v3298_v7 = vadd.f32 %v392_v6, %v384_v4 }
 0x3c6   :  { %2709 = vtanh.f32 %v3298_v7 }
 0x3cc   :  { %v2710_v14 = vpop.eup %2709 }
 0x3cd   :  { %397 = vrot.lane.b32.xlu1 %v2710_v14, %s3071_s6 }
 0x3d5   :  { %v461_v21 = vpop.permute.xlu0 %460 }
 0x3d6   :  { %v3303_v22 = vadd.f32 %v461_v21, %v453_v18 }
 0x3d8   :  { %2711 = vtanh.f32 %v3303_v22  ;;  %v601_v14 = vrot.slane %v3303_v22, 2 }
 0x3de   :  { %v2712_v25 = vpop.eup %2711 }
 0x3df   :  { %466 = vrot.lane.b32.xlu0 %v2712_v25, %s3071_s6 }
 0x43f   :  { %v398_v62 = vpop.permute.xlu1 %397 }
 0x440   :  { %v3307_v26 = vmul.f32 %v398_v62, %v378_v61  ;;  %v532_v62 = vrot.slane %v3298_v7, 6 }
 0x442   :  { %v482_v27 = vrot.slane %v3307_v26, 2 }
 0x444   :  { %483 = vrot.lane.b32.xlu0 %v482_v27, %s3072_s3 }
 0x451   :  { %v467_v28 = vpop.permute.xlu0 %466 }
 0x452   :  { %v3311_v29 = vmul.f32 %v467_v28, %v447_v54 }
 0x454   :  { %v551_v5 = vrot.slane %v3311_v29, 4 }
 0x456   :  { %552 = vrot.lane.b32.xlu2 %v551_v5, %s3072_s3 }
 0x4b0   :  { %v553_v30 = vpop.permute.xlu2 %552 }
 0x4b1   :  { %2610 = vmatmul.msk.f32.vlgmr.msrb.gmra.mxu1 %vm200_vm10, %v553_v30 }
 0x4b2   :  { %861 = vmatpush.msrb.mxu1 %v3193_v9 }
 0x4b4   :  { %862 = vmatpush.msrb.mxu1 %v3199_v11 }
 0x4b6   :  { %v484_v31 = vpop.permute.xlu0 %483  ;;  %863 = vmatpush.msrb.mxu1 %v3204_v12 }
 0x4b7   :  { %2608 = vmatmul.msk.f32.vlgmr.msra.gmra.mxu0 %vm200_vm10, %v484_v31 }
 0x4b8   :  { %864 = vmatpush.msrb.mxu1 %v3210_v13  ;;  %1085 = vmatpush.msra.mxu0 %v3167_v0 }
 0x4ba   :  { %1086 = vmatpush.msra.mxu0 %v3172_v1 }
 0x4bc   :  { %1087 = vmatpush.msra.mxu0 %v3179_v3 }
 0x4be   :  { %1088 = vmatpush.msra.mxu0 %v3188_v8 }
 0x52e   :  { %v573_v32 = vpop.f32.mrf.mxu1 }
 0x52f   :  { %v577_v33 = vrot.slane %v573_v32, 6 }
 0x531   :  { %v579_v34 = vadd.f32 %v577_v33, %v3258_v24 }
 0x533   :  { %2713 = vtanh.f32 %v579_v34  ;;  %v2611_v1 = vmul.f32 -1.442695, %v579_v34 }
 0x534   :  { %v504_v35 = vpop.f32.mrf.mxu0 }
 0x535   :  { %v508_v36 = vrot.slane %v504_v35, 4 }
 0x537   :  { %v510_v37 = vadd.f32 %v508_v36, %v3255_v20 }
 0x539   :  { %v2714_v38 = vpop.eup %2713  ;;  %2715 = vtanh.f32 %v510_v37  ;;  %v2609_v3 = vmul.f32 -1.442695, %v510_v37 }
 0x53a   :  { %605 = vrot.lane.b32.xlu1 %v2714_v38, %s3071_s6  ;;  %2717 = vpow2.f32 %v2611_v1 }
 0x53b   :  { %2719 = vpow2.f32 %v2609_v3 }
 0x53f   :  { %v2716_v0 = vpop.eup %2715 }
 0x540   :  { %536 = vrot.lane.b32.xlu0 %v2716_v0, %s3071_s6  ;;  %v2718_v8 = vpop.eup %2717 }
 0x541   :  { %v583_v39 = vadd.f32 1.0, %v2718_v8  ;;  %v2720_v40 = vpop.eup %2719 }
 0x542   :  { %v514_v41 = vadd.f32 1.0, %v2720_v40 }
 0x543   :  { %2721 = vrcp.f32 %v583_v39  ;;  %v595_v50 = vand.u32 2147483648, %v583_v39  ;;  %vm589_vm4 = vweird.f32 %v583_v39  ;;  %v593_v51 = vand.u32 2147483647, %v583_v39 }
 0x544   :  { %2723 = vrcp.f32 %v514_v41  ;;  %v526_v58 = vand.u32 2147483648, %v514_v41  ;;  %vm520_vm8 = vweird.f32 %v514_v41  ;;  %v524_v60 = vand.u32 2147483647, %v514_v41 }
 0x545   :  { %v596_v54 = vor.u32 1.1754944e-38, %v595_v50  ;;  %vm594_vm6 = vcmp.eq.f32.partialorder %v593_v51, 8.507059e+37 }
 0x546   :  { %v527_v63 = vor.u32 1.1754944e-38, %v526_v58  ;;  %vm525_vm12 = vcmp.eq.f32.partialorder %v524_v60, 8.507059e+37 }
 0x549   :  { %v2722_v42 = vpop.eup %2721 }
 0x54a   :  { %v585_v43 = vmul.f32 %v2722_v42, %v583_v39  ;;  %v2724_v44 = vpop.eup %2723  ;;  %vm590_vm3 = vweird.f32 %v2722_v42 }
 0x54b   :  { %v516_v46 = vmul.f32 %v2724_v44, %v514_v41  ;;  %vm591_vm5 = vmor %vm589_vm4, %vm590_vm3  ;;  %vm521_vm7 = vweird.f32 %v2724_v44 }
 0x54c   :  { %v586_v45 = vsub.f32 1.0, %v585_v43  ;;  %vm522_vm11 = vmor %vm520_vm8, %vm521_vm7 }
 0x54d   :  { %v517_v48 = vsub.f32 1.0, %v516_v46 }
 0x54e   :  { %v587_v47 = vmul.f32 %v2722_v42, %v586_v45 }
 0x54f   :  { %v518_v52 = vmul.f32 %v2724_v44, %v517_v48 }
 0x550   :  { %v588_v49 = vadd.f32 %v2722_v42, %v587_v47 }
 0x551   :  { %v519_v55 = vadd.f32 %v2724_v44, %v518_v52 }
 0x552   :  { %v592_v53 = vsel %vm591_vm5, %v2722_v42, %v588_v49 }
 0x553   :  { %v597_v57 = vsel %vm594_vm6, %v596_v54, %v592_v53  ;;  %v523_v61 = vsel %vm522_vm11, %v2724_v44, %v519_v55 }
 0x554   :  { %v528_v4 = vsel %vm525_vm12, %v527_v63, %v523_v61  ;;  %v603_v15 = vmul.f32 %v601_v14, %v597_v57 }
 0x555   :  { %v534_v27 = vmul.f32 %v532_v62, %v528_v4 }
 0x5ac   :  { %v606_v56 = vpop.permute.xlu1 %605 }
 0x5ad   :  { %v608_v59 = vmul.f32 %v606_v56, %v597_v57 }
 0x5af   :  { %610 = vrot.lane.b32.xlu2 %v608_v59, %s3072_s3 }
 0x5b2   :  { %v537_v2 = vpop.permute.xlu0 %536 }
 0x5b3   :  { %v539_v6 = vmul.f32 %v537_v2, %v528_v4 }
 0x5b5   :  { %541 = vrot.lane.b32.xlu1 %v539_v6, %s3072_s3 }
 0x609   :  { %v611_v18 = vpop.permute.xlu2 %610 }
 0x60a   :  { %v3332_v21 = vadd.f32 %v611_v18, %v603_v15 }
 0x60c   :  { %2725 = vtanh.f32 %v3332_v21 }
 0x612   :  { %v2726_v25 = vpop.eup %2725 }
 0x613   :  { %616 = vrot.lane.b32.xlu2 %v2726_v25, %s3071_s6 }
 0x627   :  { %v542_v28 = vpop.permute.xlu1 %541 }
 0x628   :  { %v3337_v5 = vadd.f32 %v542_v28, %v534_v27 }
 0x62a   :  { %2727 = vtanh.f32 %v3337_v5  ;;  %v682_v25 = vrot.slane %v3337_v5, 6 }
 0x630   :  { %v2728_v30 = vpop.eup %2727 }
 0x631   :  { %547 = vrot.lane.b32.xlu0 %v2728_v30, %s3071_s6 }
 0x66d   :  { %v617_v22 = vpop.permute.xlu2 %616 }
 0x66e   :  { %v3341_v31 = vmul.f32 %v617_v22, %v597_v57 }
 0x670   :  { %v701_v32 = vrot.slane %v3341_v31, 2 }
 0x672   :  { %702 = vrot.lane.b32.xlu1 %v701_v32, %s3072_s3 }
 0x6a3   :  { %v548_v33 = vpop.permute.xlu0 %547 }
 0x6a4   :  { %v3345_v34 = vmul.f32 %v548_v33, %v528_v4  ;;  %v748_v4 = vrot.slane %v3332_v21, 2 }
 0x6a6   :  { %v632_v7 = vrot.slane %v3345_v34, 4 }
 0x6a8   :  { %633 = vrot.lane.b32.xlu2 %v632_v7, %s3072_s3 }
 0x6e4   :  { %v703_v35 = vpop.permute.xlu1 %702 }
 0x6e5   :  { %2614 = vmatmul.msk.f32.vlgmr.msrb.gmra.mxu3 %vm200_vm10, %v703_v35 }
 0x6e6   :  { %1302 = vmatpush.msrb.mxu3 %v3193_v9 }
 0x6e8   :  { %1303 = vmatpush.msrb.mxu3 %v3199_v11 }
 0x6ea   :  { %1304 = vmatpush.msrb.mxu3 %v3204_v12 }
 0x6ec   :  { %1305 = vmatpush.msrb.mxu3 %v3210_v13 }
 0x702   :  { %v634_v36 = vpop.permute.xlu2 %633 }
 0x703   :  { %2612 = vmatmul.msk.f32.vlgmr.msra.gmra.mxu1 %vm200_vm10, %v634_v36 }
 0x704   :  { %1154 = vmatpush.msra.mxu1 %v3193_v9 }
 0x706   :  { %1155 = vmatpush.msra.mxu1 %v3199_v11 }
 0x708   :  { %1156 = vmatpush.msra.mxu1 %v3204_v12 }
 0x70a   :  { %1157 = vmatpush.msra.mxu1 %v3210_v13 }
 0x768   :  { %v723_v37 = vpop.f32.mrf.mxu3 }
 0x769   :  { %v726_v38 = vadd.f32 %v723_v37, %v3258_v24 }
 0x76b   :  { %2729 = vtanh.f32 %v726_v38  ;;  %v2615_v9 = vmul.f32 -1.442695, %v726_v38 }
 0x771   :  { %v2730_v0 = vpop.eup %2729 }
 0x772   :  { %752 = vrot.lane.b32.xlu0 %v2730_v0, %s3071_s6 }
 0x780   :  { %v654_v1 = vpop.f32.mrf.mxu1 }
 0x781   :  { %v658_v3 = vrot.slane %v654_v1, 2  ;;  %v3389_v1 = vadd.f32 %v3250_v16, %v3289_v23 }
 0x783   :  { %v660_v8 = vadd.f32 %v658_v3, %v3255_v20 }
 0x785   :  { %2731 = vtanh.f32 %v660_v8  ;;  %v2613_v40 = vmul.f32 -1.442695, %v660_v8 }
 0x786   :  { %2733 = vpow2.f32 %v2615_v9 }
 0x78b   :  { %v2732_v39 = vpop.eup %2731 }
 0x78c   :  { %686 = vrot.lane.b32.xlu1 %v2732_v39, %s3071_s6  ;;  %v2734_v11 = vpop.eup %2733 }
 0x78d   :  { %v730_v12 = vadd.f32 1.0, %v2734_v11 }
 0x78f   :  { %2735 = vrcp.f32 %v730_v12  ;;  %v742_v20 = vand.u32 2147483648, %v730_v12  ;;  %vm736_vm14 = vweird.f32 %v730_v12  ;;  %v740_v46 = vand.u32 2147483647, %v730_v12 }
 0x790   :  { %2737 = vpow2.f32 %v2613_v40 }
 0x791   :  { %v743_v48 = vor.u32 1.1754944e-38, %v742_v20  ;;  %vm741_vm0 = vcmp.eq.f32.partialorder %v740_v46, 8.507059e+37 }
 0x795   :  { %v2736_v13 = vpop.eup %2735 }
 0x796   :  { %v732_v24 = vmul.f32 %v2736_v13, %v730_v12  ;;  %v2738_v43 = vpop.eup %2737  ;;  %vm737_vm13 = vweird.f32 %v2736_v13 }
 0x797   :  { %v664_v45 = vadd.f32 1.0, %v2738_v43  ;;  %vm738_vm15 = vmor %vm736_vm14, %vm737_vm13 }
 0x798   :  { %v733_v41 = vsub.f32 1.0, %v732_v24 }
 0x799   :  { %2739 = vrcp.f32 %v664_v45  ;;  %v676_v57 = vand.u32 2147483648, %v664_v45  ;;  %vm670_vm2 = vweird.f32 %v664_v45  ;;  %v674_v58 = vand.u32 2147483647, %v664_v45 }
 0x79a   :  { %v734_v42 = vmul.f32 %v2736_v13, %v733_v41 }
 0x79b   :  { %v677_v60 = vor.u32 1.1754944e-38, %v676_v57  ;;  %vm675_vm4 = vcmp.eq.f32.partialorder %v674_v58, 8.507059e+37 }
 0x79c   :  { %v735_v44 = vadd.f32 %v2736_v13, %v734_v42 }
 0x79e   :  { %v739_v47 = vsel %vm738_vm15, %v2736_v13, %v735_v44 }
 0x79f   :  { %v744_v49 = vsel %vm741_vm0, %v743_v48, %v739_v47  ;;  %v2740_v52 = vpop.eup %2739 }
 0x7a0   :  { %v666_v53 = vmul.f32 %v2740_v52, %v664_v45  ;;  %vm671_vm1 = vweird.f32 %v2740_v52  ;;  %v750_v6 = vmul.f32 %v748_v4, %v744_v49 }
 0x7a1   :  { %vm672_vm3 = vmor %vm670_vm2, %vm671_vm1 }
 0x7a2   :  { %v667_v54 = vsub.f32 1.0, %v666_v53 }
 0x7a4   :  { %v668_v55 = vmul.f32 %v2740_v52, %v667_v54 }
 0x7a6   :  { %v669_v56 = vadd.f32 %v2740_v52, %v668_v55 }
 0x7a8   :  { %v673_v59 = vsel %vm672_vm3, %v2740_v52, %v669_v56 }
 0x7a9   :  { %v678_v63 = vsel %vm675_vm4, %v677_v60, %v673_v59 }
 0x7aa   :  { %v684_v62 = vmul.f32 %v682_v25, %v678_v63 }
 0x7e4   :  { %v753_v50 = vpop.permute.xlu0 %752 }
 0x7e5   :  { %v755_v51 = vmul.f32 %v753_v50, %v744_v49 }
 0x7e7   :  { %757 = vrot.lane.b32.xlu2 %v755_v51, %s3072_s3 }
 0x7fe   :  { %v687_v61 = vpop.permute.xlu1 %686 }
 0x7ff   :  { %v689_v2 = vmul.f32 %v687_v61, %v678_v63 }
 0x801   :  { %691 = vrot.lane.b32.xlu0 %v689_v2, %s3072_s3 }
 0x841   :  { %v758_v14 = vpop.permute.xlu2 %757 }
 0x842   :  { %v3366_v15 = vadd.f32 %v758_v14, %v750_v6 }
 0x844   :  { %2741 = vtanh.f32 %v3366_v15 }
 0x84a   :  { %v2742_v18 = vpop.eup %2741 }
 0x84b   :  { %763 = vrot.lane.b32.xlu1 %v2742_v18, %s3071_s6 }
 0x873   :  { %v692_v27 = vpop.permute.xlu0 %691 }
 0x874   :  { %v3371_v28 = vadd.f32 %v692_v27, %v684_v62 }
 0x876   :  { %2743 = vtanh.f32 %v3371_v28  ;;  %v826_v18 = vrot.slane %v3371_v28, 6 }
 0x87c   :  { %v2744_v30 = vpop.eup %2743 }
 0x87d   :  { %697 = vrot.lane.b32.xlu2 %v2744_v30, %s3071_s6 }
 0x8bd   :  { %v764_v21 = vpop.permute.xlu1 %763 }
 0x8be   :  { %v3375_v22 = vmul.f32 %v764_v21, %v744_v49 }
 0x8c0   :  { %845 = vrot.lane.b32.xlu0 %v3375_v22, %s3072_s3 }
 0x8d7   :  { %v698_v32 = vpop.permute.xlu2 %697 }
 0x8d8   :  { %v3379_v33 = vmul.f32 %v698_v32, %v678_v63  ;;  %v894_v63 = vrot.slane %v3366_v15, 2 }
 0x8da   :  { %v779_v5 = vrot.slane %v3379_v33, 6 }
 0x8dc   :  { %780 = vrot.lane.b32.xlu1 %v779_v5, %s3072_s3 }
 0x932   :  { %v846_v7 = vpop.permute.xlu0 %845 }
 0x933   :  { %2618 = vmatmul.msk.f32.vlgmr.msrb.gmra.mxu1 %vm200_vm10, %v846_v7 }
 0x94e   :  { %v781_v35 = vpop.permute.xlu1 %780 }
 0x94f   :  { %2616 = vmatmul.msk.f32.vlgmr.msrb.gmra.mxu0 %vm200_vm10, %v781_v35 }
 0x9b0   :  { %v866_v36 = vpop.f32.mrf.mxu1 }
 0x9b1   :  { %v870_v37 = vrot.slane %v866_v36, 2 }
 0x9b3   :  { %v872_v38 = vadd.f32 %v870_v37, %v3252_v19 }
 0x9b5   :  { %2745 = vtanh.f32 %v872_v38  ;;  %v2619_v9 = vmul.f32 -1.442695, %v872_v38 }
 0x9bb   :  { %v2746_v0 = vpop.eup %2745 }
 0x9bc   :  { %898 = vrot.lane.b32.xlu2 %v2746_v0, %s3071_s6 }
 0x9cc   :  { %v801_v3 = vpop.f32.mrf.mxu0 }
 0x9cd   :  { %v804_v8 = vadd.f32 %v801_v3, %v3389_v1 }
 0x9cf   :  { %2747 = vtanh.f32 %v804_v8  ;;  %v2617_v47 = vmul.f32 -1.442695, %v804_v8 }
 0x9d0   :  { %2749 = vpow2.f32 %v2619_v9 }
 0x9d5   :  { %v2748_v39 = vpop.eup %2747 }
 0x9d6   :  { %830 = vrot.lane.b32.xlu0 %v2748_v39, %s3071_s6  ;;  %v2750_v11 = vpop.eup %2749 }
 0x9d7   :  { %v876_v12 = vadd.f32 1.0, %v2750_v11 }
 0x9d9   :  { %2751 = vrcp.f32 %v876_v12  ;;  %v888_v16 = vand.u32 2147483648, %v876_v12  ;;  %vm882_vm6 = vweird.f32 %v876_v12  ;;  %v886_v23 = vand.u32 2147483647, %v876_v12 }
 0x9da   :  { %2753 = vpow2.f32 %v2617_v47 }
 0x9db   :  { %v889_v44 = vor.u32 1.1754944e-38, %v888_v16  ;;  %vm887_vm8 = vcmp.eq.f32.partialorder %v886_v23, 8.507059e+37 }
 0x9df   :  { %v2752_v13 = vpop.eup %2751 }
 0x9e0   :  { %v878_v40 = vmul.f32 %v2752_v13, %v876_v12  ;;  %vm883_vm5 = vweird.f32 %v2752_v13  ;;  %v2754_v48 = vpop.eup %2753 }
 0x9e1   :  { %vm884_vm7 = vmor %vm882_vm6, %vm883_vm5  ;;  %v808_v49 = vadd.f32 1.0, %v2754_v48 }
 0x9e2   :  { %v879_v24 = vsub.f32 1.0, %v878_v40 }
 0x9e3   :  { %2755 = vrcp.f32 %v808_v49  ;;  %v820_v55 = vand.u32 2147483648, %v808_v49  ;;  %vm814_vm12 = vweird.f32 %v808_v49  ;;  %v818_v56 = vand.u32 2147483647, %v808_v49 }
 0x9e4   :  { %v880_v41 = vmul.f32 %v2752_v13, %v879_v24 }
 0x9e5   :  { %v821_v58 = vor.u32 1.1754944e-38, %v820_v55  ;;  %vm819_vm14 = vcmp.eq.f32.partialorder %v818_v56, 8.507059e+37 }
 0x9e6   :  { %v881_v42 = vadd.f32 %v2752_v13, %v880_v41 }
 0x9e8   :  { %v885_v43 = vsel %vm884_vm7, %v2752_v13, %v881_v42 }
 0x9e9   :  { %v890_v20 = vsel %vm887_vm8, %v889_v44, %v885_v43  ;;  %v2756_v50 = vpop.eup %2755 }
 0x9ea   :  { %v810_v51 = vmul.f32 %v2756_v50, %v808_v49  ;;  %vm815_vm11 = vweird.f32 %v2756_v50  ;;  %v896_v2 = vmul.f32 %v894_v63, %v890_v20 }
 0x9eb   :  { %vm816_vm13 = vmor %vm814_vm12, %vm815_vm11 }
 0x9ec   :  { %v811_v52 = vsub.f32 1.0, %v810_v51 }
 0x9ee   :  { %v812_v53 = vmul.f32 %v2756_v50, %v811_v52 }
 0x9f0   :  { %v813_v54 = vadd.f32 %v2756_v50, %v812_v53 }
 0x9f2   :  { %v817_v57 = vsel %vm816_vm13, %v2756_v50, %v813_v54 }
 0x9f3   :  { %v822_v59 = vsel %vm819_vm14, %v821_v58, %v817_v57 }
 0x9f4   :  { %v828_v25 = vmul.f32 %v826_v18, %v822_v59 }
 0xa16   :  { %v899_v45 = vpop.permute.xlu2 %898 }
 0xa17   :  { %v901_v46 = vmul.f32 %v899_v45, %v890_v20 }
 0xa19   :  { %903 = vrot.lane.b32.xlu1 %v901_v46, %s3072_s3 }
 0xa48   :  { %v831_v60 = vpop.permute.xlu0 %830 }
 0xa49   :  { %v833_v61 = vmul.f32 %v831_v60, %v822_v59 }
 0xa4b   :  { %835 = vrot.lane.b32.xlu2 %v833_v61, %s3072_s3 }
 0xa8b   :  { %v904_v4 = vpop.permute.xlu1 %903 }
 0xa8c   :  { %v3396_v6 = vadd.f32 %v904_v4, %v896_v2 }
 0xa8e   :  { %2757 = vtanh.f32 %v3396_v6  ;;  %v1039_v2 = vrot.slane %v3396_v6, 2 }
 0xa94   :  { %v2758_v14 = vpop.eup %2757 }
 0xa95   :  { %909 = vrot.lane.b32.xlu0 %v2758_v14, %s3071_s6 }
 0xaa5   :  { %v836_v62 = vpop.permute.xlu2 %835 }
 0xaa6   :  { %v3401_v27 = vadd.f32 %v836_v62, %v828_v25 }
 0xaa8   :  { %2759 = vtanh.f32 %v3401_v27  ;;  %v970_v62 = vrot.slane %v3401_v27, 6 }
 0xaae   :  { %v2760_v30 = vpop.eup %2759 }
 0xaaf   :  { %841 = vrot.lane.b32.xlu1 %v2760_v30, %s3071_s6 }
 0xb07   :  { %v910_v15 = vpop.permute.xlu0 %909 }
 0xb08   :  { %v3405_v21 = vmul.f32 %v910_v15, %v890_v20 }
 0xb0a   :  { %v989_v32 = vrot.slane %v3405_v21, 6 }
 0xb0c   :  { %990 = vrot.lane.b32.xlu2 %v989_v32, %s3072_s3 }
 0xb21   :  { %v842_v5 = vpop.permute.xlu1 %841 }
 0xb22   :  { %v844_v7 = vmul.f32 %v842_v5, %v822_v59 }
 0xb24   :  { %914 = vrot.lane.b32.xlu0 %v844_v7, %s3072_s3 }
 0xb66   :  { %v991_v28 = vpop.permute.xlu2 %990 }
 0xb67   :  { %2622 = vmatmul.msk.f32.vlgmr.msra.gmra.mxu3 %vm200_vm10, %v991_v28 }
 0xb96   :  { %v3411_v35 = vpop.permute.xlu0 %914 }
 0xb97   :  { %2620 = vmatmul.msk.f32.vlgmr.msra.gmra.mxu2 %vm200_vm10, %v3411_v35 }
 0xbea   :  { %v1011_v36 = vpop.f32.mrf.mxu3 }
 0xbeb   :  { %v1015_v37 = vrot.slane %v1011_v36, 4 }
 0xbed   :  { %v1017_v38 = vadd.f32 %v1015_v37, %v3252_v19 }
 0xbef   :  { %2761 = vtanh.f32 %v1017_v38  ;;  %v2623_v11 = vmul.f32 -1.442695, %v1017_v38 }
 0xbf5   :  { %v2762_v0 = vpop.eup %2761 }
 0xbf6   :  { %1043 = vrot.lane.b32.xlu1 %v2762_v0, %s3071_s6 }
 0xc1a   :  { %v942_v3 = vpop.f32.mrf.mxu2 }
 0xc1b   :  { %v946_v8 = vrot.slane %v942_v3, 6 }
 0xc1d   :  { %v948_v39 = vadd.f32 %v946_v8, %v3389_v1 }
 0xc1f   :  { %2763 = vtanh.f32 %v948_v39  ;;  %v2621_v24 = vmul.f32 -1.442695, %v948_v39 }
 0xc20   :  { %2765 = vpow2.f32 %v2623_v11 }
 0xc25   :  { %v2764_v9 = vpop.eup %2763 }
 0xc26   :  { %974 = vrot.lane.b32.xlu2 %v2764_v9, %s3071_s6  ;;  %v2766_v12 = vpop.eup %2765 }
 0xc27   :  { %v1021_v13 = vadd.f32 1.0, %v2766_v12 }
 0xc29   :  { %2767 = vrcp.f32 %v1021_v13  ;;  %v1033_v45 = vand.u32 2147483648, %v1021_v13  ;;  %vm1027_vm0 = vweird.f32 %v1021_v13  ;;  %v1031_v20 = vand.u32 2147483647, %v1021_v13 }
 0xc2a   :  { %2769 = vpow2.f32 %v2621_v24 }
 0xc2b   :  { %v1034_v47 = vor.u32 1.1754944e-38, %v1033_v45  ;;  %vm1032_vm2 = vcmp.eq.f32.partialorder %v1031_v20, 8.507059e+37 }
 0xc2f   :  { %v2768_v40 = vpop.eup %2767 }
 0xc30   :  { %v1023_v41 = vmul.f32 %v2768_v40, %v1021_v13  ;;  %v2770_v16 = vpop.eup %2769  ;;  %vm1028_vm15 = vweird.f32 %v2768_v40 }
 0xc31   :  { %v952_v43 = vadd.f32 1.0, %v2770_v16  ;;  %vm1029_vm1 = vmor %vm1027_vm0, %vm1028_vm15 }
 0xc32   :  { %v1024_v42 = vsub.f32 1.0, %v1023_v41 }
 0xc33   :  { %2771 = vrcp.f32 %v952_v43  ;;  %v964_v56 = vand.u32 2147483648, %v952_v43  ;;  %vm958_vm4 = vweird.f32 %v952_v43  ;;  %v962_v57 = vand.u32 2147483647, %v952_v43 }
 0xc34   :  { %v1025_v23 = vmul.f32 %v2768_v40, %v1024_v42 }
 0xc35   :  { %v965_v59 = vor.u32 1.1754944e-38, %v964_v56  ;;  %vm963_vm6 = vcmp.eq.f32.partialorder %v962_v57, 8.507059e+37 }
 0xc36   :  { %v1026_v44 = vadd.f32 %v2768_v40, %v1025_v23 }
 0xc38   :  { %v1030_v46 = vsel %vm1029_vm1, %v2768_v40, %v1026_v44 }
 0xc39   :  { %v1035_v49 = vsel %vm1032_vm2, %v1034_v47, %v1030_v46  ;;  %v2772_v51 = vpop.eup %2771 }
 0xc3a   :  { %v954_v52 = vmul.f32 %v2772_v51, %v952_v43  ;;  %vm959_vm3 = vweird.f32 %v2772_v51  ;;  %v1041_v4 = vmul.f32 %v1039_v2, %v1035_v49 }
 0xc3b   :  { %vm960_vm5 = vmor %vm958_vm4, %vm959_vm3 }
 0xc3c   :  { %v955_v53 = vsub.f32 1.0, %v954_v52 }
 0xc3e   :  { %v956_v54 = vmul.f32 %v2772_v51, %v955_v53 }
 0xc40   :  { %v957_v55 = vadd.f32 %v2772_v51, %v956_v54 }
 0xc42   :  { %v961_v58 = vsel %vm960_vm5, %v2772_v51, %v957_v55 }
 0xc43   :  { %v966_v61 = vsel %vm963_vm6, %v965_v59, %v961_v58 }
 0xc44   :  { %v972_v30 = vmul.f32 %v970_v62, %v966_v61 }
 0xc68   :  { %v1044_v48 = vpop.permute.xlu1 %1043 }
 0xc69   :  { %v1046_v50 = vmul.f32 %v1044_v48, %v1035_v49 }
 0xc6b   :  { %1048 = vrot.lane.b32.xlu0 %v1046_v50, %s3072_s3 }
 0xc80   :  { %v975_v60 = vpop.permute.xlu2 %974 }
 0xc81   :  { %v977_v63 = vmul.f32 %v975_v60, %v966_v61 }
 0xc83   :  { %979 = vrot.lane.b32.xlu1 %v977_v63, %s3072_s3 }
 0xcdd   :  { %v1049_v14 = vpop.permute.xlu0 %1048 }
 0xcde   :  { %v3422_v18 = vadd.f32 %v1049_v14, %v1041_v4 }
 0xce0   :  { %2773 = vtanh.f32 %v3422_v18  ;;  %v1187_v62 = vrot.slane %v3422_v18, 2 }
 0xce6   :  { %v2774_v25 = vpop.eup %2773 }
 0xce7   :  { %1054 = vrot.lane.b32.xlu2 %v2774_v25, %s3071_s6 }
 0xcf5   :  { %v980_v15 = vpop.permute.xlu1 %979 }
 0xcf6   :  { %v3427_v32 = vadd.f32 %v980_v15, %v972_v30 }
 0xcf8   :  { %2775 = vtanh.f32 %v3427_v32 }
 0xcfe   :  { %v2776_v5 = vpop.eup %2775 }
 0xcff   :  { %985 = vrot.lane.b32.xlu0 %v2776_v5, %s3071_s6 }
 0xd41   :  { %v1055_v6 = vpop.permute.xlu2 %1054 }
 0xd42   :  { %v3431_v7 = vmul.f32 %v1055_v6, %v1035_v49 }
 0xd44   :  { %v1137_v28 = vrot.slane %v3431_v7, 4 }
 0xd46   :  { %1138 = vrot.lane.b32.xlu1 %v1137_v28, %s3072_s3  ;;  %v1118_v28 = vrot.slane %v3427_v32, 6 }
 0xd71   :  { %v986_v36 = vpop.permute.xlu0 %985 }
 0xd72   :  { %v3435_v37 = vmul.f32 %v986_v36, %v966_v61 }
 0xd74   :  { %v1068_v27 = vrot.slane %v3435_v37, 2 }
 0xd76   :  { %1069 = vrot.lane.b32.xlu2 %v1068_v27, %s3072_s3 }
 0xdb8   :  { %v1139_v38 = vpop.permute.xlu1 %1138 }
 0xdb9   :  { %2626 = vmatmul.msk.f32.vlgmr.msra.gmra.mxu1 %vm200_vm10, %v1139_v38 }
 0xdd0   :  { %v1070_v0 = vpop.permute.xlu2 %1069 }
 0xdd1   :  { %2624 = vmatmul.msk.f32.vlgmr.msra.gmra.mxu0 %vm200_vm10, %v1070_v0 }
 0xe36   :  { %v1159_v3 = vpop.f32.mrf.mxu1 }
 0xe37   :  { %v1163_v8 = vrot.slane %v1159_v3, 6 }
 0xe39   :  { %v1165_v39 = vadd.f32 %v1163_v8, %v3252_v19 }
 0xe3b   :  { %2777 = vtanh.f32 %v1165_v39  ;;  %v2627_v24 = vmul.f32 -1.442695, %v1165_v39 }
 0xe41   :  { %v2778_v9 = vpop.eup %2777 }
 0xe42   :  { %1191 = vrot.lane.b32.xlu0 %v2778_v9, %s3071_s6 }
 0xe4e   :  { %v1090_v11 = vpop.f32.mrf.mxu0 }
 0xe4f   :  { %v1094_v12 = vrot.slane %v1090_v11, 4 }
 0xe51   :  { %v1096_v13 = vadd.f32 %v1094_v12, %v3389_v1 }
 0xe53   :  { %2779 = vtanh.f32 %v1096_v13  ;;  %v2625_v23 = vmul.f32 -1.442695, %v1096_v13 }
 0xe54   :  { %2781 = vpow2.f32 %v2627_v24 }
 0xe59   :  { %v2780_v40 = vpop.eup %2779 }
 0xe5a   :  { %1122 = vrot.lane.b32.xlu1 %v2780_v40, %s3071_s6  ;;  %v2782_v41 = vpop.eup %2781 }
 0xe5b   :  { %v1169_v42 = vadd.f32 1.0, %v2782_v41 }
 0xe5d   :  { %2783 = vrcp.f32 %v1169_v42  ;;  %v1181_v48 = vand.u32 2147483648, %v1169_v42  ;;  %vm1175_vm8 = vweird.f32 %v1169_v42  ;;  %v1179_v49 = vand.u32 2147483647, %v1169_v42 }
 0xe5e   :  { %2785 = vpow2.f32 %v2625_v23 }
 0xe5f   :  { %v1182_v51 = vor.u32 1.1754944e-38, %v1181_v48  ;;  %vm1180_vm12 = vcmp.eq.f32.partialorder %v1179_v49, 8.507059e+37 }
 0xe63   :  { %v2784_v16 = vpop.eup %2783 }
 0xe64   :  { %v1171_v43 = vmul.f32 %v2784_v16, %v1169_v42  ;;  %v2786_v45 = vpop.eup %2785  ;;  %vm1176_vm7 = vweird.f32 %v2784_v16 }
 0xe65   :  { %v1100_v46 = vadd.f32 1.0, %v2786_v45  ;;  %vm1177_vm11 = vmor %vm1175_vm8, %vm1176_vm7 }
 0xe66   :  { %v1172_v44 = vsub.f32 1.0, %v1171_v43 }
 0xe67   :  { %2787 = vrcp.f32 %v1100_v46  ;;  %v1112_v60 = vand.u32 2147483648, %v1100_v46  ;;  %vm1106_vm14 = vweird.f32 %v1100_v46  ;;  %v1110_v61 = vand.u32 2147483647, %v1100_v46 }
 0xe68   :  { %v1173_v20 = vmul.f32 %v2784_v16, %v1172_v44 }
 0xe69   :  { %v1113_v2 = vor.u32 1.1754944e-38, %v1112_v60  ;;  %vm1111_vm0 = vcmp.eq.f32.partialorder %v1110_v61, 8.507059e+37 }
 0xe6a   :  { %v1174_v47 = vadd.f32 %v2784_v16, %v1173_v20 }
 0xe6c   :  { %v1178_v50 = vsel %vm1177_vm11, %v2784_v16, %v1174_v47  ;;  %vm474_vm11 = vcmask 257026  }
 0xe6d   :  { %v1183_v52 = vsel %vm1180_vm12, %v1182_v51, %v1178_v50  ;;  %v2788_v55 = vpop.eup %2787  ;;  %vm624_vm12 = vcmask 259076  }
 0xe6e   :  { %v1102_v56 = vmul.f32 %v2788_v55, %v1100_v46  ;;  %vm1107_vm13 = vweird.f32 %v2788_v55  ;;  %v1189_v30 = vmul.f32 %v1187_v62, %v1183_v52 }
 0xe6f   :  { %vm1108_vm15 = vmor %vm1106_vm14, %vm1107_vm13  ;;  %vm480_vm13 = vcmask 521476   ;;  %vm333_vm14 = vcmask 523526  }
 0xe70   :  { %v1103_v57 = vsub.f32 1.0, %v1102_v56 }
 0xe72   :  { %v1104_v58 = vmul.f32 %v2788_v55, %v1103_v57 }
 0xe74   :  { %v1105_v59 = vadd.f32 %v2788_v55, %v1104_v58 }
 0xe76   :  { %v1109_v63 = vsel %vm1108_vm15, %v2788_v55, %v1105_v59  ;;  %vm777_vm15 = vcmask 517376  }
 0xe77   :  { %v1114_v14 = vsel %vm1111_vm0, %v1113_v2, %v1109_v63  ;;  %vm771_vm0 = vcmask 261126  }
 0xe78   :  { %v1120_v36 = vmul.f32 %v1118_v28, %v1114_v14 }
 0xeb4   :  { %v1192_v53 = vpop.permute.xlu0 %1191 }
 0xeb5   :  { %v1194_v54 = vmul.f32 %v1192_v53, %v1183_v52 }
 0xeb7   :  { %1196 = vrot.lane.b32.xlu2 %v1194_v54, %s3072_s3 }
 0xecc   :  { %v1123_v4 = vpop.permute.xlu1 %1122 }
 0xecd   :  { %v1125_v25 = vmul.f32 %v1123_v4, %v1114_v14 }
 0xecf   :  { %1127 = vrot.lane.b32.xlu0 %v1125_v25, %s3072_s3 }
 0xf11   :  { %v1197_v15 = vpop.permute.xlu2 %1196 }
 0xf12   :  { %v3448_v5 = vadd.f32 %v1197_v15, %v1189_v30 }
 0xf14   :  { %2789 = vtanh.f32 %v3448_v5 }
 0xf1a   :  { %v2790_v6 = vpop.eup %2789 }
 0xf1b   :  { %1202 = vrot.lane.b32.xlu1 %v2790_v6, %s3071_s6  ;;  %v1332_v6 = vrot.slane %v3448_v5, 2 }
 0xf41   :  { %v1128_v27 = vpop.permute.xlu0 %1127 }
 0xf42   :  { %v3453_v38 = vadd.f32 %v1128_v27, %v1120_v36 }
 0xf44   :  { %2791 = vtanh.f32 %v3453_v38 }
 0xf4a   :  { %v2792_v0 = vpop.eup %2791 }
 0xf4b   :  { %1133 = vrot.lane.b32.xlu2 %v2792_v0, %s3071_s6 }
 0xf8d   :  { %v1203_v18 = vpop.permute.xlu1 %1202 }
 0xf8e   :  { %v3457_v3 = vmul.f32 %v1203_v18, %v1183_v52  ;;  %v1266_v18 = vrot.slane %v3453_v38, 6  ;;  %v1369_v38 = vld [vmem:[%s3891_s7 + $0x30] sm:$0xff] }
 0xf90   :  { %v1285_v8 = vrot.slane %v3457_v3, 2 }
 0xf92   :  { %1286 = vrot.lane.b32.xlu0 %v1285_v8, %s3072_s3 }
 0xfa5   :  { %v1134_v39 = vpop.permute.xlu2 %1133 }
 0xfa6   :  { %v3461_v9 = vmul.f32 %v1134_v39, %v1114_v14 }
 0xfa8   :  { %v1216_v32 = vrot.slane %v3461_v9, 4 }
 0xfaa   :  { %1217 = vrot.lane.b32.xlu1 %v1216_v32, %s3072_s3  ;;  %v3521_v32 = vld [vmem:[#allocation8 + $0x18] sm:$0xff] }
 0xfab   :  { %1460 = vmatpush.msra.mxu2 %v3521_v32 }
0x1004   :  { %v1287_v11 = vpop.permute.xlu0 %1286 }
0x1005   :  { %2630 = vmatmul.msk.f32.vlgmr.msrb.gmra.mxu3 %vm200_vm10, %v1287_v11  ;;  %v1368_v11 = vld [vmem:[%s3891_s7 + $0x28] sm:$0xff] }
0x101c   :  { %v1218_v12 = vpop.permute.xlu1 %1217 }
0x101d   :  { %2628 = vmatmul.msk.f32.vlgmr.msrb.gmra.mxu2 %vm200_vm10, %v1218_v12  ;;  %v3527_v12 = vld [vmem:[#allocation8 + $0x10] sm:$0xff] }
0x101e   :  { %1461 = vmatpush.msra.mxu2 %v3527_v12 }
0x1088   :  { %v1307_v13 = vpop.f32.mrf.mxu3 }
0x1089   :  { %v1310_v40 = vadd.f32 %v1307_v13, %v3252_v19  ;;  %v1381_v13 = vld [vmem:[%s3894_s10 + $0x28] sm:$0xff] }
0x108b   :  { %2793 = vtanh.f32 %v1310_v40  ;;  %v2631_v43 = vmul.f32 -1.442695, %v1310_v40  ;;  %v1367_v40 = vld [vmem:[%s3891_s7 + $0x20] sm:$0xff] }
0x1091   :  { %v2794_v24 = vpop.eup %2793 }
0x1092   :  { %1336 = vrot.lane.b32.xlu2 %v2794_v24, %s3071_s6  ;;  %v1380_v24 = vld [vmem:[%s3894_s10 + $0x20] sm:$0xff] }
0x10a0   :  { %v1238_v41 = vpop.f32.mrf.mxu2 }
0x10a1   :  { %v1242_v42 = vrot.slane %v1238_v41, 2 }
0x10a3   :  { %v1244_v16 = vadd.f32 %v1242_v42, %v3389_v1 }
0x10a5   :  { %2795 = vtanh.f32 %v1244_v16  ;;  %v2629_v55 = vmul.f32 -1.442695, %v1244_v16 }
0x10a6   :  { %2797 = vpow2.f32 %v2631_v43 }
0x10ab   :  { %v2796_v23 = vpop.eup %2795 }
0x10ac   :  { %1270 = vrot.lane.b32.xlu0 %v2796_v23, %s3071_s6  ;;  %v2798_v44 = vpop.eup %2797 }
0x10ad   :  { %v1314_v45 = vadd.f32 1.0, %v2798_v44  ;;  %v3547_v44 = vld [vmem:[#allocation8 + $0x8] sm:$0xff] }
0x10ae   :  { %1462 = vmatpush.msra.mxu2 %v3547_v44 }
0x10af   :  { %2799 = vrcp.f32 %v1314_v45  ;;  %v1326_v49 = vand.u32 2147483648, %v1314_v45  ;;  %vm1320_vm2 = vweird.f32 %v1314_v45  ;;  %v1324_v50 = vand.u32 2147483647, %v1314_v45 }
0x10b0   :  { %2801 = vpow2.f32 %v2629_v55 }
0x10b1   :  { %v1327_v51 = vor.u32 1.1754944e-38, %v1326_v49  ;;  %vm1325_vm4 = vcmp.eq.f32.partialorder %v1324_v50, 8.507059e+37  ;;  %v1363_v49 = vld [vmem:[%s3891_s7] sm:$0xff] }
0x10b2   :  { %v1376_v50 = vld [vmem:[%s3894_s10] sm:$0xff] }
0x10b5   :  { %v2800_v20 = vpop.eup %2799 }
0x10b6   :  { %v1316_v46 = vmul.f32 %v2800_v20, %v1314_v45  ;;  %vm1321_vm1 = vweird.f32 %v2800_v20  ;;  %v2802_v56 = vpop.eup %2801  ;;  %v1379_v45 = vld [vmem:[%s3894_s10 + $0x18] sm:$0xff] }
0x10b7   :  { %vm1322_vm3 = vmor %vm1320_vm2, %vm1321_vm1  ;;  %v1248_v57 = vadd.f32 1.0, %v2802_v56  ;;  %vm630_vm1 = vcmask 519426  }
0x10b8   :  { %v1317_v19 = vsub.f32 1.0, %v1316_v46  ;;  %v1365_v46 = vld [vmem:[%s3891_s7 + $0x10] sm:$0xff] }
0x10b9   :  { %2803 = vrcp.f32 %v1248_v57  ;;  %v1260_v2 = vand.u32 2147483648, %v1248_v57  ;;  %vm1254_vm6 = vweird.f32 %v1248_v57  ;;  %v1258_v4 = vand.u32 2147483647, %v1248_v57 }
0x10ba   :  { %v1318_v47 = vmul.f32 %v2800_v20, %v1317_v19  ;;  %v1378_v19 = vld [vmem:[%s3894_s10 + $0x10] sm:$0xff] }
0x10bb   :  { %v1261_v25 = vor.u32 1.1754944e-38, %v1260_v2  ;;  %vm1259_vm8 = vcmp.eq.f32.partialorder %v1258_v4, 8.507059e+37 }
0x10bc   :  { %v1319_v48 = vadd.f32 %v2800_v20, %v1318_v47  ;;  %v1364_v47 = vld [vmem:[%s3891_s7 + $0x8] sm:$0xff] }
0x10be   :  { %v1323_v1 = vsel %vm1322_vm3, %v2800_v20, %v1319_v48  ;;  %v3556_v20 = vld [vmem:[#allocation8] sm:$0xff]  ;;  %v1377_v48 = vld [vmem:[%s3894_s10 + $0x8] sm:$0xff] }
0x10bf   :  { %v1328_v53 = vsel %vm1325_vm4, %v1327_v51, %v1323_v1  ;;  %v2804_v58 = vpop.eup %2803  ;;  %1463 = vmatpush.msra.mxu2 %v3556_v20  ;;  %v3588_v1 = vld [vmem:[#allocation10 + $0x18] sm:$0xff]  ;;  %v3590_v51 = vld [vmem:[#allocation10 + $0x10] sm:$0xff] }
0x10c0   :  { %v1250_v59 = vmul.f32 %v2804_v58, %v1248_v57  ;;  %vm1255_vm5 = vweird.f32 %v2804_v58  ;;  %v1334_v28 = vmul.f32 %v1332_v6, %v1328_v53  ;;  %1464 = vmatmul.f32.vlgmr.msra.gmra.mxu2 %v3070_v10  ;;  %1518 = vmatpush.msra.mxu3 %v3588_v1 }
0x10c1   :  { %vm1256_vm7 = vmor %vm1254_vm6, %vm1255_vm5  ;;  %1584 = vmatpush.msrb.mxu2 %v3521_v32 }
0x10c2   :  { %v1251_v60 = vsub.f32 1.0, %v1250_v59  ;;  %1519 = vmatpush.msra.mxu3 %v3590_v51 }
0x10c3   :  { %1585 = vmatpush.msrb.mxu2 %v3527_v12 }
0x10c4   :  { %v1252_v61 = vmul.f32 %v2804_v58, %v1251_v60  ;;  %v3638_v60 = vld [vmem:[%s3893_s9] ss:$0 sm:$0xff] }
0x10c5   :  { %1586 = vmatpush.msrb.mxu2 %v3547_v44 }
0x10c6   :  { %v1253_v63 = vadd.f32 %v2804_v58, %v1252_v61  ;;  %v2680_v61 = vld [vmem:[%s3896_s12] ss:$0 sm:$0xff] }
0x10c7   :  { %1587 = vmatpush.msrb.mxu2 %v3556_v20 }
0x10c8   :  { %v1257_v14 = vsel %vm1256_vm7, %v2804_v58, %v1253_v63  ;;  %v3612_v58 = vld [vmem:[#allocation10] sm:$0xff] }
0x10c9   :  { %v1262_v62 = vsel %vm1259_vm8, %v1261_v25, %v1257_v14  ;;  %1724 = vmatpush.msra.mxu2 %v3521_v32 }
0x10ca   :  { %v1268_v8 = vmul.f32 %v1266_v18, %v1262_v62 }
0x10cb   :  { %1725 = vmatpush.msra.mxu2 %v3527_v12 }
0x10cd   :  { %1726 = vmatpush.msra.mxu2 %v3547_v44 }
0x10cf   :  { %1727 = vmatpush.msra.mxu2 %v3556_v20 }
0x10ec   :  { %v1337_v52 = vpop.permute.xlu2 %1336 }
0x10ed   :  { %v1339_v54 = vmul.f32 %v1337_v52, %v1328_v53  ;;  %v3595_v52 = vld [vmem:[#allocation10 + $0x8] sm:$0xff] }
0x10ee   :  { %1520 = vmatpush.msra.mxu3 %v3595_v52 }
0x10ef   :  { %1341 = vrot.lane.b32.xlu1 %v1339_v54, %s3072_s3 }
0x10f0   :  { %1521 = vmatpush.msra.mxu3 %v3612_v58 }
0x10f1   :  { %1522 = vmatmul.f32.vlgmr.msra.gmra.mxu3 %v3070_v10 }
0x10f2   :  { %1654 = vmatpush.msrb.mxu3 %v3588_v1 }
0x10f4   :  { %1655 = vmatpush.msrb.mxu3 %v3590_v51 }
0x10f6   :  { %1656 = vmatpush.msrb.mxu3 %v3595_v52 }
0x10f8   :  { %1657 = vmatpush.msrb.mxu3 %v3612_v58 }
0x10fa   :  { %1794 = vmatpush.msra.mxu3 %v3588_v1 }
0x10fc   :  { %1795 = vmatpush.msra.mxu3 %v3590_v51 }
0x10fe   :  { %1796 = vmatpush.msra.mxu3 %v3595_v52 }
0x1100   :  { %1797 = vmatpush.msra.mxu3 %v3612_v58 }
0x111e   :  { %v1271_v30 = vpop.permute.xlu0 %1270 }
0x111f   :  { %v1273_v15 = vmul.f32 %v1271_v30, %v1262_v62 }
0x1121   :  { %1275 = vrot.lane.b32.xlu2 %v1273_v15, %s3072_s3 }
0x1129   :  { %471 = vrot.lane.b32.xlu2 %v3307_v26, %s3072_s3 }
0x1131   :  { %919 = vrot.lane.b32.xlu2 %v3405_v21, %s3071_s6 }
0x1143   :  { %v1465_v63 = vpop.f32.mrf.mxu2 }
0x1161   :  { %v1342_v36 = vpop.permute.xlu1 %1341 }
0x1162   :  { %v1344_v27 = vadd.f32 %v1342_v36, %v1334_v28 }
0x1164   :  { %2805 = vtanh.f32 %v1344_v27 }
0x116a   :  { %v2806_v0 = vpop.eup %2805 }
0x116b   :  { %1347 = vrot.lane.b32.xlu0 %v2806_v0, %s3071_s6 }
0x1173   :  { %621 = vrot.lane.b32.xlu0 %v3345_v34, %s3072_s3 }
0x1174   :  { %v1523_v15 = vpop.f32.mrf.mxu3 }
0x1175   :  { %v1527_v6 = vrot.slane %v1523_v15, 2 }
0x117b   :  { %1064 = vrot.lane.b32.xlu0 %v3431_v7, %s3071_s6  ;;  %v1276_v26 = vpop.permute.xlu2 %1275 }
0x117c   :  { %v1278_v21 = vadd.f32 %v1276_v26, %v1268_v8 }
0x117e   :  { %2807 = vtanh.f32 %v1278_v21 }
0x1183   :  { %330 = vrot.lane.b32.xlu0 %v3274_v17, %s3071_s6  ;;  %v472_v5 = vpop.permute.xlu2 %471 }
0x1184   :  { %v2808_v39 = vpop.eup %2807  ;;  %475 = vst.msk [vmem:[#allocation2] sm:$0xc] %vm474_vm11, %v472_v5 }
0x1185   :  { %1281 = vrot.lane.b32.xlu1 %v2808_v39, %s3071_s6 }
0x118b   :  { %774 = vrot.lane.b32.xlu0 %v3375_v22, %s3071_s6  ;;  %v920_v16 = vpop.permute.xlu2 %919 }
0x118d   :  { %768 = vrot.lane.b32.xlu1 %v3379_v33, %s3072_s3 }
0x1195   :  { %1212 = vrot.lane.b32.xlu1 %v3457_v3, %s3071_s6 }
0x119d   :  { %477 = vrot.lane.b32.xlu1 %v3311_v29, %s3071_s6 }
0x11a5   :  { %1059 = vrot.lane.b32.xlu1 %v3435_v37, %s3072_s3  ;;  %v1370_v37 = vld [vmem:[%s3891_s7 + $0x38] sm:$0xff] }
0x11a6   :  { %1407 = vmatpush.msrb.mxu0 %v1370_v37 }
0x11a8   :  { %1408 = vmatpush.msrb.mxu0 %v1369_v38 }
0x11aa   :  { %1409 = vmatpush.msrb.mxu0 %v1368_v11 }
0x11ac   :  { %1410 = vmatpush.msrb.mxu0 %v1367_v40 }
0x11dd   :  { %v1348_v17 = vpop.permute.xlu0 %1347 }
0x11de   :  { %v3498_v34 = vmul.f32 %v1348_v17, %v1328_v53 }
0x11e0   :  { %1357 = vrot.lane.b32.xlu2 %v3498_v34, %s3071_s6 }
0x11e5   :  { %v622_v22 = vpop.permute.xlu0 %621 }
0x11e6   :  { %625 = vst.msk [vmem:[#allocation2] sm:$0x30] %vm624_vm12, %v622_v22 }
0x11e8   :  { %627 = vrot.lane.b32.xlu2 %v3341_v31, %s3071_s6  ;;  %v1383_v31 = vld [vmem:[%s3894_s10 + $0x38] sm:$0xff] }
0x11e9   :  { %1433 = vmatpush.msrb.mxu1 %v1383_v31 }
0x11ed   :  { %v1065_v33 = vpop.permute.xlu0 %1064 }
0x11ee   :  { %1067 = vst.msk [vmem:[#allocation2] sm:$0x30] %vm480_vm13, %v1065_v33 }
0x11f0   :  { %1207 = vrot.lane.b32.xlu2 %v3461_v9, %s3072_s3  ;;  %v1382_v9 = vld [vmem:[%s3894_s10 + $0x30] sm:$0xff] }
0x11f1   :  { %1434 = vmatpush.msrb.mxu1 %v1382_v9 }
0x11f3   :  { %1435 = vmatpush.msrb.mxu1 %v1381_v13 }
0x11f5   :  { %v331_v29 = vpop.permute.xlu0 %330  ;;  %1436 = vmatpush.msrb.mxu1 %v1380_v24 }
0x11f6   :  { %334 = vst.msk [vmem:[#allocation2 + $0x8] sm:$0xc0] %vm333_vm14, %v331_v29 }
0x11f7   :  { %v1282_v7 = vpop.permute.xlu1 %1281  ;;  %1437 = vmatpush.msrb.mxu1 %v1379_v45 }
0x11f8   :  { %v1284_v3 = vmul.f32 %v1282_v7, %v1262_v62 }
0x11f9   :  { %1438 = vmatpush.msrb.mxu1 %v1378_v19 }
0x11fa   :  { %1352 = vrot.lane.b32.xlu0 %v1284_v3, %s3072_s3 }
0x11fb   :  { %1439 = vmatpush.msrb.mxu1 %v1377_v48 }
0x11fd   :  { %v775_v41 = vpop.permute.xlu0 %774  ;;  %1440 = vmatpush.msrb.mxu1 %v1376_v50 }
0x11fe   :  { %778 = vst.msk [vmem:[#allocation2 + $0x8] sm:$0x3] %vm777_vm15, %v775_v41 }
0x11ff   :  { %917 = vst.msk [vmem:[#allocation2 + $0x8] sm:$0x3] %vm327_vm9, %v3411_v35  ;;  %v769_v42 = vpop.permute.xlu1 %768  ;;  %v1366_v35 = vld [vmem:[%s3891_s7 + $0x18] sm:$0xff]  ;;  %1934 = vmatpush.msra.mxu1 %v3588_v1  ;;  %vm1392_vm9 = vcmask 523264  }
0x1200   :  { %772 = vst.msk [vmem:[#allocation2] sm:$0xc0] %vm771_vm0, %v769_v42  ;;  %1411 = vmatpush.msrb.mxu0 %v1366_v35 }
0x1201   :  { %922 = vst.msk [vmem:[#allocation2] sm:$0xc0] %vm333_vm14, %v920_v16  ;;  %1935 = vmatpush.msra.mxu1 %v3590_v51 }
0x1202   :  { %1412 = vmatpush.msrb.mxu0 %v1365_v46 }
0x1203   :  { %1936 = vmatpush.msra.mxu1 %v3595_v52 }
0x1204   :  { %1413 = vmatpush.msrb.mxu0 %v1364_v47 }
0x1205   :  { %1937 = vmatpush.msra.mxu1 %v3612_v58 }
0x1206   :  { %1414 = vmatpush.msrb.mxu0 %v1363_v49 }
0x1207   :  { %v1213_v23 = vpop.permute.xlu1 %1212 }
0x1208   :  { %1215 = vst.msk [vmem:[#allocation2] sm:$0xc] %vm630_vm1, %v1213_v23  ;;  %1864 = vmatpush.msra.mxu0 %v3521_v32 }
0x120a   :  { %1865 = vmatpush.msra.mxu0 %v3527_v12 }
0x120c   :  { %1866 = vmatpush.msra.mxu0 %v3547_v44 }
0x120e   :  { %1867 = vmatpush.msra.mxu0 %v3556_v20 }
0x120f   :  { %v478_v43 = vpop.permute.xlu1 %477 }
0x1210   :  { %481 = vst.msk [vmem:[#allocation2 + $0x8] sm:$0x30] %vm480_vm13, %v478_v43 }
0x1217   :  { %v1060_v56 = vpop.permute.xlu1 %1059 }
0x123a   :  { %v1358_v53 = vpop.permute.xlu2 %1357 }
0x123b   :  { %1360 = vst.msk [vmem:[#allocation2] sm:$0x3] %vm777_vm15, %v1358_v53 }
0x1242   :  { %v628_v54 = vpop.permute.xlu2 %627  ;;  %v1361_v55 = vld [vmem:[#allocation2] sm:$0xff] }
0x1243   :  { %631 = vst.msk [vmem:[#allocation2 + $0x8] sm:$0xc] %vm630_vm1, %v628_v54  ;;  %2632 = vmatmul.msk.f32.vlgmr.msrb.gmra.mxu0 %vm1392_vm9, %v1361_v55  ;;  %2634 = vmatmul.msk.f32.vlgmr.msrb.gmra.mxu1 %vm1392_vm9, %v1361_v55 }
0x1244   :  { %1062 = vst.msk [vmem:[#allocation2 + $0x8] sm:$0xc] %vm474_vm11, %v1060_v56  ;;  %2136 = vmatpush.msrb.mxu0 %v3521_v32  ;;  %2206 = vmatpush.msrb.mxu1 %v3588_v1 }
0x1246   :  { %2137 = vmatpush.msrb.mxu0 %v3527_v12  ;;  %2207 = vmatpush.msrb.mxu1 %v3590_v51 }
0x1248   :  { %2138 = vmatpush.msrb.mxu0 %v3547_v44  ;;  %2208 = vmatpush.msrb.mxu1 %v3595_v52 }
0x124a   :  { %v1208_v57 = vpop.permute.xlu2 %1207  ;;  %2139 = vmatpush.msrb.mxu0 %v3556_v20  ;;  %2209 = vmatpush.msrb.mxu1 %v3612_v58 }
0x124b   :  { %1210 = vst.msk [vmem:[#allocation2 + $0x8] sm:$0x30] %vm624_vm12, %v1208_v57 }
0x126c   :  { %v3629_v10 = vpop.permute.xlu0 %1352 }
0x126d   :  { %1355 = vst.msk [vmem:[#allocation2 + $0x8] sm:$0xc0] %vm771_vm0, %v3629_v10 }
0x1274   :  { %v1362_v59 = vld [vmem:[#allocation2 + $0x8] sm:$0xff] }
0x1275   :  { %2633 = vmatmul.msk.f32.gmra.mxu0 %vm1392_vm9, %v1362_v59  ;;  %2635 = vmatmul.msk.f32.gmra.mxu1 %vm1392_vm9, %v1362_v59 }
0x12c0   :  { %v1416_v2 = vpop.f32.mrf.mxu0  ;;  %v1442_v4 = vpop.f32.mrf.mxu1 }
0x12c1   :  { %v3644_v14 = vadd.f32 %v3638_v60, %v1416_v2  ;;  %v3646_v25 = vadd.f32 %v2680_v61, %v1442_v4 }
0x12c3   :  { %v1468_v62 = vadd.f32 %v1465_v63, %v3644_v14 }
0x12c5   :  { %2809 = vtanh.f32 %v1468_v62  ;;  %v2636_v18 = vmul.f32 -1.442695, %v1468_v62 }
0x12cb   :  { %v2810_v30 = vpop.eup %2809 }
0x12cc   :  { %1491 = vrot.lane.b32.xlu1 %v2810_v30, %s3071_s6 }
0x12f2   :  { %v1445_v28 = vpop.f32.mrf.mxu1 }
0x12f3   :  { %v3650_v36 = vadd.f32 %v2680_v61, %v1445_v28 }
0x12f5   :  { %v1529_v27 = vadd.f32 %v1527_v6, %v3650_v36 }
0x12f7   :  { %2811 = vtanh.f32 %v1529_v27  ;;  %v2637_v5 = vmul.f32 -1.442695, %v1529_v27 }
0x12f8   :  { %2813 = vpow2.f32 %v2636_v18 }
0x12fd   :  { %v2812_v0 = vpop.eup %2811 }
0x12fe   :  { %1552 = vrot.lane.b32.xlu2 %v2812_v0, %s3071_s6  ;;  %v2814_v8 = vpop.eup %2813 }
0x12ff   :  { %v1472_v26 = vadd.f32 1.0, %v2814_v8 }
0x1301   :  { %2815 = vrcp.f32 %v1472_v26  ;;  %v1484_v37 = vand.u32 2147483648, %v1472_v26  ;;  %vm1478_vm3 = vweird.f32 %v1472_v26  ;;  %v1482_v31 = vand.u32 2147483647, %v1472_v26 }
0x1302   :  { %2817 = vpow2.f32 %v2637_v5 }
0x1303   :  { %v1485_v3 = vor.u32 1.1754944e-38, %v1484_v37  ;;  %vm1483_vm5 = vcmp.eq.f32.partialorder %v1482_v31, 8.507059e+37 }
0x1307   :  { %v2816_v21 = vpop.eup %2815 }
0x1308   :  { %v1474_v39 = vmul.f32 %v2816_v21, %v1472_v26  ;;  %v2818_v33 = vpop.eup %2817  ;;  %vm1479_vm2 = vweird.f32 %v2816_v21 }
0x1309   :  { %v1533_v7 = vadd.f32 1.0, %v2818_v33  ;;  %vm1480_vm4 = vmor %vm1478_vm3, %vm1479_vm2 }
0x130a   :  { %v1475_v17 = vsub.f32 1.0, %v1474_v39 }
0x130b   :  { %2819 = vrcp.f32 %v1533_v7  ;;  %v1545_v23 = vand.u32 2147483648, %v1533_v7  ;;  %vm1539_vm7 = vweird.f32 %v1533_v7  ;;  %v1543_v43 = vand.u32 2147483647, %v1533_v7 }
0x130c   :  { %v1476_v22 = vmul.f32 %v2816_v21, %v1475_v17 }
0x130d   :  { %v1546_v45 = vor.u32 1.1754944e-38, %v1545_v23  ;;  %vm1544_vm11 = vcmp.eq.f32.partialorder %v1543_v43, 8.507059e+37 }
0x130e   :  { %v1477_v29 = vadd.f32 %v2816_v21, %v1476_v22 }
0x1310   :  { %v1481_v38 = vsel %vm1480_vm4, %v2816_v21, %v1477_v29 }
0x1311   :  { %v1486_v11 = vsel %vm1483_vm5, %v1485_v3, %v1481_v38  ;;  %v2820_v40 = vpop.eup %2819 }
0x1312   :  { %v1535_v24 = vmul.f32 %v2820_v40, %v1533_v7  ;;  %vm1540_vm6 = vweird.f32 %v2820_v40  ;;  %v1489_v48 = vmul.f32 0.0, %v1486_v11 }
0x1313   :  { %vm1541_vm8 = vmor %vm1539_vm7, %vm1540_vm6 }
0x1314   :  { %v1536_v41 = vsub.f32 1.0, %v1535_v24 }
0x1316   :  { %v1537_v42 = vmul.f32 %v2820_v40, %v1536_v41 }
0x1318   :  { %v1538_v16 = vadd.f32 %v2820_v40, %v1537_v42 }
0x131a   :  { %v1542_v35 = vsel %vm1541_vm8, %v2820_v40, %v1538_v16 }
0x131b   :  { %v1547_v19 = vsel %vm1544_vm11, %v1546_v45, %v1542_v35 }
0x131c   :  { %v1550_v54 = vmul.f32 0.0, %v1547_v19 }
0x133e   :  { %v1492_v9 = vpop.permute.xlu1 %1491 }
0x133f   :  { %v1494_v13 = vmul.f32 %v1492_v9, %v1486_v11 }
0x1341   :  { %1496 = vrot.lane.b32.xlu0 %v1494_v13, %s3072_s3 }
0x1358   :  { %v1553_v46 = vpop.permute.xlu2 %1552 }
0x1359   :  { %v1555_v47 = vmul.f32 %v1553_v46, %v1547_v19 }
0x135b   :  { %1557 = vrot.lane.b32.xlu1 %v1555_v47, %s3072_s3 }
0x13b3   :  { %v1497_v49 = vpop.permute.xlu0 %1496 }
0x13b4   :  { %v3656_v50 = vadd.f32 %v1497_v49, %v1489_v48 }
0x13b6   :  { %2821 = vtanh.f32 %v3656_v50 }
0x13bc   :  { %v2822_v53 = vpop.eup %2821 }
0x13bd   :  { %1502 = vrot.lane.b32.xlu2 %v2822_v53, %s3071_s6 }
0x13cd   :  { %v1558_v55 = vpop.permute.xlu1 %1557 }
0x13ce   :  { %v3660_v56 = vadd.f32 %v1558_v55, %v1550_v54  ;;  %v1617_v54 = vrot.slane %v3656_v50, 6 }
0x13d0   :  { %2823 = vtanh.f32 %v3660_v56 }
0x13d6   :  { %v2824_v57 = vpop.eup %2823 }
0x13d7   :  { %1563 = vrot.lane.b32.xlu0 %v2824_v57, %s3071_s6 }
0x1417   :  { %v1503_v59 = vpop.permute.xlu2 %1502 }
0x1418   :  { %v1505_v61 = vmul.f32 %v1503_v59, %v1486_v11 }
0x141a   :  { %1568 = vrot.lane.b32.xlu1 %v1505_v61, %s3072_s3 }
0x1449   :  { %v1564_v63 = vpop.permute.xlu0 %1563 }
0x144a   :  { %v1566_v2 = vmul.f32 %v1564_v63, %v1547_v19  ;;  %v1687_v63 = vrot.slane %v3660_v56, 2 }
0x144c   :  { %v1637_v4 = vrot.slane %v1566_v2, 6 }
0x144e   :  { %1638 = vrot.lane.b32.xlu2 %v1637_v4, %s3072_s3 }
0x148c   :  { %v1569_v62 = vpop.permute.xlu1 %1568 }
0x148d   :  { %2638 = vmatmul.msk.f32.vlgmr.msrb.gmra.mxu2 %vm200_vm10, %v1569_v62 }
0x148e   :  { %2001 = vmatpush.msrb.mxu2 %v3521_v32 }
0x1490   :  { %2002 = vmatpush.msrb.mxu2 %v3527_v12 }
0x1492   :  { %2003 = vmatpush.msrb.mxu2 %v3547_v44 }
0x1494   :  { %2004 = vmatpush.msrb.mxu2 %v3556_v20 }
0x14a8   :  { %v1639_v30 = vpop.permute.xlu2 %1638 }
0x14a9   :  { %2640 = vmatmul.msk.f32.vlgmr.msrb.gmra.mxu3 %vm200_vm10, %v1639_v30 }
0x14aa   :  { %2067 = vmatpush.msrb.mxu3 %v3588_v1 }
0x14ac   :  { %2068 = vmatpush.msrb.mxu3 %v3590_v51 }
0x14ae   :  { %2069 = vmatpush.msrb.mxu3 %v3595_v52 }
0x14b0   :  { %2070 = vmatpush.msrb.mxu3 %v3612_v58 }
0x1510   :  { %v1589_v15 = vpop.f32.mrf.mxu2 }
0x1511   :  { %v1593_v6 = vrot.slane %v1589_v15, 6 }
0x1513   :  { %v1595_v28 = vadd.f32 %v1593_v6, %v3644_v14 }
0x1515   :  { %2825 = vtanh.f32 %v1595_v28  ;;  %v2639_v21 = vmul.f32 -1.442695, %v1595_v28 }
0x151b   :  { %v2826_v27 = vpop.eup %2825 }
0x151c   :  { %1621 = vrot.lane.b32.xlu0 %v2826_v27, %s3071_s6 }
0x152c   :  { %v1659_v0 = vpop.f32.mrf.mxu3 }
0x152d   :  { %v1663_v18 = vrot.slane %v1659_v0, 4 }
0x152f   :  { %v1665_v8 = vadd.f32 %v1663_v18, %v3650_v36 }
0x1531   :  { %2827 = vtanh.f32 %v1665_v8  ;;  %v2641_v33 = vmul.f32 -1.442695, %v1665_v8 }
0x1532   :  { %2829 = vpow2.f32 %v2639_v21 }
0x1537   :  { %v2828_v26 = vpop.eup %2827 }
0x1538   :  { %1691 = vrot.lane.b32.xlu1 %v2828_v26, %s3071_s6  ;;  %v2830_v5 = vpop.eup %2829 }
0x1539   :  { %v1599_v39 = vadd.f32 1.0, %v2830_v5 }
0x153b   :  { %2831 = vrcp.f32 %v1599_v39  ;;  %v1611_v38 = vand.u32 2147483648, %v1599_v39  ;;  %vm1605_vm13 = vweird.f32 %v1599_v39  ;;  %v1609_v3 = vand.u32 2147483647, %v1599_v39 }
0x153c   :  { %2833 = vpow2.f32 %v2641_v33 }
0x153d   :  { %v1612_v13 = vor.u32 1.1754944e-38, %v1611_v38  ;;  %vm1610_vm15 = vcmp.eq.f32.partialorder %v1609_v3, 8.507059e+37 }
0x1541   :  { %v2832_v17 = vpop.eup %2831 }
0x1542   :  { %v1601_v22 = vmul.f32 %v2832_v17, %v1599_v39  ;;  %v2834_v37 = vpop.eup %2833  ;;  %vm1606_vm12 = vweird.f32 %v2832_v17 }
0x1543   :  { %v1669_v9 = vadd.f32 1.0, %v2834_v37  ;;  %vm1607_vm14 = vmor %vm1605_vm13, %vm1606_vm12 }
0x1544   :  { %v1602_v29 = vsub.f32 1.0, %v1601_v22 }
0x1545   :  { %2835 = vrcp.f32 %v1669_v9  ;;  %v1681_v45 = vand.u32 2147483648, %v1669_v9  ;;  %vm1675_vm1 = vweird.f32 %v1669_v9  ;;  %v1679_v46 = vand.u32 2147483647, %v1669_v9 }
0x1546   :  { %v1603_v7 = vmul.f32 %v2832_v17, %v1602_v29 }
0x1547   :  { %v1682_v47 = vor.u32 1.1754944e-38, %v1681_v45  ;;  %vm1680_vm3 = vcmp.eq.f32.partialorder %v1679_v46, 8.507059e+37 }
0x1548   :  { %v1604_v31 = vadd.f32 %v2832_v17, %v1603_v7 }
0x154a   :  { %v1608_v11 = vsel %vm1607_vm14, %v2832_v17, %v1604_v31 }
0x154b   :  { %v1613_v40 = vsel %vm1610_vm15, %v1612_v13, %v1608_v11  ;;  %v2836_v42 = vpop.eup %2835 }
0x154c   :  { %v1671_v16 = vmul.f32 %v2836_v42, %v1669_v9  ;;  %vm1676_vm0 = vweird.f32 %v2836_v42  ;;  %v1619_v55 = vmul.f32 %v1617_v54, %v1613_v40 }
0x154d   :  { %vm1677_vm2 = vmor %vm1675_vm1, %vm1676_vm0 }
0x154e   :  { %v1672_v23 = vsub.f32 1.0, %v1671_v16 }
0x1550   :  { %v1673_v43 = vmul.f32 %v2836_v42, %v1672_v23 }
0x1552   :  { %v1674_v35 = vadd.f32 %v2836_v42, %v1673_v43 }
0x1554   :  { %v1678_v19 = vsel %vm1677_vm2, %v2836_v42, %v1674_v35 }
0x1555   :  { %v1683_v49 = vsel %vm1680_vm3, %v1682_v47, %v1678_v19 }
0x1556   :  { %v1689_v2 = vmul.f32 %v1687_v63, %v1683_v49 }
0x158e   :  { %v1622_v24 = vpop.permute.xlu0 %1621 }
0x158f   :  { %v1624_v41 = vmul.f32 %v1622_v24, %v1613_v40 }
0x1591   :  { %1626 = vrot.lane.b32.xlu2 %v1624_v41, %s3072_s3 }
0x15aa   :  { %v1692_v48 = vpop.permute.xlu1 %1691 }
0x15ab   :  { %v1694_v53 = vmul.f32 %v1692_v48, %v1683_v49 }
0x15ad   :  { %1696 = vrot.lane.b32.xlu0 %v1694_v53, %s3072_s3 }
0x15eb   :  { %v1627_v57 = vpop.permute.xlu2 %1626 }
0x15ec   :  { %v3683_v59 = vadd.f32 %v1627_v57, %v1619_v55 }
0x15ee   :  { %2837 = vtanh.f32 %v3683_v59 }
0x15f4   :  { %v2838_v61 = vpop.eup %2837 }
0x15f5   :  { %1632 = vrot.lane.b32.xlu1 %v2838_v61, %s3071_s6 }
0x161f   :  { %v1697_v4 = vpop.permute.xlu0 %1696 }
0x1620   :  { %v3688_v62 = vadd.f32 %v1697_v4, %v1689_v2  ;;  %v1757_v4 = vrot.slane %v3683_v59, 6 }
0x1622   :  { %2839 = vtanh.f32 %v3688_v62 }
0x1628   :  { %v2840_v30 = vpop.eup %2839 }
0x1629   :  { %1702 = vrot.lane.b32.xlu2 %v2840_v30, %s3071_s6 }
0x1667   :  { %v1633_v50 = vpop.permute.xlu1 %1632 }
0x1668   :  { %v1635_v15 = vmul.f32 %v1633_v50, %v1613_v40 }
0x166a   :  { %v1707_v6 = vrot.slane %v1635_v15, 2 }
0x166c   :  { %1708 = vrot.lane.b32.xlu0 %v1707_v6, %s3072_s3 }
0x1683   :  { %v1703_v28 = vpop.permute.xlu2 %1702 }
0x1684   :  { %v1705_v27 = vmul.f32 %v1703_v28, %v1683_v49  ;;  %v1827_v28 = vrot.slane %v3688_v62, 2 }
0x1686   :  { %v1777_v0 = vrot.slane %v1705_v27, 4 }
0x1688   :  { %1778 = vrot.lane.b32.xlu1 %v1777_v0, %s3072_s3 }
0x16de   :  { %v1709_v56 = vpop.permute.xlu0 %1708 }
0x16df   :  { %2642 = vmatmul.msk.f32.vlgmr.msra.gmra.mxu2 %vm200_vm10, %v1709_v56 }
0x16e0   :  { %2276 = vmatpush.msra.mxu2 %v3521_v32 }
0x16e2   :  { %2277 = vmatpush.msra.mxu2 %v3527_v12 }
0x16e4   :  { %2278 = vmatpush.msra.mxu2 %v3547_v44 }
0x16e6   :  { %2279 = vmatpush.msra.mxu2 %v3556_v20 }
0x16fa   :  { %v1779_v18 = vpop.permute.xlu1 %1778 }
0x16fb   :  { %2644 = vmatmul.msk.f32.vlgmr.msra.gmra.mxu3 %vm200_vm10, %v1779_v18 }
0x16fc   :  { %2346 = vmatpush.msra.mxu3 %v3588_v1 }
0x16fe   :  { %2347 = vmatpush.msra.mxu3 %v3590_v51 }
0x1700   :  { %2348 = vmatpush.msra.mxu3 %v3595_v52 }
0x1702   :  { %2349 = vmatpush.msra.mxu3 %v3612_v58 }
0x1762   :  { %v1729_v8 = vpop.f32.mrf.mxu2 }
0x1763   :  { %v1733_v26 = vrot.slane %v1729_v8, 4 }
0x1765   :  { %v1735_v21 = vadd.f32 %v1733_v26, %v3644_v14 }
0x1767   :  { %2841 = vtanh.f32 %v1735_v21  ;;  %v2643_v29 = vmul.f32 -1.442695, %v1735_v21 }
0x176d   :  { %v2842_v5 = vpop.eup %2841 }
0x176e   :  { %1761 = vrot.lane.b32.xlu2 %v2842_v5, %s3071_s6 }
0x177e   :  { %v1799_v39 = vpop.f32.mrf.mxu3 }
0x177f   :  { %v1803_v17 = vrot.slane %v1799_v39, 6 }
0x1781   :  { %v1805_v22 = vadd.f32 %v1803_v17, %v3650_v36 }
0x1783   :  { %2843 = vtanh.f32 %v1805_v22  ;;  %v2645_v43 = vmul.f32 -1.442695, %v1805_v22  ;;  %v3732_v22 = vpop.f32.mrf.mxu0 }
0x1784   :  { %2845 = vpow2.f32 %v2643_v29 }
0x1789   :  { %v2844_v33 = vpop.eup %2843 }
0x178a   :  { %1831 = vrot.lane.b32.xlu0 %v2844_v33, %s3071_s6  ;;  %v2846_v7 = vpop.eup %2845 }
0x178b   :  { %v1739_v37 = vadd.f32 1.0, %v2846_v7 }
0x178d   :  { %2847 = vrcp.f32 %v1739_v37  ;;  %v1751_v13 = vand.u32 2147483648, %v1739_v37  ;;  %vm1745_vm5 = vweird.f32 %v1739_v37  ;;  %v1749_v40 = vand.u32 2147483647, %v1739_v37 }
0x178e   :  { %2849 = vpow2.f32 %v2645_v43 }
0x178f   :  { %v1752_v41 = vor.u32 1.1754944e-38, %v1751_v13  ;;  %vm1750_vm7 = vcmp.eq.f32.partialorder %v1749_v40, 8.507059e+37 }
0x1793   :  { %v2848_v31 = vpop.eup %2847 }
0x1794   :  { %v1741_v38 = vmul.f32 %v2848_v31, %v1739_v37  ;;  %vm1746_vm4 = vweird.f32 %v2848_v31  ;;  %v2850_v35 = vpop.eup %2849 }
0x1795   :  { %vm1747_vm6 = vmor %vm1745_vm5, %vm1746_vm4  ;;  %v1809_v45 = vadd.f32 1.0, %v2850_v35 }
0x1796   :  { %v1742_v3 = vsub.f32 1.0, %v1741_v38 }
0x1797   :  { %2851 = vrcp.f32 %v1809_v45  ;;  %v1821_v53 = vand.u32 2147483648, %v1809_v45  ;;  %vm1815_vm11 = vweird.f32 %v1809_v45  ;;  %v1819_v54 = vand.u32 2147483647, %v1809_v45 }
0x1798   :  { %v1743_v9 = vmul.f32 %v2848_v31, %v1742_v3 }
0x1799   :  { %v1822_v57 = vor.u32 1.1754944e-38, %v1821_v53  ;;  %vm1820_vm13 = vcmp.eq.f32.partialorder %v1819_v54, 8.507059e+37 }
0x179a   :  { %v1744_v11 = vadd.f32 %v2848_v31, %v1743_v9 }
0x179c   :  { %v1748_v24 = vsel %vm1747_vm6, %v2848_v31, %v1744_v11 }
0x179d   :  { %v1753_v16 = vsel %vm1750_vm7, %v1752_v41, %v1748_v24  ;;  %v2852_v46 = vpop.eup %2851 }
0x179e   :  { %v1811_v19 = vmul.f32 %v2852_v46, %v1809_v45  ;;  %vm1816_vm8 = vweird.f32 %v2852_v46  ;;  %v1759_v30 = vmul.f32 %v1757_v4, %v1753_v16 }
0x179f   :  { %vm1817_vm12 = vmor %vm1815_vm11, %vm1816_vm8 }
0x17a0   :  { %v1812_v47 = vsub.f32 1.0, %v1811_v19 }
0x17a2   :  { %v1813_v48 = vmul.f32 %v2852_v46, %v1812_v47 }
0x17a4   :  { %v1814_v49 = vadd.f32 %v2852_v46, %v1813_v48 }
0x17a6   :  { %v1818_v55 = vsel %vm1817_vm12, %v2852_v46, %v1814_v49 }
0x17a7   :  { %v1823_v61 = vsel %vm1820_vm13, %v1822_v57, %v1818_v55 }
0x17a8   :  { %v1829_v27 = vmul.f32 %v1827_v28, %v1823_v61 }
0x17c8   :  { %v1762_v42 = vpop.permute.xlu2 %1761 }
0x17c9   :  { %v1764_v23 = vmul.f32 %v1762_v42, %v1753_v16 }
0x17cb   :  { %1766 = vrot.lane.b32.xlu1 %v1764_v23, %s3072_s3 }
0x17fc   :  { %v1832_v63 = vpop.permute.xlu0 %1831 }
0x17fd   :  { %v1834_v2 = vmul.f32 %v1832_v63, %v1823_v61 }
0x17ff   :  { %1836 = vrot.lane.b32.xlu2 %v1834_v2, %s3072_s3 }
0x183d   :  { %v1767_v50 = vpop.permute.xlu1 %1766 }
0x183e   :  { %v3711_v15 = vadd.f32 %v1767_v50, %v1759_v30 }
0x1840   :  { %2853 = vtanh.f32 %v3711_v15  ;;  %v1897_v57 = vrot.slane %v3711_v15, 6 }
0x1846   :  { %v2854_v6 = vpop.eup %2853 }
0x1847   :  { %1772 = vrot.lane.b32.xlu0 %v2854_v6, %s3071_s6 }
0x1859   :  { %v1837_v0 = vpop.permute.xlu2 %1836 }
0x185a   :  { %v3716_v56 = vadd.f32 %v1837_v0, %v1829_v27 }
0x185c   :  { %2855 = vtanh.f32 %v3716_v56  ;;  %v1964_v30 = vrot.slane %v3716_v56, 2 }
0x1862   :  { %v2856_v18 = vpop.eup %2855 }
0x1863   :  { %1842 = vrot.lane.b32.xlu1 %v2856_v18, %s3071_s6 }
0x18b9   :  { %v1773_v59 = vpop.permute.xlu0 %1772 }
0x18ba   :  { %v1775_v8 = vmul.f32 %v1773_v59, %v1753_v16 }
0x18bc   :  { %v1847_v26 = vrot.slane %v1775_v8, 4 }
0x18be   :  { %1848 = vrot.lane.b32.xlu2 %v1847_v26, %s3072_s3 }
0x18d5   :  { %v1843_v21 = vpop.permute.xlu1 %1842 }
0x18d6   :  { %v1845_v5 = vmul.f32 %v1843_v21, %v1823_v61  ;;  %v3756_v21 = vadd.f32 %v3638_v60, %v3732_v22 }
0x18d8   :  { %v1917_v39 = vrot.slane %v1845_v5, 2 }
0x18da   :  { %1918 = vrot.lane.b32.xlu0 %v1917_v39, %s3072_s3 }
0x1918   :  { %v1849_v62 = vpop.permute.xlu2 %1848 }
0x1919   :  { %2646 = vmatmul.msk.f32.vlgmr.msra.gmra.mxu0 %vm200_vm10, %v1849_v62 }
0x191a   :  { %2416 = vmatpush.msra.mxu0 %v3521_v32 }
0x191c   :  { %2417 = vmatpush.msra.mxu0 %v3527_v12 }
0x191e   :  { %2418 = vmatpush.msra.mxu0 %v3547_v44 }
0x1920   :  { %2419 = vmatpush.msra.mxu0 %v3556_v20 }
0x194c   :  { %v1919_v17 = vpop.permute.xlu0 %1918 }
0x194d   :  { %2648 = vmatmul.msk.f32.vlgmr.msra.gmra.mxu1 %vm200_vm10, %v1919_v17 }
0x194e   :  { %2486 = vmatpush.msra.mxu1 %v3588_v1 }
0x1950   :  { %2487 = vmatpush.msra.mxu1 %v3590_v51 }
0x1952   :  { %2488 = vmatpush.msra.mxu1 %v3595_v52 }
0x1954   :  { %2489 = vmatpush.msra.mxu1 %v3612_v58 }
0x1996   :  { %v1869_v32 = vpop.f32.mrf.mxu0 }
0x1997   :  { %v1873_v33 = vrot.slane %v1869_v32, 2 }
0x1999   :  { %v1875_v12 = vadd.f32 %v1873_v33, %v3644_v14 }
0x199b   :  { %2857 = vtanh.f32 %v1875_v12  ;;  %v2647_v51 = vmul.f32 -1.442695, %v1875_v12 }
0x19a1   :  { %v2858_v44 = vpop.eup %2857 }
0x19a2   :  { %1901 = vrot.lane.b32.xlu1 %v2858_v44, %s3071_s6 }
0x19ca   :  { %v1939_v20 = vpop.f32.mrf.mxu1 }
0x19cb   :  { %v1942_v29 = vadd.f32 %v1939_v20, %v3650_v36 }
0x19cd   :  { %2859 = vtanh.f32 %v1942_v29  ;;  %v2649_v37 = vmul.f32 -1.442695, %v1942_v29 }
0x19ce   :  { %2861 = vpow2.f32 %v2647_v51 }
0x19d3   :  { %v2860_v1 = vpop.eup %2859 }
0x19d4   :  { %1968 = vrot.lane.b32.xlu2 %v2860_v1, %s3071_s6  ;;  %v2862_v52 = vpop.eup %2861 }
0x19d5   :  { %v1879_v58 = vadd.f32 1.0, %v2862_v52 }
0x19d7   :  { %2863 = vrcp.f32 %v1879_v58  ;;  %v1891_v36 = vand.u32 2147483648, %v1879_v58  ;;  %vm1885_vm15 = vweird.f32 %v1879_v58  ;;  %v1889_v13 = vand.u32 2147483647, %v1879_v58 }
0x19d8   :  { %2865 = vpow2.f32 %v2649_v37 }
0x19d9   :  { %v1892_v24 = vor.u32 1.1754944e-38, %v1891_v36  ;;  %vm1890_vm1 = vcmp.eq.f32.partialorder %v1889_v13, 8.507059e+37 }
0x19dd   :  { %v2864_v7 = vpop.eup %2863 }
0x19de   :  { %v1881_v31 = vmul.f32 %v2864_v7, %v1879_v58  ;;  %v2866_v3 = vpop.eup %2865  ;;  %vm1886_vm14 = vweird.f32 %v2864_v7 }
0x19df   :  { %v1946_v11 = vadd.f32 1.0, %v2866_v3  ;;  %vm1887_vm0 = vmor %vm1885_vm15, %vm1886_vm14 }
0x19e0   :  { %v1882_v14 = vsub.f32 1.0, %v1881_v31 }
0x19e1   :  { %2867 = vrcp.f32 %v1946_v11  ;;  %v1958_v19 = vand.u32 2147483648, %v1946_v11  ;;  %vm1952_vm3 = vweird.f32 %v1946_v11  ;;  %v1956_v47 = vand.u32 2147483647, %v1946_v11 }
0x19e2   :  { %v1883_v38 = vmul.f32 %v2864_v7, %v1882_v14 }
0x19e3   :  { %v1959_v49 = vor.u32 1.1754944e-38, %v1958_v19  ;;  %vm1957_vm5 = vcmp.eq.f32.partialorder %v1956_v47, 8.507059e+37 }
0x19e4   :  { %v1884_v9 = vadd.f32 %v2864_v7, %v1883_v38 }
0x19e6   :  { %v1888_v40 = vsel %vm1887_vm0, %v2864_v7, %v1884_v9 }
0x19e7   :  { %v1893_v42 = vsel %vm1890_vm1, %v1892_v24, %v1888_v40  ;;  %v2868_v23 = vpop.eup %2867 }
0x19e8   :  { %v1948_v43 = vmul.f32 %v2868_v23, %v1946_v11  ;;  %vm1953_vm2 = vweird.f32 %v2868_v23  ;;  %v1899_v61 = vmul.f32 %v1897_v57, %v1893_v42 }
0x19e9   :  { %vm1954_vm4 = vmor %vm1952_vm3, %vm1953_vm2 }
0x19ea   :  { %v1949_v35 = vsub.f32 1.0, %v1948_v43 }
0x19ec   :  { %v1950_v45 = vmul.f32 %v2868_v23, %v1949_v35 }
0x19ee   :  { %v1951_v46 = vadd.f32 %v2868_v23, %v1950_v45 }
0x19f0   :  { %v1955_v48 = vsel %vm1954_vm4, %v2868_v23, %v1951_v46 }
0x19f1   :  { %v1960_v54 = vsel %vm1957_vm5, %v1959_v49, %v1955_v48 }
0x19f2   :  { %v1966_v50 = vmul.f32 %v1964_v30, %v1960_v54 }
0x1a14   :  { %v1902_v41 = vpop.permute.xlu1 %1901 }
0x1a15   :  { %v1904_v16 = vmul.f32 %v1902_v41, %v1893_v42 }
0x1a17   :  { %1906 = vrot.lane.b32.xlu0 %v1904_v16, %s3072_s3 }
0x1a2e   :  { %v1969_v53 = vpop.permute.xlu2 %1968 }
0x1a2f   :  { %v1971_v55 = vmul.f32 %v1969_v53, %v1960_v54 }
0x1a31   :  { %1973 = vrot.lane.b32.xlu1 %v1971_v55, %s3072_s3 }
0x1a89   :  { %v1907_v63 = vpop.permute.xlu0 %1906 }
0x1a8a   :  { %v3741_v2 = vadd.f32 %v1907_v63, %v1899_v61 }
0x1a8c   :  { %2869 = vtanh.f32 %v3741_v2  ;;  %v2031_v47 = vrot.slane %v3741_v2, 6 }
0x1a92   :  { %v2870_v4 = vpop.eup %2869 }
0x1a93   :  { %1912 = vrot.lane.b32.xlu2 %v2870_v4, %s3071_s6 }
0x1aa3   :  { %v1974_v6 = vpop.permute.xlu1 %1973 }
0x1aa4   :  { %v3746_v28 = vadd.f32 %v1974_v6, %v1966_v50 }
0x1aa6   :  { %2871 = vtanh.f32 %v3746_v28  ;;  %v2100_v55 = vrot.slane %v3746_v28, 2 }
0x1aac   :  { %v2872_v27 = vpop.eup %2871 }
0x1aad   :  { %1979 = vrot.lane.b32.xlu0 %v2872_v27, %s3071_s6 }
0x1aed   :  { %v1913_v15 = vpop.permute.xlu2 %1912 }
0x1aee   :  { %v1915_v0 = vmul.f32 %v1913_v15, %v1893_v42 }
0x1af0   :  { %v1984_v18 = vrot.slane %v1915_v0, 6 }
0x1af2   :  { %1985 = vrot.lane.b32.xlu1 %v1984_v18, %s3072_s3 }
0x1b1f   :  { %v1980_v59 = vpop.permute.xlu0 %1979 }
0x1b20   :  { %v1982_v8 = vmul.f32 %v1980_v59, %v1960_v54 }
0x1b22   :  { %2051 = vrot.lane.b32.xlu2 %v1982_v8, %s3072_s3 }
0x1b64   :  { %v1986_v26 = vpop.permute.xlu1 %1985 }
0x1b65   :  { %2650 = vmatmul.msk.f32.vlgmr.msrb.gmra.mxu2 %vm200_vm10, %v1986_v26 }
0x1b7c   :  { %v2052_v56 = vpop.permute.xlu2 %2051 }
0x1b7d   :  { %2652 = vmatmul.msk.f32.vlgmr.msrb.gmra.mxu3 %vm200_vm10, %v2052_v56 }
0x1be8   :  { %v2006_v5 = vpop.f32.mrf.mxu2 }
0x1be9   :  { %v2009_v39 = vadd.f32 %v2006_v5, %v3756_v21 }
0x1beb   :  { %2873 = vtanh.f32 %v2009_v39  ;;  %v2651_v44 = vmul.f32 -1.442695, %v2009_v39 }
0x1bf1   :  { %v2874_v62 = vpop.eup %2873 }
0x1bf2   :  { %2035 = vrot.lane.b32.xlu0 %v2874_v62, %s3071_s6 }
0x1c00   :  { %v2072_v17 = vpop.f32.mrf.mxu3 }
0x1c01   :  { %v2076_v32 = vrot.slane %v2072_v17, 2 }
0x1c03   :  { %v2078_v33 = vadd.f32 %v2076_v32, %v3646_v25 }
0x1c05   :  { %2875 = vtanh.f32 %v2078_v33  ;;  %v2653_v29 = vmul.f32 -1.442695, %v2078_v33 }
0x1c06   :  { %2877 = vpow2.f32 %v2651_v44 }
0x1c0b   :  { %v2876_v12 = vpop.eup %2875 }
0x1c0c   :  { %2104 = vrot.lane.b32.xlu1 %v2876_v12, %s3071_s6  ;;  %v2878_v20 = vpop.eup %2877 }
0x1c0d   :  { %v2013_v60 = vadd.f32 1.0, %v2878_v20 }
0x1c0f   :  { %2879 = vrcp.f32 %v2013_v60  ;;  %v2025_v31 = vand.u32 2147483648, %v2013_v60  ;;  %vm2019_vm7 = vweird.f32 %v2013_v60  ;;  %v2023_v14 = vand.u32 2147483647, %v2013_v60 }
0x1c10   :  { %2881 = vpow2.f32 %v2653_v29 }
0x1c11   :  { %v2026_v3 = vor.u32 1.1754944e-38, %v2025_v31  ;;  %vm2024_vm11 = vcmp.eq.f32.partialorder %v2023_v14, 8.507059e+37 }
0x1c15   :  { %v2880_v22 = vpop.eup %2879 }
0x1c16   :  { %v2015_v1 = vmul.f32 %v2880_v22, %v2013_v60  ;;  %v2882_v58 = vpop.eup %2881  ;;  %vm2020_vm6 = vweird.f32 %v2880_v22 }
0x1c17   :  { %v2082_v37 = vadd.f32 1.0, %v2882_v58  ;;  %vm2021_vm8 = vmor %vm2019_vm7, %vm2020_vm6 }
0x1c18   :  { %v2016_v51 = vsub.f32 1.0, %v2015_v1 }
0x1c19   :  { %2883 = vrcp.f32 %v2082_v37  ;;  %v2094_v16 = vand.u32 2147483648, %v2082_v37  ;;  %vm2088_vm13 = vweird.f32 %v2082_v37  ;;  %v2092_v23 = vand.u32 2147483647, %v2082_v37 }
0x1c1a   :  { %v2017_v52 = vmul.f32 %v2880_v22, %v2016_v51 }
0x1c1b   :  { %v2095_v35 = vor.u32 1.1754944e-38, %v2094_v16  ;;  %vm2093_vm15 = vcmp.eq.f32.partialorder %v2092_v23, 8.507059e+37 }
0x1c1c   :  { %v2018_v7 = vadd.f32 %v2880_v22, %v2017_v52 }
0x1c1e   :  { %v2022_v38 = vsel %vm2021_vm8, %v2880_v22, %v2018_v7 }
0x1c1f   :  { %v2027_v9 = vsel %vm2024_vm11, %v2026_v3, %v2022_v38  ;;  %v2884_v13 = vpop.eup %2883 }
0x1c20   :  { %v2084_v40 = vmul.f32 %v2884_v13, %v2082_v37  ;;  %vm2089_vm12 = vweird.f32 %v2884_v13  ;;  %v2033_v48 = vmul.f32 %v2031_v47, %v2027_v9 }
0x1c21   :  { %vm2090_vm14 = vmor %vm2088_vm13, %vm2089_vm12 }
0x1c22   :  { %v2085_v24 = vsub.f32 1.0, %v2084_v40 }
0x1c24   :  { %v2086_v41 = vmul.f32 %v2884_v13, %v2085_v24 }
0x1c26   :  { %v2087_v42 = vadd.f32 %v2884_v13, %v2086_v41 }
0x1c28   :  { %v2091_v43 = vsel %vm2090_vm14, %v2884_v13, %v2087_v42 }
0x1c29   :  { %v2096_v46 = vsel %vm2093_vm15, %v2095_v35, %v2091_v43 }
0x1c2a   :  { %v2102_v57 = vmul.f32 %v2100_v55, %v2096_v46 }
0x1c64   :  { %v2036_v11 = vpop.permute.xlu0 %2035 }
0x1c65   :  { %v2038_v36 = vmul.f32 %v2036_v11, %v2027_v9 }
0x1c67   :  { %2040 = vrot.lane.b32.xlu2 %v2038_v36, %s3072_s3 }
0x1c7e   :  { %v2105_v45 = vpop.permute.xlu1 %2104 }
0x1c7f   :  { %v2107_v19 = vmul.f32 %v2105_v45, %v2096_v46 }
0x1c81   :  { %2109 = vrot.lane.b32.xlu0 %v2107_v19, %s3072_s3 }
0x1cc1   :  { %v2041_v49 = vpop.permute.xlu2 %2040 }
0x1cc2   :  { %v3765_v53 = vadd.f32 %v2041_v49, %v2033_v48 }
0x1cc4   :  { %2885 = vtanh.f32 %v3765_v53  ;;  %v2169_v43 = vrot.slane %v3765_v53, 6 }
0x1cca   :  { %v2886_v54 = vpop.eup %2885 }
0x1ccb   :  { %2046 = vrot.lane.b32.xlu1 %v2886_v54, %s3071_s6 }
0x1cf3   :  { %v2110_v61 = vpop.permute.xlu0 %2109 }
0x1cf4   :  { %v3770_v63 = vadd.f32 %v2110_v61, %v2102_v57 }
0x1cf6   :  { %2887 = vtanh.f32 %v3770_v63  ;;  %v2239_v47 = vrot.slane %v3770_v63, 2 }
0x1cfc   :  { %v2888_v4 = vpop.eup %2887 }
0x1cfd   :  { %2115 = vrot.lane.b32.xlu2 %v2888_v4, %s3071_s6 }
0x1d3d   :  { %v2047_v2 = vpop.permute.xlu1 %2046 }
0x1d3e   :  { %v2049_v30 = vmul.f32 %v2047_v2, %v2027_v9 }
0x1d40   :  { %2120 = vrot.lane.b32.xlu0 %v2049_v30, %s3072_s3 }
0x1d57   :  { %v2116_v50 = vpop.permute.xlu2 %2115 }
0x1d58   :  { %v2118_v6 = vmul.f32 %v2116_v50, %v2096_v46 }
0x1d5a   :  { %v2189_v27 = vrot.slane %v2118_v6, 6 }
0x1d5c   :  { %2190 = vrot.lane.b32.xlu1 %v2189_v27, %s3072_s3 }
0x1db2   :  { %v2121_v15 = vpop.permute.xlu0 %2120 }
0x1db3   :  { %2654 = vmatmul.msk.f32.vlgmr.msrb.gmra.mxu0 %vm200_vm10, %v2121_v15 }
0x1dce   :  { %v2191_v28 = vpop.permute.xlu1 %2190 }
0x1dcf   :  { %2656 = vmatmul.msk.f32.vlgmr.msrb.gmra.mxu1 %vm200_vm10, %v2191_v28 }
0x1e30   :  { %v2141_v0 = vpop.f32.mrf.mxu0 }
0x1e31   :  { %v2145_v18 = vrot.slane %v2141_v0, 6 }
0x1e33   :  { %v2147_v59 = vadd.f32 %v2145_v18, %v3756_v21 }
0x1e35   :  { %2889 = vtanh.f32 %v2147_v59  ;;  %v2655_v62 = vmul.f32 -1.442695, %v2147_v59 }
0x1e3b   :  { %v2890_v8 = vpop.eup %2889 }
0x1e3c   :  { %2173 = vrot.lane.b32.xlu2 %v2890_v8, %s3071_s6 }
0x1e4c   :  { %v2211_v26 = vpop.f32.mrf.mxu1 }
0x1e4d   :  { %v2215_v56 = vrot.slane %v2211_v26, 4 }
0x1e4f   :  { %v2217_v5 = vadd.f32 %v2215_v56, %v3646_v25 }
0x1e51   :  { %2891 = vtanh.f32 %v2217_v5  ;;  %v2657_v37 = vmul.f32 -1.442695, %v2217_v5 }
0x1e52   :  { %2893 = vpow2.f32 %v2655_v62 }
0x1e57   :  { %v2892_v39 = vpop.eup %2891 }
0x1e58   :  { %2243 = vrot.lane.b32.xlu0 %v2892_v39, %s3071_s6  ;;  %v2894_v17 = vpop.eup %2893 }
0x1e59   :  { %v2151_v32 = vadd.f32 1.0, %v2894_v17 }
0x1e5b   :  { %2895 = vrcp.f32 %v2151_v32  ;;  %v2163_v22 = vand.u32 2147483648, %v2151_v32  ;;  %vm2157_vm1 = vweird.f32 %v2151_v32  ;;  %v2161_v29 = vand.u32 2147483647, %v2151_v32 }
0x1e5c   :  { %2897 = vpow2.f32 %v2657_v37 }
0x1e5d   :  { %v2164_v51 = vor.u32 1.1754944e-38, %v2163_v22  ;;  %vm2162_vm3 = vcmp.eq.f32.partialorder %v2161_v29, 8.507059e+37 }
0x1e61   :  { %v2896_v33 = vpop.eup %2895 }
0x1e62   :  { %v2153_v12 = vmul.f32 %v2896_v33, %v2151_v32  ;;  %vm2158_vm0 = vweird.f32 %v2896_v33  ;;  %v2898_v31 = vpop.eup %2897 }
0x1e63   :  { %vm2159_vm2 = vmor %vm2157_vm1, %vm2158_vm0  ;;  %v2221_v14 = vadd.f32 1.0, %v2898_v31 }
0x1e64   :  { %v2154_v44 = vsub.f32 1.0, %v2153_v12 }
0x1e65   :  { %2899 = vrcp.f32 %v2221_v14  ;;  %v2233_v13 = vand.u32 2147483648, %v2221_v14  ;;  %vm2227_vm5 = vweird.f32 %v2221_v14  ;;  %v2231_v40 = vand.u32 2147483647, %v2221_v14 }
0x1e66   :  { %v2155_v20 = vmul.f32 %v2896_v33, %v2154_v44 }
0x1e67   :  { %v2234_v41 = vor.u32 1.1754944e-38, %v2233_v13  ;;  %vm2232_vm7 = vcmp.eq.f32.partialorder %v2231_v40, 8.507059e+37 }
0x1e68   :  { %v2156_v60 = vadd.f32 %v2896_v33, %v2155_v20 }
0x1e6a   :  { %v2160_v1 = vsel %vm2159_vm2, %v2896_v33, %v2156_v60 }
0x1e6b   :  { %v2165_v58 = vsel %vm2162_vm3, %v2164_v51, %v2160_v1  ;;  %v2900_v38 = vpop.eup %2899 }
0x1e6c   :  { %v2223_v3 = vmul.f32 %v2900_v38, %v2221_v14  ;;  %vm2228_vm4 = vweird.f32 %v2900_v38  ;;  %v2171_v35 = vmul.f32 %v2169_v43, %v2165_v58 }
0x1e6d   :  { %vm2229_vm6 = vmor %vm2227_vm5, %vm2228_vm4 }
0x1e6e   :  { %v2224_v9 = vsub.f32 1.0, %v2223_v3 }
0x1e70   :  { %v2225_v11 = vmul.f32 %v2900_v38, %v2224_v9 }
0x1e72   :  { %v2226_v36 = vadd.f32 %v2900_v38, %v2225_v11 }
0x1e74   :  { %v2230_v24 = vsel %vm2229_vm6, %v2900_v38, %v2226_v36 }
0x1e75   :  { %v2235_v42 = vsel %vm2232_vm7, %v2234_v41, %v2230_v24 }
0x1e76   :  { %v2241_v48 = vmul.f32 %v2239_v47, %v2235_v42 }
0x1e96   :  { %v2174_v52 = vpop.permute.xlu2 %2173 }
0x1e97   :  { %v2176_v7 = vmul.f32 %v2174_v52, %v2165_v58 }
0x1e99   :  { %2178 = vrot.lane.b32.xlu1 %v2176_v7, %s3072_s3 }
0x1eca   :  { %v2244_v16 = vpop.permute.xlu0 %2243 }
0x1ecb   :  { %v2246_v23 = vmul.f32 %v2244_v16, %v2235_v42 }
0x1ecd   :  { %2248 = vrot.lane.b32.xlu2 %v2246_v23, %s3072_s3 }
0x1f0b   :  { %v2179_v45 = vpop.permute.xlu1 %2178 }
0x1f0c   :  { %v3785_v46 = vadd.f32 %v2179_v45, %v2171_v35 }
0x1f0e   :  { %2901 = vtanh.f32 %v3785_v46  ;;  %v2309_v41 = vrot.slane %v3785_v46, 6 }
0x1f14   :  { %v2902_v19 = vpop.eup %2901 }
0x1f15   :  { %2184 = vrot.lane.b32.xlu0 %v2902_v19, %s3071_s6 }
0x1f27   :  { %v2249_v49 = vpop.permute.xlu2 %2248 }
0x1f28   :  { %v3790_v54 = vadd.f32 %v2249_v49, %v2241_v48 }
0x1f2a   :  { %2903 = vtanh.f32 %v3790_v54  ;;  %v2379_v35 = vrot.slane %v3790_v54, 2 }
0x1f30   :  { %v2904_v55 = vpop.eup %2903 }
0x1f31   :  { %2254 = vrot.lane.b32.xlu1 %v2904_v55, %s3071_s6 }
0x1f87   :  { %v2185_v53 = vpop.permute.xlu0 %2184 }
0x1f88   :  { %v2187_v57 = vmul.f32 %v2185_v53, %v2165_v58 }
0x1f8a   :  { %v2259_v61 = vrot.slane %v2187_v57, 2 }
0x1f8c   :  { %2260 = vrot.lane.b32.xlu2 %v2259_v61, %s3072_s3 }
0x1fa3   :  { %v2255_v4 = vpop.permute.xlu1 %2254 }
0x1fa4   :  { %v2257_v2 = vmul.f32 %v2255_v4, %v2235_v42 }
0x1fa6   :  { %v2329_v30 = vrot.slane %v2257_v2, 4 }
0x1fa8   :  { %2330 = vrot.lane.b32.xlu0 %v2329_v30, %s3072_s3 }
0x1fe6   :  { %v2261_v63 = vpop.permute.xlu2 %2260 }
0x1fe7   :  { %2658 = vmatmul.msk.f32.vlgmr.msra.gmra.mxu2 %vm200_vm10, %v2261_v63 }
0x201a   :  { %v2331_v50 = vpop.permute.xlu0 %2330 }
0x201b   :  { %2660 = vmatmul.msk.f32.vlgmr.msra.gmra.mxu3 %vm200_vm10, %v2331_v50 }
0x206a   :  { %v2281_v6 = vpop.f32.mrf.mxu2 }
0x206b   :  { %v2285_v27 = vrot.slane %v2281_v6, 4 }
0x206d   :  { %v2287_v15 = vadd.f32 %v2285_v27, %v3756_v21 }
0x206f   :  { %2905 = vtanh.f32 %v2287_v15  ;;  %v2659_v26 = vmul.f32 -1.442695, %v2287_v15 }
0x2075   :  { %v2906_v28 = vpop.eup %2905 }
0x2076   :  { %2313 = vrot.lane.b32.xlu1 %v2906_v28, %s3071_s6 }
0x209e   :  { %v2351_v0 = vpop.f32.mrf.mxu3 }
0x209f   :  { %v2355_v18 = vrot.slane %v2351_v0, 6 }
0x20a1   :  { %v2357_v59 = vadd.f32 %v2355_v18, %v3646_v25 }
0x20a3   :  { %2907 = vtanh.f32 %v2357_v59  ;;  %v2661_v17 = vmul.f32 -1.442695, %v2357_v59 }
0x20a4   :  { %2909 = vpow2.f32 %v2659_v26 }
0x20a9   :  { %v2908_v8 = vpop.eup %2907 }
0x20aa   :  { %2383 = vrot.lane.b32.xlu2 %v2908_v8, %s3071_s6  ;;  %v2910_v56 = vpop.eup %2909 }
0x20ab   :  { %v2291_v5 = vadd.f32 1.0, %v2910_v56 }
0x20ad   :  { %2911 = vrcp.f32 %v2291_v5  ;;  %v2303_v20 = vand.u32 2147483648, %v2291_v5  ;;  %vm2297_vm11 = vweird.f32 %v2291_v5  ;;  %v2301_v60 = vand.u32 2147483647, %v2291_v5 }
0x20ae   :  { %2913 = vpow2.f32 %v2661_v17 }
0x20af   :  { %v2304_v1 = vor.u32 1.1754944e-38, %v2303_v20  ;;  %vm2302_vm13 = vcmp.eq.f32.partialorder %v2301_v60, 8.507059e+37 }
0x20b3   :  { %v2912_v39 = vpop.eup %2911 }
0x20b4   :  { %v2293_v62 = vmul.f32 %v2912_v39, %v2291_v5  ;;  %v2914_v12 = vpop.eup %2913  ;;  %vm2298_vm8 = vweird.f32 %v2912_v39 }
0x20b5   :  { %v2361_v22 = vadd.f32 1.0, %v2914_v12  ;;  %vm2299_vm12 = vmor %vm2297_vm11, %vm2298_vm8 }
0x20b6   :  { %v2294_v32 = vsub.f32 1.0, %v2293_v62 }
0x20b7   :  { %2915 = vrcp.f32 %v2361_v22  ;;  %v2373_v3 = vand.u32 2147483648, %v2361_v22  ;;  %vm2367_vm15 = vweird.f32 %v2361_v22  ;;  %v2371_v9 = vand.u32 2147483647, %v2361_v22 }
0x20b8   :  { %v2295_v33 = vmul.f32 %v2912_v39, %v2294_v32 }
0x20b9   :  { %v2374_v36 = vor.u32 1.1754944e-38, %v2373_v3  ;;  %vm2372_vm1 = vcmp.eq.f32.partialorder %v2371_v9, 8.507059e+37  ;;  %v2535_v3 = vrot.slane %v3498_v34, 2  ;;  %v2565_v34 = vld [vmem:[%s3897_s13 + $0x78] sm:$0xff] }
0x20ba   :  { %v2296_v44 = vadd.f32 %v2912_v39, %v2295_v33  ;;  %2569 = vmatpush.msrb.mxu2 %v2565_v34 }
0x20bc   :  { %v2300_v29 = vsel %vm2299_vm12, %v2912_v39, %v2296_v44  ;;  %vm2548_vm12 = vcmask 785408  }
0x20bd   :  { %v2305_v52 = vsel %vm2302_vm13, %v2304_v1, %v2300_v29  ;;  %v2916_v7 = vpop.eup %2915  ;;  %vm2589_vm13 = vcmask 1024  }
0x20be   :  { %v2363_v37 = vmul.f32 %v2916_v7, %v2361_v22  ;;  %vm2368_vm14 = vweird.f32 %v2916_v7  ;;  %v2311_v42 = vmul.f32 %v2309_v41, %v2305_v52 }
0x20bf   :  { %vm2369_vm0 = vmor %vm2367_vm15, %vm2368_vm14 }
0x20c0   :  { %v2364_v31 = vsub.f32 1.0, %v2363_v37 }
0x20c2   :  { %v2365_v14 = vmul.f32 %v2916_v7, %v2364_v31 }
0x20c4   :  { %v2366_v38 = vadd.f32 %v2916_v7, %v2365_v14 }
0x20c6   :  { %v2370_v11 = vsel %vm2369_vm0, %v2916_v7, %v2366_v38 }
0x20c7   :  { %v2375_v40 = vsel %vm2372_vm1, %v2374_v36, %v2370_v11 }
0x20c8   :  { %v2381_v45 = vmul.f32 %v2379_v35, %v2375_v40  ;;  %v2563_v35 = vld [vmem:[%s3897_s13 + $0x68] sm:$0xff] }
0x20e8   :  { %v2314_v51 = vpop.permute.xlu1 %2313 }
0x20e9   :  { %v2316_v58 = vmul.f32 %v2314_v51, %v2305_v52 }
0x20eb   :  { %2318 = vrot.lane.b32.xlu0 %v2316_v58, %s3072_s3 }
0x2104   :  { %v2384_v13 = vpop.permute.xlu2 %2383 }
0x2105   :  { %v2386_v24 = vmul.f32 %v2384_v13, %v2375_v40 }
0x2107   :  { %2388 = vrot.lane.b32.xlu1 %v2386_v24, %s3072_s3 }
0x215d   :  { %v2319_v16 = vpop.permute.xlu0 %2318 }
0x215e   :  { %v3805_v23 = vadd.f32 %v2319_v16, %v2311_v42 }
0x2160   :  { %2917 = vtanh.f32 %v3805_v23  ;;  %v2449_v9 = vrot.slane %v3805_v23, 6  ;;  %v2564_v23 = vld [vmem:[%s3897_s13 + $0x70] sm:$0xff] }
0x2161   :  { %2570 = vmatpush.msrb.mxu2 %v2564_v23 }
0x2163   :  { %2571 = vmatpush.msrb.mxu2 %v2563_v35 }
0x2166   :  { %v2918_v43 = vpop.eup %2917 }
0x2167   :  { %2324 = vrot.lane.b32.xlu2 %v2918_v43, %s3071_s6 }
0x2179   :  { %v2389_v19 = vpop.permute.xlu1 %2388 }
0x217a   :  { %v3810_v47 = vadd.f32 %v2389_v19, %v2381_v45 }
0x217c   :  { %2919 = vtanh.f32 %v3810_v47  ;;  %v2516_v24 = vrot.slane %v3810_v47, 2  ;;  %v2562_v47 = vld [vmem:[%s3897_s13 + $0x60] sm:$0xff] }
0x217d   :  { %2572 = vmatpush.msrb.mxu2 %v2562_v47 }
0x2182   :  { %v2920_v48 = vpop.eup %2919 }
0x2183   :  { %2394 = vrot.lane.b32.xlu0 %v2920_v48, %s3071_s6  ;;  %v2561_v48 = vld [vmem:[%s3897_s13 + $0x58] sm:$0xff] }
0x2184   :  { %2573 = vmatpush.msrb.mxu2 %v2561_v48 }
0x21c1   :  { %v2325_v46 = vpop.permute.xlu2 %2324 }
0x21c2   :  { %v2327_v49 = vmul.f32 %v2325_v46, %v2305_v52  ;;  %v2560_v46 = vld [vmem:[%s3897_s13 + $0x50] sm:$0xff] }
0x21c3   :  { %2574 = vmatpush.msrb.mxu2 %v2560_v46 }
0x21c4   :  { %v2399_v55 = vrot.slane %v2327_v49, 4  ;;  %v2559_v49 = vld [vmem:[%s3897_s13 + $0x48] sm:$0xff] }
0x21c5   :  { %2575 = vmatpush.msrb.mxu2 %v2559_v49 }
0x21c6   :  { %2400 = vrot.lane.b32.xlu1 %v2399_v55, %s3072_s3  ;;  %v2558_v55 = vld [vmem:[%s3897_s13 + $0x40] sm:$0xff] }
0x21c7   :  { %2576 = vmatpush.msrb.mxu2 %v2558_v55 }
0x21f5   :  { %v2395_v53 = vpop.permute.xlu0 %2394 }
0x21f6   :  { %v2397_v57 = vmul.f32 %v2395_v53, %v2375_v40  ;;  %v2557_v53 = vld [vmem:[%s3897_s13 + $0x38] sm:$0xff] }
0x21f7   :  { %2577 = vmatpush.msrb.mxu2 %v2557_v53 }
0x21f8   :  { %v2469_v61 = vrot.slane %v2397_v57, 2  ;;  %v2556_v57 = vld [vmem:[%s3897_s13 + $0x30] sm:$0xff] }
0x21f9   :  { %2578 = vmatpush.msrb.mxu2 %v2556_v57 }
0x21fa   :  { %2470 = vrot.lane.b32.xlu2 %v2469_v61, %s3072_s3  ;;  %v2555_v61 = vld [vmem:[%s3897_s13 + $0x28] sm:$0xff] }
0x21fb   :  { %2579 = vmatpush.msrb.mxu2 %v2555_v61 }
0x2238   :  { %v2401_v54 = vpop.permute.xlu1 %2400 }
0x2239   :  { %2662 = vmatmul.msk.f32.vlgmr.msra.gmra.mxu0 %vm200_vm10, %v2401_v54  ;;  %v2554_v54 = vld [vmem:[%s3897_s13 + $0x20] sm:$0xff] }
0x223a   :  { %2580 = vmatpush.msrb.mxu2 %v2554_v54 }
0x2254   :  { %v2471_v4 = vpop.permute.xlu2 %2470 }
0x2255   :  { %2664 = vmatmul.msk.f32.vlgmr.msra.gmra.mxu1 %vm200_vm10, %v2471_v4  ;;  %v2553_v4 = vld [vmem:[%s3897_s13 + $0x18] sm:$0xff] }
0x2256   :  { %2581 = vmatpush.msrb.mxu2 %v2553_v4 }
0x22b6   :  { %v2421_v2 = vpop.f32.mrf.mxu0 }
0x22b7   :  { %v2425_v30 = vrot.slane %v2421_v2, 2  ;;  %v2552_v2 = vld [vmem:[%s3897_s13 + $0x10] sm:$0xff] }
0x22b8   :  { %2582 = vmatpush.msrb.mxu2 %v2552_v2 }
0x22b9   :  { %v2427_v63 = vadd.f32 %v2425_v30, %v3756_v21  ;;  %v2551_v30 = vld [vmem:[%s3897_s13 + $0x8] sm:$0xff] }
0x22ba   :  { %2583 = vmatpush.msrb.mxu2 %v2551_v30 }
0x22bb   :  { %2921 = vtanh.f32 %v2427_v63  ;;  %v2663_v28 = vmul.f32 -1.442695, %v2427_v63  ;;  %v2550_v63 = vld [vmem:[%s3897_s13] sm:$0xff] }
0x22bc   :  { %2584 = vmatpush.msrb.mxu2 %v2550_v63 }
0x22c1   :  { %v2922_v50 = vpop.eup %2921 }
0x22c2   :  { %2453 = vrot.lane.b32.xlu0 %v2922_v50, %s3071_s6 }
0x22d2   :  { %v2491_v6 = vpop.f32.mrf.mxu1 }
0x22d3   :  { %v2494_v27 = vadd.f32 %v2491_v6, %v3646_v25 }
0x22d5   :  { %2923 = vtanh.f32 %v2494_v27  ;;  %v2665_v8 = vmul.f32 -1.442695, %v2494_v27 }
0x22d6   :  { %2925 = vpow2.f32 %v2663_v28 }
0x22db   :  { %v2924_v15 = vpop.eup %2923 }
0x22dc   :  { %2520 = vrot.lane.b32.xlu1 %v2924_v15, %s3071_s6  ;;  %v2926_v0 = vpop.eup %2925 }
0x22dd   :  { %v2431_v18 = vadd.f32 1.0, %v2926_v0 }
0x22df   :  { %2927 = vrcp.f32 %v2431_v18  ;;  %v2443_v25 = vand.u32 2147483648, %v2431_v18  ;;  %vm2437_vm3 = vweird.f32 %v2431_v18  ;;  %v2441_v17 = vand.u32 2147483647, %v2431_v18 }
0x22e0   :  { %2929 = vpow2.f32 %v2665_v8 }
0x22e1   :  { %v2444_v33 = vor.u32 1.1754944e-38, %v2443_v25  ;;  %vm2442_vm5 = vcmp.eq.f32.partialorder %v2441_v17, 8.507059e+37 }
0x22e5   :  { %v2928_v59 = vpop.eup %2927 }
0x22e6   :  { %v2433_v26 = vmul.f32 %v2928_v59, %v2431_v18  ;;  %v2930_v5 = vpop.eup %2929  ;;  %vm2438_vm2 = vweird.f32 %v2928_v59 }
0x22e7   :  { %v2498_v62 = vadd.f32 1.0, %v2930_v5  ;;  %vm2439_vm4 = vmor %vm2437_vm3, %vm2438_vm2 }
0x22e8   :  { %v2434_v21 = vsub.f32 1.0, %v2433_v26 }
0x22e9   :  { %2931 = vrcp.f32 %v2498_v62  ;;  %v2510_v52 = vand.u32 2147483648, %v2498_v62  ;;  %vm2504_vm7 = vweird.f32 %v2498_v62  ;;  %v2508_v58 = vand.u32 2147483647, %v2498_v62 }
0x22ea   :  { %v2435_v56 = vmul.f32 %v2928_v59, %v2434_v21 }
0x22eb   :  { %v2511_v37 = vor.u32 1.1754944e-38, %v2510_v52  ;;  %vm2509_vm11 = vcmp.eq.f32.partialorder %v2508_v58, 8.507059e+37 }
0x22ec   :  { %v2436_v39 = vadd.f32 %v2928_v59, %v2435_v56 }
0x22ee   :  { %v2440_v32 = vsel %vm2439_vm4, %v2928_v59, %v2436_v39 }
0x22ef   :  { %v2445_v12 = vsel %vm2442_vm5, %v2444_v33, %v2440_v32  ;;  %v2932_v60 = vpop.eup %2931 }
0x22f0   :  { %v2500_v22 = vmul.f32 %v2932_v60, %v2498_v62  ;;  %vm2505_vm6 = vweird.f32 %v2932_v60  ;;  %v2451_v11 = vmul.f32 %v2449_v9, %v2445_v12 }
0x22f1   :  { %vm2506_vm8 = vmor %vm2504_vm7, %vm2505_vm6 }
0x22f2   :  { %v2501_v29 = vsub.f32 1.0, %v2500_v22 }
0x22f4   :  { %v2502_v1 = vmul.f32 %v2932_v60, %v2501_v29 }
0x22f6   :  { %v2503_v51 = vadd.f32 %v2932_v60, %v2502_v1 }
0x22f8   :  { %v2507_v7 = vsel %vm2506_vm8, %v2932_v60, %v2503_v51 }
0x22f9   :  { %v2512_v14 = vsel %vm2509_vm11, %v2511_v37, %v2507_v7 }
0x22fa   :  { %v2518_v41 = vmul.f32 %v2516_v24, %v2512_v14 }
0x2334   :  { %v2454_v44 = vpop.permute.xlu0 %2453 }
0x2335   :  { %v2456_v20 = vmul.f32 %v2454_v44, %v2445_v12 }
0x2337   :  { %2458 = vrot.lane.b32.xlu2 %v2456_v20, %s3072_s3 }
0x234e   :  { %v2521_v31 = vpop.permute.xlu1 %2520 }
0x234f   :  { %v2523_v38 = vmul.f32 %v2521_v31, %v2512_v14 }
0x2351   :  { %2525 = vrot.lane.b32.xlu0 %v2523_v38, %s3072_s3 }
0x2359   :  { %2536 = vrot.lane.b32.xlu0 %v2535_v3, %s3071_s6 }
0x2391   :  { %v2459_v36 = vpop.permute.xlu2 %2458 }
0x2392   :  { %v2461_v13 = vadd.f32 %v2459_v36, %v2451_v11 }
0x2394   :  { %2933 = vtanh.f32 %v2461_v13 }
0x239a   :  { %v2934_v40 = vpop.eup %2933 }
0x239b   :  { %2464 = vrot.lane.b32.xlu1 %v2934_v40, %s3071_s6 }
0x23c3   :  { %v2526_v42 = vpop.permute.xlu0 %2525 }
0x23c4   :  { %v2528_v16 = vadd.f32 %v2526_v42, %v2518_v41 }
0x23c6   :  { %2935 = vtanh.f32 %v2528_v16 }
0x23cb   :  { %v2537_v27 = vpop.permute.xlu0 %2536 }
0x23cc   :  { %v2936_v43 = vpop.eup %2935  ;;  %v2546_v15 = vsel %vm200_vm10, %v3629_v10, %v2537_v27 }
0x23cd   :  { %2531 = vrot.lane.b32.xlu2 %v2936_v43, %s3071_s6  ;;  %s3073_s6 = smov 96  }
0x240d   :  { %v2465_v45 = vpop.permute.xlu1 %2464 }
0x240e   :  { %v2467_v19 = vmul.f32 %v2465_v45, %v2445_v12 }
0x2410   :  { %2540 = vrot.lane.b32.xlu1 %v2467_v19, %s3073_s6 }
0x2427   :  { %v2532_v50 = vpop.permute.xlu2 %2531 }
0x2428   :  { %v2534_v6 = vmul.f32 %v2532_v50, %v2512_v14 }
0x242a   :  { %v2544_v28 = vrot.slane %v2534_v6, 2 }
0x2482   :  { %v2541_v0 = vpop.permute.xlu1 %2540 }
0x2483   :  { %v2547_v18 = vsel %vm1392_vm9, %v2546_v15, %v2541_v0 }
0x2484   :  { %v2549_v59 = vsel %vm2548_vm12, %v2547_v18, %v2544_v28 }
0x2485   :  { %v2567_v8 = vrot.slane %v2549_v59, 6 }
0x2487   :  { %2585 = vmatmul.f32.vlgmr.msrb.gmra.mxu2 %v2567_v8 }
0x250a   :  { %v2586_v26 = vpop.f32.mrf.mxu2 }
0x250b   :  { %2590 = vst.msk [vmem:[%s3898_s14] sm:$0x3] %vm2589_vm13, %v2586_v26 }
0x250c   :  { %2595 = vsyncpa [#allocation4], 1 }
0x250d   :  { %2596 = vsyncpa [#allocation6], 1 }
0x250e   :  { %2597 = vsyncpa [#allocation9], 1 }

</bundles_post_ra>
